<compile_context>
chip_gen: v7x
topology: tpu7x:2x2x1
jax: 0.10.0
libtpu: 0.0.40
codegen_flags: <defaults>
</compile_context>

<pallas_src>
import numpy as np
import jax
import jax.numpy as jnp
from jax.experimental import pallas as pl
from jax.experimental.pallas import tpu as pltpu


def _full_spec(shape):
    nd = len(shape)
    return pl.BlockSpec(tuple(shape), lambda *_: (0,) * nd)


# --------------------------- parameter packing helpers ---------------------------

def _pack_bidir_gru(p, B):
    """Pack one bidirectional GRU layer for the fused-direction recurrence."""
    H = p["w_hh"].shape[1]
    wih = jnp.concatenate([p["w_ih"].T, p["w_ih_r"].T], axis=1)        # (In, 6H)
    whh = jnp.concatenate([p["w_hh"].T, p["w_hh_r"].T], axis=1)        # (H, 6H)
    zH = jnp.zeros((H,), jnp.float32)
    # fold b_ih (all gates) + b_hh (r,z gates only) into the hoisted projection
    bias_f = p["b_ih"] + jnp.concatenate([p["b_hh"][:2 * H], zH])
    bias_b = p["b_ih_r"] + jnp.concatenate([p["b_hh_r"][:2 * H], zH])
    bias6 = jnp.concatenate([bias_f, bias_b]).reshape(1, 6 * H)        # (1, 6H)
    # n-gate hidden bias must stay inside the recurrence (it is multiplied by r)
    bhh_n = jnp.concatenate(
        [jnp.broadcast_to(p["b_hh"][2 * H:].reshape(1, H), (B, H)),
         jnp.broadcast_to(p["b_hh_r"][2 * H:].reshape(1, H), (B, H))],
        axis=0)                                                        # (2B, H)
    return wih, whh, bias6, bhh_n


# --------------------- fused model forward + loss (one pallas_call) ---------------------

def fused_forward_and_loss(params, U, qmask, umask, target):
    """U: (S,B,D_m), qmask unused, umask: (B,S) 0/1, target: (S*B,) seq-major.
    Returns (log_prob (S,B,C), alpha (S,B,S), [], [], emotions (S,B,2H), loss)."""
    del qmask
    S, B, D_m = U.shape
    H = params["gru_l0"]["w_hh"].shape[1]
    M = 2 * H
    D_h = params["lin_w"].shape[0]
    C = params["fc_w"].shape[0]

    wih0, whh0, b60, bn0 = _pack_bidir_gru(params["gru_l0"], B)
    wih1, whh1, b61, bn1 = _pack_bidir_gru(params["gru_l1"], B)
    wt, bt = params["att_w"].T, params["att_b"].reshape(1, M)
    wl, bl = params["lin_w"].T, params["lin_b"].reshape(1, D_h)
    ws, bs = params["fc_w"].T, params["fc_b"].reshape(1, C)

    u_flat = U.reshape(S * B, D_m)                      # seq-major rows (t, b)
    tgt_sm = target.reshape(S * B, 1).astype(jnp.int32)
    msk_sm = jnp.transpose(umask).reshape(S * B, 1).astype(jnp.float32)

    def kernel(u_ref, wih0_ref, whh0_ref, b60_ref, bn0_ref,
               wih1_ref, whh1_ref, b61_ref, bn1_ref,
               um_ref, tgt_ref, msk_ref,
               wt_ref, bt_ref, wl_ref, bl_ref, ws_ref, bs_ref,
               em_ref, lp_ref, al_ref, loss_ref):

        def bi_gru(x, wih_r_, b6_r_, whh_r_, bn_r_):
            # Both directions fused: hidden is (2B, H); one MXU issue per step.
            gi_all = jnp.dot(x, wih_r_[...],
                             preferred_element_type=jnp.float32) + b6_r_[...]
            gi_f, gi_b = gi_all[:, :3 * H], gi_all[:, 3 * H:]
            whh = whh_r_[...]               # (H, 6H) = [whh_f.T | whh_r.T]
            bhh_n = bn_r_[...]              # (2B, H)
            h = jnp.zeros((2 * B, H), jnp.float32)
            hs = []
            for t in range(S):
                tb = S - 1 - t
                gi = jnp.concatenate([gi_f[t * B:(t + 1) * B],
                                      gi_b[tb * B:(tb + 1) * B]], axis=0)
                gh2 = jnp.dot(h, whh, preferred_element_type=jnp.float32)
                gh = jnp.concatenate([gh2[:B, :3 * H], gh2[B:, 3 * H:]], axis=0)
                r = jax.nn.sigmoid(gi[:, :H] + gh[:, :H])
                z = jax.nn.sigmoid(gi[:, H:2 * H] + gh[:, H:2 * H])
                n = jnp.tanh(gi[:, 2 * H:] + r * (gh[:, 2 * H:] + bhh_n))
                h = (1.0 - z) * n + z * h
                hs.append(h)                # hs[t][:B]=fwd(t), hs[t][B:]=bwd(S-1-t)
            return hs

        # ---- bi-GRU layer 0 (outputs stay in registers) ----------------------
        hs0 = bi_gru(u_ref[...], wih0_ref, b60_ref, whh0_ref, bn0_ref)
        f0 = jnp.concatenate([hs0[t][:B] for t in range(S)], axis=0)          # (S*B,H)
        b0 = jnp.concatenate([hs0[S - 1 - t][B:] for t in range(S)], axis=0)  # (S*B,H)
        x1 = jnp.concatenate([f0, b0], axis=-1)                               # (S*B,2H)

        # ---- bi-GRU layer 1 ---------------------------------------------------
        hs1 = bi_gru(x1, wih1_ref, b61_ref, whh1_ref, bn1_ref)
        em_list = []                                       # per-batch (S, M) memories
        for b in range(B):
            fb = jnp.concatenate([hs1[t][b:b + 1] for t in range(S)], axis=0)
            bb = jnp.concatenate([hs1[S - 1 - t][B + b:B + b + 1]
                                  for t in range(S)], axis=0)
            em_list.append(jnp.concatenate([fb, bb], axis=-1))
        em_bsm = jnp.stack(em_list, axis=0)                 # (B, S, M) for attention
        em_sm = jnp.stack(em_list, axis=1).reshape(S * B, M)  # seq-major output slab
        em_ref[...] = em_sm

        # ---- MatchingAttention('general2'): all query timesteps at once -------
        um = um_ref[...]                                    # (B, S) 0/1 mask
        xt = (jnp.dot(em_bsm.reshape(B * S, M), wt_ref[...],
                      preferred_element_type=jnp.float32)
              + bt_ref[...]).reshape(B, S, M)
        scores = jnp.einsum('btm,bsm->bts', xt, em_bsm,
                            preferred_element_type=jnp.float32)
        # tanh-bounded scores -> max-subtract safely skipped; the intermediate
        # unmasked softmax normalization cancels algebraically, so one masked
        # normalization suffices (umask is a 0/1 mask; masked columns get 0).
        wgt = jnp.exp(jnp.tanh(scores)) * um[:, None, :]
        a = wgt / jnp.sum(wgt, axis=-1, keepdims=True)      # (B, S, S)
        al_ref[...] = jnp.stack([a[b] for b in range(B)], axis=1)   # (S, B, S)

        attn = jnp.einsum('bts,bsm->btm', a, em_bsm,
                          preferred_element_type=jnp.float32)       # (B, S, M)
        attn_sm = jnp.stack([attn[b] for b in range(B)],
                            axis=1).reshape(S * B, M)               # seq-major

        # ---- Linear + ReLU -> smax_fc -> log_softmax (seq-major) --------------
        hid = jnp.maximum(
            jnp.dot(attn_sm, wl_ref[...], preferred_element_type=jnp.float32)
            + bl_ref[...], 0.0)
        logits = jnp.dot(hid, ws_ref[...],
                         preferred_element_type=jnp.float32) + bs_ref[...]
        mx = jnp.max(logits, axis=-1, keepdims=True)
        lp = logits - (mx + jnp.log(jnp.sum(jnp.exp(logits - mx),
                                            axis=-1, keepdims=True)))
        lp_ref[...] = lp                                            # (S*B, C)

        # ---- fused MaskedNLLLoss (weight=None) --------------------------------
        cols = jax.lax.broadcasted_iota(jnp.int32, (S * B, C), 1)
        picked = jnp.sum(jnp.where(cols == tgt_ref[...], lp, 0.0),
                         axis=1, keepdims=True)                     # (S*B, 1)
        num = jnp.sum(picked * msk_ref[...], keepdims=True)         # (1, 1)
        den = jnp.sum(msk_ref[...], keepdims=True)                  # (1, 1)
        loss_ref[...] = -num / den

    em_sm, lp_sm, alpha, loss = pl.pallas_call(
        kernel,
        out_shape=(jax.ShapeDtypeStruct((S * B, M), jnp.float32),
                   jax.ShapeDtypeStruct((S * B, C), jnp.float32),
                   jax.ShapeDtypeStruct((S, B, S), jnp.float32),
                   jax.ShapeDtypeStruct((1, 1), jnp.float32)),
        grid_spec=pltpu.PrefetchScalarGridSpec(
            num_scalar_prefetch=0,
            grid=(1,),
            in_specs=[
                _full_spec((S * B, D_m)),
                _full_spec(wih0.shape), _full_spec(whh0.shape),
                _full_spec(b60.shape), _full_spec(bn0.shape),
                _full_spec(wih1.shape), _full_spec(whh1.shape),
                _full_spec(b61.shape), _full_spec(bn1.shape),
                _full_spec((B, S)),
                _full_spec((S * B, 1)), _full_spec((S * B, 1)),
                _full_spec((M, M)), _full_spec((1, M)),
                _full_spec((M, D_h)), _full_spec((1, D_h)),
                _full_spec((D_h, C)), _full_spec((1, C)),
            ],
            out_specs=[
                _full_spec((S * B, M)),
                _full_spec((S * B, C)),
                _full_spec((S, B, S)),
                _full_spec((1, 1)),
            ]),
        compiler_params=pltpu.CompilerParams(
            dimension_semantics=("arbitrary",)),
    )(u_flat, wih0, whh0, b60, bn0, wih1, whh1, b61, bn1,
      umask.astype(jnp.float32), tgt_sm, msk_sm, wt, bt, wl, bl, ws, bs)

    emotions = em_sm.reshape(S, B, M)       # free reshapes: already seq-major
    log_prob = lp_sm.reshape(S, B, C)
    return log_prob, alpha, [], [], emotions, loss[0, 0]


# ------------------------ standalone MaskedNLLLoss kernel (spec module) ------------------------

def masked_nll_loss(pred, target, mask, weight=None):
    """Pallas port of MaskedNLLLoss.forward (weight=None).
    pred: (N, C) log-probs; target: (N,); mask flattens row-aligned with pred."""
    if weight is not None:
        raise NotImplementedError  # TODO(synk): class-weighted MaskedNLLLoss path.
    N, C = pred.shape

    def kernel(pred_ref, tgt_ref, msk_ref, out_ref):
        cols = jax.lax.broadcasted_iota(jnp.int32, (N, C), 1)
        picked = jnp.sum(jnp.where(cols == tgt_ref[...], pred_ref[...], 0.0),
                         axis=1, keepdims=True)                    # (N, 1)
        num = jnp.sum(picked * msk_ref[...], keepdims=True)        # (1, 1)
        den = jnp.sum(msk_ref[...], keepdims=True)                 # (1, 1)
        out_ref[...] = -num / den

    loss = pl.pallas_call(
        kernel,
        out_shape=jax.ShapeDtypeStruct((1, 1), jnp.float32),
        grid_spec=pltpu.PrefetchScalarGridSpec(
            num_scalar_prefetch=0, grid=(1,),
            in_specs=[_full_spec((N, C)), _full_spec((N, 1)), _full_spec((N, 1))],
            out_specs=_full_spec((1, 1))),
        compiler_params=pltpu.CompilerParams(dimension_semantics=("arbitrary",)),
    )(pred.astype(jnp.float32),
      target.reshape(N, 1).astype(jnp.int32),
      mask.reshape(N, 1).astype(jnp.float32))
    return loss[0, 0]


# ------------------------------ params & pure-JAX references ------------------------------

def init_params(key, D_m, D_e, D_h, n_classes):
    ks = iter(jax.random.split(key, 32))

    def unif(shape, bound):
        return jax.random.uniform(next(ks), shape, jnp.float32, -bound, bound)

    kH = 1.0 / np.sqrt(D_e)

    def gru_layer(in_dim):
        return {
            "w_ih": unif((3 * D_e, in_dim), kH), "w_hh": unif((3 * D_e, D_e), kH),
            "b_ih": unif((3 * D_e,), kH), "b_hh": unif((3 * D_e,), kH),
            "w_ih_r": unif((3 * D_e, in_dim), kH), "w_hh_r": unif((3 * D_e, D_e), kH),
            "b_ih_r": unif((3 * D_e,), kH), "b_hh_r": unif((3 * D_e,), kH),
        }

    M = 2 * D_e
    return {
        "gru_l0": gru_layer(D_m),
        "gru_l1": gru_layer(2 * D_e),
        "att_w": unif((M, M), 1.0 / np.sqrt(M)),
        "att_b": unif((M,), 1.0 / np.sqrt(M)),
        "lin_w": unif((D_h, M), 1.0 / np.sqrt(M)),
        "lin_b": unif((D_h,), 1.0 / np.sqrt(M)),
        "fc_w": unif((n_classes, D_h), 1.0 / np.sqrt(D_h)),
        "fc_b": unif((n_classes,), 1.0 / np.sqrt(D_h)),
    }


def _gru_pass_ref(x, w_ih, w_hh, b_ih, b_hh):
    H = w_hh.shape[1]

    def step(h, xt):
        gi = xt @ w_ih.T + b_ih
        gh = h @ w_hh.T + b_hh
        r = jax.nn.sigmoid(gi[:, :H] + gh[:, :H])
        z = jax.nn.sigmoid(gi[:, H:2 * H] + gh[:, H:2 * H])
        n = jnp.tanh(gi[:, 2 * H:] + r * gh[:, 2 * H:])
        h_new = (1.0 - z) * n + z * h
        return h_new, h_new

    h0 = jnp.zeros((x.shape[1], H), jnp.float32)
    _, ys = jax.lax.scan(step, h0, x)
    return ys


def _bi_gru_ref(x, p):
    f = _gru_pass_ref(x, p["w_ih"], p["w_hh"], p["b_ih"], p["b_hh"])
    b = _gru_pass_ref(x[::-1], p["w_ih_r"], p["w_hh_r"], p["b_ih_r"], p["b_hh_r"])[::-1]
    return jnp.concatenate([f, b], axis=-1)


def _emotions_ref(params, U):
    return _bi_gru_ref(_bi_gru_ref(U, params["gru_l0"]), params["gru_l1"])


def forward_ref(params, U, umask):
    emotions = _emotions_ref(params, U)
    xt = emotions @ params["att_w"].T + params["att_b"]            # (S,B,M)
    Mm = emotions * umask.T[:, :, None]
    scores = jnp.einsum('tbm,sbm->tbs', xt, Mm) * umask[None, :, :]
    a = jax.nn.softmax(jnp.tanh(scores), axis=-1)
    a = a * umask[None, :, :]
    a = a / jnp.sum(a, axis=-1, keepdims=True)
    attn = jnp.einsum('tbs,sbm->tbm', a, emotions)
    hid = jax.nn.relu(attn @ params["lin_w"].T + params["lin_b"])
    logits = hid @ params["fc_w"].T + params["fc_b"]
    return jax.nn.log_softmax(logits, axis=-1), a, emotions


def masked_nll_ref(pred, target, mask_flat):
    picked = jnp.take_along_axis(pred, target.reshape(-1, 1), axis=1)[:, 0]
    return -jnp.sum(picked * mask_flat) / jnp.sum(mask_flat)


# ------------------------------------- main -------------------------------------

if __name__ == "__main__":
    S, B = 8, 2
    D_m, D_e, D_h, C = 16, 16, 32, 7

    key = jax.random.PRNGKey(0)
    kU, kq, kt, kp = jax.random.split(key, 4)
    U = jax.random.normal(kU, (S, B, D_m), jnp.float32)
    qmask = jax.nn.one_hot(jax.random.randint(kq, (S, B), 0, 2), 2, dtype=jnp.float32)
    umask = jnp.ones((B, S), jnp.float32).at[1, S - 2:].set(0.0)   # partially masked
    target = jax.random.randint(kt, (S * B,), 0, C)                # seq-major (t,b)
    params = init_params(kp, D_m, D_e, D_h, C)

    log_prob, alpha, _, _, emotions, loss = fused_forward_and_loss(
        params, U, qmask, umask, target)
    pred = log_prob.reshape(S * B, C)                              # already seq-major
    loss_module = masked_nll_loss(pred, target, jnp.transpose(umask))  # spec module
    jax.block_until_ready((log_prob, alpha, emotions, loss, loss_module))

    lp_r, a_r, em_r = forward_ref(params, U, umask)
    mask_flat = jnp.transpose(umask).reshape(-1)
    loss_r = masked_nll_ref(pred, target, mask_flat)

    assert log_prob.shape == (S, B, C)
    assert emotions.shape == (S, B, 2 * D_e)
    assert alpha.shape == (S, B, S) and alpha[0].shape == (B, S)
    assert bool(jnp.all(jnp.isfinite(log_prob)))
    assert float(jnp.max(jnp.abs(emotions - em_r))) < 5e-3
    assert float(jnp.max(jnp.abs(log_prob - lp_r))) < 5e-3
    assert float(jnp.max(jnp.abs(alpha - a_r))) < 5e-3
    assert loss.shape == () and bool(jnp.isfinite(loss))
    assert abs(float(loss) - float(loss_r)) < 1e-4
    assert abs(float(loss_module) - float(loss_r)) < 1e-4

    print("KERNEL_OK")
</pallas_src>

<mosaic_0001>
module attributes {stable_mosaic.version = 11 : i64} {
  func.func @kernel(%arg0: i32, %arg1: memref<16x16xf32, #tpu.memory_space<vmem>>, %arg2: memref<16x96xf32, #tpu.memory_space<vmem>>, %arg3: memref<16x96xf32, #tpu.memory_space<vmem>>, %arg4: memref<1x96xf32, #tpu.memory_space<vmem>>, %arg5: memref<4x16xf32, #tpu.memory_space<vmem>>, %arg6: memref<32x96xf32, #tpu.memory_space<vmem>>, %arg7: memref<16x96xf32, #tpu.memory_space<vmem>>, %arg8: memref<1x96xf32, #tpu.memory_space<vmem>>, %arg9: memref<4x16xf32, #tpu.memory_space<vmem>>, %arg10: memref<2x8xf32, #tpu.memory_space<vmem>>, %arg11: memref<16x1xi32, #tpu.memory_space<vmem>>, %arg12: memref<16x1xf32, #tpu.memory_space<vmem>>, %arg13: memref<32x32xf32, #tpu.memory_space<vmem>>, %arg14: memref<1x32xf32, #tpu.memory_space<vmem>>, %arg15: memref<32x32xf32, #tpu.memory_space<vmem>>, %arg16: memref<1x32xf32, #tpu.memory_space<vmem>>, %arg17: memref<32x7xf32, #tpu.memory_space<vmem>>, %arg18: memref<1x7xf32, #tpu.memory_space<vmem>>, %arg19: memref<16x32xf32, #tpu.memory_space<vmem>>, %arg20: memref<16x7xf32, #tpu.memory_space<vmem>>, %arg21: memref<8x2x8xf32, #tpu.memory_space<vmem>>, %arg22: memref<1x1xf32, #tpu.memory_space<vmem>>) attributes {dimension_semantics = [#tpu.dimension_semantics<arbitrary>], iteration_bounds = array<i64: 1>, scalar_prefetch = 0 : i64, scratch_operands = 0 : i64, tpu.core_type = #tpu.core_type<tc>, window_params = [{pipeline_mode = #tpu.pipeline_mode<synchronous>, transform_indices = @transform_0, window_bounds = array<i64: 16, 16>}, {pipeline_mode = #tpu.pipeline_mode<synchronous>, transform_indices = @transform_1, window_bounds = array<i64: 16, 96>}, {pipeline_mode = #tpu.pipeline_mode<synchronous>, transform_indices = @transform_2, window_bounds = array<i64: 16, 96>}, {pipeline_mode = #tpu.pipeline_mode<synchronous>, transform_indices = @transform_3, window_bounds = array<i64: 1, 96>}, {pipeline_mode = #tpu.pipeline_mode<synchronous>, transform_indices = @transform_4, window_bounds = array<i64: 4, 16>}, {pipeline_mode = #tpu.pipeline_mode<synchronous>, transform_indices = @transform_5, window_bounds = array<i64: 32, 96>}, {pipeline_mode = #tpu.pipeline_mode<synchronous>, transform_indices = @transform_6, window_bounds = array<i64: 16, 96>}, {pipeline_mode = #tpu.pipeline_mode<synchronous>, transform_indices = @transform_7, window_bounds = array<i64: 1, 96>}, {pipeline_mode = #tpu.pipeline_mode<synchronous>, transform_indices = @transform_8, window_bounds = array<i64: 4, 16>}, {pipeline_mode = #tpu.pipeline_mode<synchronous>, transform_indices = @transform_9, window_bounds = array<i64: 2, 8>}, {pipeline_mode = #tpu.pipeline_mode<synchronous>, transform_indices = @transform_10, window_bounds = array<i64: 16, 1>}, {pipeline_mode = #tpu.pipeline_mode<synchronous>, transform_indices = @transform_11, window_bounds = array<i64: 16, 1>}, {pipeline_mode = #tpu.pipeline_mode<synchronous>, transform_indices = @transform_12, window_bounds = array<i64: 32, 32>}, {pipeline_mode = #tpu.pipeline_mode<synchronous>, transform_indices = @transform_13, window_bounds = array<i64: 1, 32>}, {pipeline_mode = #tpu.pipeline_mode<synchronous>, transform_indices = @transform_14, window_bounds = array<i64: 32, 32>}, {pipeline_mode = #tpu.pipeline_mode<synchronous>, transform_indices = @transform_15, window_bounds = array<i64: 1, 32>}, {pipeline_mode = #tpu.pipeline_mode<synchronous>, transform_indices = @transform_16, window_bounds = array<i64: 32, 7>}, {pipeline_mode = #tpu.pipeline_mode<synchronous>, transform_indices = @transform_17, window_bounds = array<i64: 1, 7>}, {pipeline_mode = #tpu.pipeline_mode<synchronous>, transform_indices = @transform_18, window_bounds = array<i64: 16, 32>}, {pipeline_mode = #tpu.pipeline_mode<synchronous>, transform_indices = @transform_19, window_bounds = array<i64: 16, 7>}, {pipeline_mode = #tpu.pipeline_mode<synchronous>, transform_indices = @transform_20, window_bounds = array<i64: 8, 2, 8>}, {pipeline_mode = #tpu.pipeline_mode<synchronous>, transform_indices = @transform_21, window_bounds = array<i64: 1, 1>}]} {
    %c0 = arith.constant 0 : index
    %c0_0 = arith.constant 0 : index
    %0 = vector.load %arg1[%c0, %c0_0] : memref<16x16xf32, #tpu.memory_space<vmem>>, vector<16x16xf32>
    %c0_1 = arith.constant 0 : index
    %c0_2 = arith.constant 0 : index
    %1 = vector.load %arg2[%c0_1, %c0_2] : memref<16x96xf32, #tpu.memory_space<vmem>>, vector<16x96xf32>
    %cst = arith.constant dense<0.000000e+00> : vector<16x96xf32>
    %2 = tpu.matmul %0, %1, %cst {dimension_numbers = #tpu.dot_dimension_numbers<[1], [0], [0], [1], [0, 0, 1, 1], [], []>} : vector<16x16xf32>, vector<16x96xf32>, vector<16x96xf32> -> vector<16x96xf32>
    %c0_3 = arith.constant 0 : index
    %c0_4 = arith.constant 0 : index
    %3 = vector.load %arg4[%c0_3, %c0_4] : memref<1x96xf32, #tpu.memory_space<vmem>>, vector<1x96xf32>
    %4 = vector.broadcast %3 : vector<1x96xf32> to vector<16x96xf32>
    %5 = arith.addf %2, %4 : vector<16x96xf32>
    %6 = vector.extract_strided_slice %5 {offsets = [0, 0], sizes = [16, 48], strides = [1, 1]} : vector<16x96xf32> to vector<16x48xf32>
    %7 = vector.extract_strided_slice %5 {offsets = [0, 48], sizes = [16, 48], strides = [1, 1]} : vector<16x96xf32> to vector<16x48xf32>
    %c0_5 = arith.constant 0 : index
    %c0_6 = arith.constant 0 : index
    %8 = vector.load %arg3[%c0_5, %c0_6] : memref<16x96xf32, #tpu.memory_space<vmem>>, vector<16x96xf32>
    %c0_7 = arith.constant 0 : index
    %c0_8 = arith.constant 0 : index
    %9 = vector.load %arg5[%c0_7, %c0_8] : memref<4x16xf32, #tpu.memory_space<vmem>>, vector<4x16xf32>
    %cst_9 = arith.constant 0.000000e+00 : f32
    %10 = vector.broadcast %cst_9 : f32 to vector<4x16xf32>
    %11 = vector.extract_strided_slice %6 {offsets = [0, 0], sizes = [2, 48], strides = [1, 1]} : vector<16x48xf32> to vector<2x48xf32>
    %12 = vector.extract_strided_slice %7 {offsets = [14, 0], sizes = [2, 48], strides = [1, 1]} : vector<16x48xf32> to vector<2x48xf32>
    %13 = tpu.concatenate %11, %12 in 0 : vector<2x48xf32>, vector<2x48xf32> -> vector<4x48xf32>
    %cst_10 = arith.constant dense<0.000000e+00> : vector<4x96xf32>
    %14 = tpu.matmul %10, %8, %cst_10 {dimension_numbers = #tpu.dot_dimension_numbers<[1], [0], [0], [1], [0, 0, 1, 1], [], []>} : vector<4x16xf32>, vector<16x96xf32>, vector<4x96xf32> -> vector<4x96xf32>
    %15 = vector.extract_strided_slice %14 {offsets = [0, 0], sizes = [2, 48], strides = [1, 1]} : vector<4x96xf32> to vector<2x48xf32>
    %16 = vector.extract_strided_slice %14 {offsets = [2, 48], sizes = [2, 48], strides = [1, 1]} : vector<4x96xf32> to vector<2x48xf32>
    %17 = tpu.concatenate %15, %16 in 0 : vector<2x48xf32>, vector<2x48xf32> -> vector<4x48xf32>
    %18 = vector.extract_strided_slice %13 {offsets = [0, 0], sizes = [4, 16], strides = [1, 1]} : vector<4x48xf32> to vector<4x16xf32>
    %19 = vector.extract_strided_slice %17 {offsets = [0, 0], sizes = [4, 16], strides = [1, 1]} : vector<4x48xf32> to vector<4x16xf32>
    %20 = arith.addf %18, %19 : vector<4x16xf32>
    %21 = arith.negf %20 : vector<4x16xf32>
    %22 = math.exp %21 : vector<4x16xf32>
    %cst_11 = arith.constant 1.000000e+00 : f32
    %23 = vector.broadcast %cst_11 : f32 to vector<4x16xf32>
    %24 = arith.addf %23, %22 : vector<4x16xf32>
    %25 = arith.divf %23, %24 : vector<4x16xf32>
    %26 = vector.extract_strided_slice %13 {offsets = [0, 16], sizes = [4, 16], strides = [1, 1]} : vector<4x48xf32> to vector<4x16xf32>
    %27 = vector.extract_strided_slice %17 {offsets = [0, 16], sizes = [4, 16], strides = [1, 1]} : vector<4x48xf32> to vector<4x16xf32>
    %28 = arith.addf %26, %27 : vector<4x16xf32>
    %29 = arith.negf %28 : vector<4x16xf32>
    %30 = math.exp %29 : vector<4x16xf32>
    %cst_12 = arith.constant 1.000000e+00 : f32
    %31 = vector.broadcast %cst_12 : f32 to vector<4x16xf32>
    %32 = arith.addf %31, %30 : vector<4x16xf32>
    %33 = arith.divf %31, %32 : vector<4x16xf32>
    %34 = vector.extract_strided_slice %13 {offsets = [0, 32], sizes = [4, 16], strides = [1, 1]} : vector<4x48xf32> to vector<4x16xf32>
    %35 = vector.extract_strided_slice %17 {offsets = [0, 32], sizes = [4, 16], strides = [1, 1]} : vector<4x48xf32> to vector<4x16xf32>
    %36 = arith.addf %35, %9 : vector<4x16xf32>
    %37 = arith.mulf %25, %36 : vector<4x16xf32>
    %38 = arith.addf %34, %37 : vector<4x16xf32>
    %39 = math.tanh %38 : vector<4x16xf32>
    %cst_13 = arith.constant 1.000000e+00 : f32
    %40 = vector.broadcast %cst_13 : f32 to vector<4x16xf32>
    %41 = arith.subf %40, %33 : vector<4x16xf32>
    %42 = arith.mulf %41, %39 : vector<4x16xf32>
    %43 = arith.mulf %33, %10 : vector<4x16xf32>
    %44 = arith.addf %42, %43 : vector<4x16xf32>
    %45 = vector.extract_strided_slice %6 {offsets = [2, 0], sizes = [2, 48], strides = [1, 1]} : vector<16x48xf32> to vector<2x48xf32>
    %46 = vector.extract_strided_slice %7 {offsets = [12, 0], sizes = [2, 48], strides = [1, 1]} : vector<16x48xf32> to vector<2x48xf32>
    %47 = tpu.concatenate %45, %46 in 0 : vector<2x48xf32>, vector<2x48xf32> -> vector<4x48xf32>
    %cst_14 = arith.constant dense<0.000000e+00> : vector<4x96xf32>
    %48 = tpu.matmul %44, %8, %cst_14 {dimension_numbers = #tpu.dot_dimension_numbers<[1], [0], [0], [1], [0, 0, 1, 1], [], []>} : vector<4x16xf32>, vector<16x96xf32>, vector<4x96xf32> -> vector<4x96xf32>
    %49 = vector.extract_strided_slice %48 {offsets = [0, 0], sizes = [2, 48], strides = [1, 1]} : vector<4x96xf32> to vector<2x48xf32>
    %50 = vector.extract_strided_slice %48 {offsets = [2, 48], sizes = [2, 48], strides = [1, 1]} : vector<4x96xf32> to vector<2x48xf32>
    %51 = tpu.concatenate %49, %50 in 0 : vector<2x48xf32>, vector<2x48xf32> -> vector<4x48xf32>
    %52 = vector.extract_strided_slice %47 {offsets = [0, 0], sizes = [4, 16], strides = [1, 1]} : vector<4x48xf32> to vector<4x16xf32>
    %53 = vector.extract_strided_slice %51 {offsets = [0, 0], sizes = [4, 16], strides = [1, 1]} : vector<4x48xf32> to vector<4x16xf32>
    %54 = arith.addf %52, %53 : vector<4x16xf32>
    %55 = arith.negf %54 : vector<4x16xf32>
    %56 = math.exp %55 : vector<4x16xf32>
    %cst_15 = arith.constant 1.000000e+00 : f32
    %57 = vector.broadcast %cst_15 : f32 to vector<4x16xf32>
    %58 = arith.addf %57, %56 : vector<4x16xf32>
    %59 = arith.divf %57, %58 : vector<4x16xf32>
    %60 = vector.extract_strided_slice %47 {offsets = [0, 16], sizes = [4, 16], strides = [1, 1]} : vector<4x48xf32> to vector<4x16xf32>
    %61 = vector.extract_strided_slice %51 {offsets = [0, 16], sizes = [4, 16], strides = [1, 1]} : vector<4x48xf32> to vector<4x16xf32>
    %62 = arith.addf %60, %61 : vector<4x16xf32>
    %63 = arith.negf %62 : vector<4x16xf32>
    %64 = math.exp %63 : vector<4x16xf32>
    %cst_16 = arith.constant 1.000000e+00 : f32
    %65 = vector.broadcast %cst_16 : f32 to vector<4x16xf32>
    %66 = arith.addf %65, %64 : vector<4x16xf32>
    %67 = arith.divf %65, %66 : vector<4x16xf32>
    %68 = vector.extract_strided_slice %47 {offsets = [0, 32], sizes = [4, 16], strides = [1, 1]} : vector<4x48xf32> to vector<4x16xf32>
    %69 = vector.extract_strided_slice %51 {offsets = [0, 32], sizes = [4, 16], strides = [1, 1]} : vector<4x48xf32> to vector<4x16xf32>
    %70 = arith.addf %69, %9 : vector<4x16xf32>
    %71 = arith.mulf %59, %70 : vector<4x16xf32>
    %72 = arith.addf %68, %71 : vector<4x16xf32>
    %73 = math.tanh %72 : vector<4x16xf32>
    %cst_17 = arith.constant 1.000000e+00 : f32
    %74 = vector.broadcast %cst_17 : f32 to vector<4x16xf32>
    %75 = arith.subf %74, %67 : vector<4x16xf32>
    %76 = arith.mulf %75, %73 : vector<4x16xf32>
    %77 = arith.mulf %67, %44 : vector<4x16xf32>
    %78 = arith.addf %76, %77 : vector<4x16xf32>
    %79 = vector.extract_strided_slice %6 {offsets = [4, 0], sizes = [2, 48], strides = [1, 1]} : vector<16x48xf32> to vector<2x48xf32>
    %80 = vector.extract_strided_slice %7 {offsets = [10, 0], sizes = [2, 48], strides = [1, 1]} : vector<16x48xf32> to vector<2x48xf32>
    %81 = tpu.concatenate %79, %80 in 0 : vector<2x48xf32>, vector<2x48xf32> -> vector<4x48xf32>
    %cst_18 = arith.constant dense<0.000000e+00> : vector<4x96xf32>
    %82 = tpu.matmul %78, %8, %cst_18 {dimension_numbers = #tpu.dot_dimension_numbers<[1], [0], [0], [1], [0, 0, 1, 1], [], []>} : vector<4x16xf32>, vector<16x96xf32>, vector<4x96xf32> -> vector<4x96xf32>
    %83 = vector.extract_strided_slice %82 {offsets = [0, 0], sizes = [2, 48], strides = [1, 1]} : vector<4x96xf32> to vector<2x48xf32>
    %84 = vector.extract_strided_slice %82 {offsets = [2, 48], sizes = [2, 48], strides = [1, 1]} : vector<4x96xf32> to vector<2x48xf32>
    %85 = tpu.concatenate %83, %84 in 0 : vector<2x48xf32>, vector<2x48xf32> -> vector<4x48xf32>
    %86 = vector.extract_strided_slice %81 {offsets = [0, 0], sizes = [4, 16], strides = [1, 1]} : vector<4x48xf32> to vector<4x16xf32>
    %87 = vector.extract_strided_slice %85 {offsets = [0, 0], sizes = [4, 16], strides = [1, 1]} : vector<4x48xf32> to vector<4x16xf32>
    %88 = arith.addf %86, %87 : vector<4x16xf32>
    %89 = arith.negf %88 : vector<4x16xf32>
    %90 = math.exp %89 : vector<4x16xf32>
    %cst_19 = arith.constant 1.000000e+00 : f32
    %91 = vector.broadcast %cst_19 : f32 to vector<4x16xf32>
    %92 = arith.addf %91, %90 : vector<4x16xf32>
    %93 = arith.divf %91, %92 : vector<4x16xf32>
    %94 = vector.extract_strided_slice %81 {offsets = [0, 16], sizes = [4, 16], strides = [1, 1]} : vector<4x48xf32> to vector<4x16xf32>
    %95 = vector.extract_strided_slice %85 {offsets = [0, 16], sizes = [4, 16], strides = [1, 1]} : vector<4x48xf32> to vector<4x16xf32>
    %96 = arith.addf %94, %95 : vector<4x16xf32>
    %97 = arith.negf %96 : vector<4x16xf32>
    %98 = math.exp %97 : vector<4x16xf32>
    %cst_20 = arith.constant 1.000000e+00 : f32
    %99 = vector.broadcast %cst_20 : f32 to vector<4x16xf32>
    %100 = arith.addf %99, %98 : vector<4x16xf32>
    %101 = arith.divf %99, %100 : vector<4x16xf32>
    %102 = vector.extract_strided_slice %81 {offsets = [0, 32], sizes = [4, 16], strides = [1, 1]} : vector<4x48xf32> to vector<4x16xf32>
    %103 = vector.extract_strided_slice %85 {offsets = [0, 32], sizes = [4, 16], strides = [1, 1]} : vector<4x48xf32> to vector<4x16xf32>
    %104 = arith.addf %103, %9 : vector<4x16xf32>
    %105 = arith.mulf %93, %104 : vector<4x16xf32>
    %106 = arith.addf %102, %105 : vector<4x16xf32>
    %107 = math.tanh %106 : vector<4x16xf32>
    %cst_21 = arith.constant 1.000000e+00 : f32
    %108 = vector.broadcast %cst_21 : f32 to vector<4x16xf32>
    %109 = arith.subf %108, %101 : vector<4x16xf32>
    %110 = arith.mulf %109, %107 : vector<4x16xf32>
    %111 = arith.mulf %101, %78 : vector<4x16xf32>
    %112 = arith.addf %110, %111 : vector<4x16xf32>
    %113 = vector.extract_strided_slice %6 {offsets = [6, 0], sizes = [2, 48], strides = [1, 1]} : vector<16x48xf32> to vector<2x48xf32>
    %114 = vector.extract_strided_slice %7 {offsets = [8, 0], sizes = [2, 48], strides = [1, 1]} : vector<16x48xf32> to vector<2x48xf32>
    %115 = tpu.concatenate %113, %114 in 0 : vector<2x48xf32>, vector<2x48xf32> -> vector<4x48xf32>
    %cst_22 = arith.constant dense<0.000000e+00> : vector<4x96xf32>
    %116 = tpu.matmul %112, %8, %cst_22 {dimension_numbers = #tpu.dot_dimension_numbers<[1], [0], [0], [1], [0, 0, 1, 1], [], []>} : vector<4x16xf32>, vector<16x96xf32>, vector<4x96xf32> -> vector<4x96xf32>
    %117 = vector.extract_strided_slice %116 {offsets = [0, 0], sizes = [2, 48], strides = [1, 1]} : vector<4x96xf32> to vector<2x48xf32>
    %118 = vector.extract_strided_slice %116 {offsets = [2, 48], sizes = [2, 48], strides = [1, 1]} : vector<4x96xf32> to vector<2x48xf32>
    %119 = tpu.concatenate %117, %118 in 0 : vector<2x48xf32>, vector<2x48xf32> -> vector<4x48xf32>
    %120 = vector.extract_strided_slice %115 {offsets = [0, 0], sizes = [4, 16], strides = [1, 1]} : vector<4x48xf32> to vector<4x16xf32>
    %121 = vector.extract_strided_slice %119 {offsets = [0, 0], sizes = [4, 16], strides = [1, 1]} : vector<4x48xf32> to vector<4x16xf32>
    %122 = arith.addf %120, %121 : vector<4x16xf32>
    %123 = arith.negf %122 : vector<4x16xf32>
    %124 = math.exp %123 : vector<4x16xf32>
    %cst_23 = arith.constant 1.000000e+00 : f32
    %125 = vector.broadcast %cst_23 : f32 to vector<4x16xf32>
    %126 = arith.addf %125, %124 : vector<4x16xf32>
    %127 = arith.divf %125, %126 : vector<4x16xf32>
    %128 = vector.extract_strided_slice %115 {offsets = [0, 16], sizes = [4, 16], strides = [1, 1]} : vector<4x48xf32> to vector<4x16xf32>
    %129 = vector.extract_strided_slice %119 {offsets = [0, 16], sizes = [4, 16], strides = [1, 1]} : vector<4x48xf32> to vector<4x16xf32>
    %130 = arith.addf %128, %129 : vector<4x16xf32>
    %131 = arith.negf %130 : vector<4x16xf32>
    %132 = math.exp %131 : vector<4x16xf32>
    %cst_24 = arith.constant 1.000000e+00 : f32
    %133 = vector.broadcast %cst_24 : f32 to vector<4x16xf32>
    %134 = arith.addf %133, %132 : vector<4x16xf32>
    %135 = arith.divf %133, %134 : vector<4x16xf32>
    %136 = vector.extract_strided_slice %115 {offsets = [0, 32], sizes = [4, 16], strides = [1, 1]} : vector<4x48xf32> to vector<4x16xf32>
    %137 = vector.extract_strided_slice %119 {offsets = [0, 32], sizes = [4, 16], strides = [1, 1]} : vector<4x48xf32> to vector<4x16xf32>
    %138 = arith.addf %137, %9 : vector<4x16xf32>
    %139 = arith.mulf %127, %138 : vector<4x16xf32>
    %140 = arith.addf %136, %139 : vector<4x16xf32>
    %141 = math.tanh %140 : vector<4x16xf32>
    %cst_25 = arith.constant 1.000000e+00 : f32
    %142 = vector.broadcast %cst_25 : f32 to vector<4x16xf32>
    %143 = arith.subf %142, %135 : vector<4x16xf32>
    %144 = arith.mulf %143, %141 : vector<4x16xf32>
    %145 = arith.mulf %135, %112 : vector<4x16xf32>
    %146 = arith.addf %144, %145 : vector<4x16xf32>
    %147 = vector.extract_strided_slice %6 {offsets = [8, 0], sizes = [2, 48], strides = [1, 1]} : vector<16x48xf32> to vector<2x48xf32>
    %148 = vector.extract_strided_slice %7 {offsets = [6, 0], sizes = [2, 48], strides = [1, 1]} : vector<16x48xf32> to vector<2x48xf32>
    %149 = tpu.concatenate %147, %148 in 0 : vector<2x48xf32>, vector<2x48xf32> -> vector<4x48xf32>
    %cst_26 = arith.constant dense<0.000000e+00> : vector<4x96xf32>
    %150 = tpu.matmul %146, %8, %cst_26 {dimension_numbers = #tpu.dot_dimension_numbers<[1], [0], [0], [1], [0, 0, 1, 1], [], []>} : vector<4x16xf32>, vector<16x96xf32>, vector<4x96xf32> -> vector<4x96xf32>
    %151 = vector.extract_strided_slice %150 {offsets = [0, 0], sizes = [2, 48], strides = [1, 1]} : vector<4x96xf32> to vector<2x48xf32>
    %152 = vector.extract_strided_slice %150 {offsets = [2, 48], sizes = [2, 48], strides = [1, 1]} : vector<4x96xf32> to vector<2x48xf32>
    %153 = tpu.concatenate %151, %152 in 0 : vector<2x48xf32>, vector<2x48xf32> -> vector<4x48xf32>
    %154 = vector.extract_strided_slice %149 {offsets = [0, 0], sizes = [4, 16], strides = [1, 1]} : vector<4x48xf32> to vector<4x16xf32>
    %155 = vector.extract_strided_slice %153 {offsets = [0, 0], sizes = [4, 16], strides = [1, 1]} : vector<4x48xf32> to vector<4x16xf32>
    %156 = arith.addf %154, %155 : vector<4x16xf32>
    %157 = arith.negf %156 : vector<4x16xf32>
    %158 = math.exp %157 : vector<4x16xf32>
    %cst_27 = arith.constant 1.000000e+00 : f32
    %159 = vector.broadcast %cst_27 : f32 to vector<4x16xf32>
    %160 = arith.addf %159, %158 : vector<4x16xf32>
    %161 = arith.divf %159, %160 : vector<4x16xf32>
    %162 = vector.extract_strided_slice %149 {offsets = [0, 16], sizes = [4, 16], strides = [1, 1]} : vector<4x48xf32> to vector<4x16xf32>
    %163 = vector.extract_strided_slice %153 {offsets = [0, 16], sizes = [4, 16], strides = [1, 1]} : vector<4x48xf32> to vector<4x16xf32>
    %164 = arith.addf %162, %163 : vector<4x16xf32>
    %165 = arith.negf %164 : vector<4x16xf32>
    %166 = math.exp %165 : vector<4x16xf32>
    %cst_28 = arith.constant 1.000000e+00 : f32
    %167 = vector.broadcast %cst_28 : f32 to vector<4x16xf32>
    %168 = arith.addf %167, %166 : vector<4x16xf32>
    %169 = arith.divf %167, %168 : vector<4x16xf32>
    %170 = vector.extract_strided_slice %149 {offsets = [0, 32], sizes = [4, 16], strides = [1, 1]} : vector<4x48xf32> to vector<4x16xf32>
    %171 = vector.extract_strided_slice %153 {offsets = [0, 32], sizes = [4, 16], strides = [1, 1]} : vector<4x48xf32> to vector<4x16xf32>
    %172 = arith.addf %171, %9 : vector<4x16xf32>
    %173 = arith.mulf %161, %172 : vector<4x16xf32>
    %174 = arith.addf %170, %173 : vector<4x16xf32>
    %175 = math.tanh %174 : vector<4x16xf32>
    %cst_29 = arith.constant 1.000000e+00 : f32
    %176 = vector.broadcast %cst_29 : f32 to vector<4x16xf32>
    %177 = arith.subf %176, %169 : vector<4x16xf32>
    %178 = arith.mulf %177, %175 : vector<4x16xf32>
    %179 = arith.mulf %169, %146 : vector<4x16xf32>
    %180 = arith.addf %178, %179 : vector<4x16xf32>
    %181 = vector.extract_strided_slice %6 {offsets = [10, 0], sizes = [2, 48], strides = [1, 1]} : vector<16x48xf32> to vector<2x48xf32>
    %182 = vector.extract_strided_slice %7 {offsets = [4, 0], sizes = [2, 48], strides = [1, 1]} : vector<16x48xf32> to vector<2x48xf32>
    %183 = tpu.concatenate %181, %182 in 0 : vector<2x48xf32>, vector<2x48xf32> -> vector<4x48xf32>
    %cst_30 = arith.constant dense<0.000000e+00> : vector<4x96xf32>
    %184 = tpu.matmul %180, %8, %cst_30 {dimension_numbers = #tpu.dot_dimension_numbers<[1], [0], [0], [1], [0, 0, 1, 1], [], []>} : vector<4x16xf32>, vector<16x96xf32>, vector<4x96xf32> -> vector<4x96xf32>
    %185 = vector.extract_strided_slice %184 {offsets = [0, 0], sizes = [2, 48], strides = [1, 1]} : vector<4x96xf32> to vector<2x48xf32>
    %186 = vector.extract_strided_slice %184 {offsets = [2, 48], sizes = [2, 48], strides = [1, 1]} : vector<4x96xf32> to vector<2x48xf32>
    %187 = tpu.concatenate %185, %186 in 0 : vector<2x48xf32>, vector<2x48xf32> -> vector<4x48xf32>
    %188 = vector.extract_strided_slice %183 {offsets = [0, 0], sizes = [4, 16], strides = [1, 1]} : vector<4x48xf32> to vector<4x16xf32>
    %189 = vector.extract_strided_slice %187 {offsets = [0, 0], sizes = [4, 16], strides = [1, 1]} : vector<4x48xf32> to vector<4x16xf32>
    %190 = arith.addf %188, %189 : vector<4x16xf32>
    %191 = arith.negf %190 : vector<4x16xf32>
    %192 = math.exp %191 : vector<4x16xf32>
    %cst_31 = arith.constant 1.000000e+00 : f32
    %193 = vector.broadcast %cst_31 : f32 to vector<4x16xf32>
    %194 = arith.addf %193, %192 : vector<4x16xf32>
    %195 = arith.divf %193, %194 : vector<4x16xf32>
    %196 = vector.extract_strided_slice %183 {offsets = [0, 16], sizes = [4, 16], strides = [1, 1]} : vector<4x48xf32> to vector<4x16xf32>
    %197 = vector.extract_strided_slice %187 {offsets = [0, 16], sizes = [4, 16], strides = [1, 1]} : vector<4x48xf32> to vector<4x16xf32>
    %198 = arith.addf %196, %197 : vector<4x16xf32>
    %199 = arith.negf %198 : vector<4x16xf32>
    %200 = math.exp %199 : vector<4x16xf32>
    %cst_32 = arith.constant 1.000000e+00 : f32
    %201 = vector.broadcast %cst_32 : f32 to vector<4x16xf32>
    %202 = arith.addf %201, %200 : vector<4x16xf32>
    %203 = arith.divf %201, %202 : vector<4x16xf32>
    %204 = vector.extract_strided_slice %183 {offsets = [0, 32], sizes = [4, 16], strides = [1, 1]} : vector<4x48xf32> to vector<4x16xf32>
    %205 = vector.extract_strided_slice %187 {offsets = [0, 32], sizes = [4, 16], strides = [1, 1]} : vector<4x48xf32> to vector<4x16xf32>
    %206 = arith.addf %205, %9 : vector<4x16xf32>
    %207 = arith.mulf %195, %206 : vector<4x16xf32>
    %208 = arith.addf %204, %207 : vector<4x16xf32>
    %209 = math.tanh %208 : vector<4x16xf32>
    %cst_33 = arith.constant 1.000000e+00 : f32
    %210 = vector.broadcast %cst_33 : f32 to vector<4x16xf32>
    %211 = arith.subf %210, %203 : vector<4x16xf32>
    %212 = arith.mulf %211, %209 : vector<4x16xf32>
    %213 = arith.mulf %203, %180 : vector<4x16xf32>
    %214 = arith.addf %212, %213 : vector<4x16xf32>
    %215 = vector.extract_strided_slice %6 {offsets = [12, 0], sizes = [2, 48], strides = [1, 1]} : vector<16x48xf32> to vector<2x48xf32>
    %216 = vector.extract_strided_slice %7 {offsets = [2, 0], sizes = [2, 48], strides = [1, 1]} : vector<16x48xf32> to vector<2x48xf32>
    %217 = tpu.concatenate %215, %216 in 0 : vector<2x48xf32>, vector<2x48xf32> -> vector<4x48xf32>
    %cst_34 = arith.constant dense<0.000000e+00> : vector<4x96xf32>
    %218 = tpu.matmul %214, %8, %cst_34 {dimension_numbers = #tpu.dot_dimension_numbers<[1], [0], [0], [1], [0, 0, 1, 1], [], []>} : vector<4x16xf32>, vector<16x96xf32>, vector<4x96xf32> -> vector<4x96xf32>
    %219 = vector.extract_strided_slice %218 {offsets = [0, 0], sizes = [2, 48], strides = [1, 1]} : vector<4x96xf32> to vector<2x48xf32>
    %220 = vector.extract_strided_slice %218 {offsets = [2, 48], sizes = [2, 48], strides = [1, 1]} : vector<4x96xf32> to vector<2x48xf32>
    %221 = tpu.concatenate %219, %220 in 0 : vector<2x48xf32>, vector<2x48xf32> -> vector<4x48xf32>
    %222 = vector.extract_strided_slice %217 {offsets = [0, 0], sizes = [4, 16], strides = [1, 1]} : vector<4x48xf32> to vector<4x16xf32>
    %223 = vector.extract_strided_slice %221 {offsets = [0, 0], sizes = [4, 16], strides = [1, 1]} : vector<4x48xf32> to vector<4x16xf32>
    %224 = arith.addf %222, %223 : vector<4x16xf32>
    %225 = arith.negf %224 : vector<4x16xf32>
    %226 = math.exp %225 : vector<4x16xf32>
    %cst_35 = arith.constant 1.000000e+00 : f32
    %227 = vector.broadcast %cst_35 : f32 to vector<4x16xf32>
    %228 = arith.addf %227, %226 : vector<4x16xf32>
    %229 = arith.divf %227, %228 : vector<4x16xf32>
    %230 = vector.extract_strided_slice %217 {offsets = [0, 16], sizes = [4, 16], strides = [1, 1]} : vector<4x48xf32> to vector<4x16xf32>
    %231 = vector.extract_strided_slice %221 {offsets = [0, 16], sizes = [4, 16], strides = [1, 1]} : vector<4x48xf32> to vector<4x16xf32>
    %232 = arith.addf %230, %231 : vector<4x16xf32>
    %233 = arith.negf %232 : vector<4x16xf32>
    %234 = math.exp %233 : vector<4x16xf32>
    %cst_36 = arith.constant 1.000000e+00 : f32
    %235 = vector.broadcast %cst_36 : f32 to vector<4x16xf32>
    %236 = arith.addf %235, %234 : vector<4x16xf32>
    %237 = arith.divf %235, %236 : vector<4x16xf32>
    %238 = vector.extract_strided_slice %217 {offsets = [0, 32], sizes = [4, 16], strides = [1, 1]} : vector<4x48xf32> to vector<4x16xf32>
    %239 = vector.extract_strided_slice %221 {offsets = [0, 32], sizes = [4, 16], strides = [1, 1]} : vector<4x48xf32> to vector<4x16xf32>
    %240 = arith.addf %239, %9 : vector<4x16xf32>
    %241 = arith.mulf %229, %240 : vector<4x16xf32>
    %242 = arith.addf %238, %241 : vector<4x16xf32>
    %243 = math.tanh %242 : vector<4x16xf32>
    %cst_37 = arith.constant 1.000000e+00 : f32
    %244 = vector.broadcast %cst_37 : f32 to vector<4x16xf32>
    %245 = arith.subf %244, %237 : vector<4x16xf32>
    %246 = arith.mulf %245, %243 : vector<4x16xf32>
    %247 = arith.mulf %237, %214 : vector<4x16xf32>
    %248 = arith.addf %246, %247 : vector<4x16xf32>
    %249 = vector.extract_strided_slice %6 {offsets = [14, 0], sizes = [2, 48], strides = [1, 1]} : vector<16x48xf32> to vector<2x48xf32>
    %250 = vector.extract_strided_slice %7 {offsets = [0, 0], sizes = [2, 48], strides = [1, 1]} : vector<16x48xf32> to vector<2x48xf32>
    %251 = tpu.concatenate %249, %250 in 0 : vector<2x48xf32>, vector<2x48xf32> -> vector<4x48xf32>
    %cst_38 = arith.constant dense<0.000000e+00> : vector<4x96xf32>
    %252 = tpu.matmul %248, %8, %cst_38 {dimension_numbers = #tpu.dot_dimension_numbers<[1], [0], [0], [1], [0, 0, 1, 1], [], []>} : vector<4x16xf32>, vector<16x96xf32>, vector<4x96xf32> -> vector<4x96xf32>
    %253 = vector.extract_strided_slice %252 {offsets = [0, 0], sizes = [2, 48], strides = [1, 1]} : vector<4x96xf32> to vector<2x48xf32>
    %254 = vector.extract_strided_slice %252 {offsets = [2, 48], sizes = [2, 48], strides = [1, 1]} : vector<4x96xf32> to vector<2x48xf32>
    %255 = tpu.concatenate %253, %254 in 0 : vector<2x48xf32>, vector<2x48xf32> -> vector<4x48xf32>
    %256 = vector.extract_strided_slice %251 {offsets = [0, 0], sizes = [4, 16], strides = [1, 1]} : vector<4x48xf32> to vector<4x16xf32>
    %257 = vector.extract_strided_slice %255 {offsets = [0, 0], sizes = [4, 16], strides = [1, 1]} : vector<4x48xf32> to vector<4x16xf32>
    %258 = arith.addf %256, %257 : vector<4x16xf32>
    %259 = arith.negf %258 : vector<4x16xf32>
    %260 = math.exp %259 : vector<4x16xf32>
    %cst_39 = arith.constant 1.000000e+00 : f32
    %261 = vector.broadcast %cst_39 : f32 to vector<4x16xf32>
    %262 = arith.addf %261, %260 : vector<4x16xf32>
    %263 = arith.divf %261, %262 : vector<4x16xf32>
    %264 = vector.extract_strided_slice %251 {offsets = [0, 16], sizes = [4, 16], strides = [1, 1]} : vector<4x48xf32> to vector<4x16xf32>
    %265 = vector.extract_strided_slice %255 {offsets = [0, 16], sizes = [4, 16], strides = [1, 1]} : vector<4x48xf32> to vector<4x16xf32>
    %266 = arith.addf %264, %265 : vector<4x16xf32>
    %267 = arith.negf %266 : vector<4x16xf32>
    %268 = math.exp %267 : vector<4x16xf32>
    %cst_40 = arith.constant 1.000000e+00 : f32
    %269 = vector.broadcast %cst_40 : f32 to vector<4x16xf32>
    %270 = arith.addf %269, %268 : vector<4x16xf32>
    %271 = arith.divf %269, %270 : vector<4x16xf32>
    %272 = vector.extract_strided_slice %251 {offsets = [0, 32], sizes = [4, 16], strides = [1, 1]} : vector<4x48xf32> to vector<4x16xf32>
    %273 = vector.extract_strided_slice %255 {offsets = [0, 32], sizes = [4, 16], strides = [1, 1]} : vector<4x48xf32> to vector<4x16xf32>
    %274 = arith.addf %273, %9 : vector<4x16xf32>
    %275 = arith.mulf %263, %274 : vector<4x16xf32>
    %276 = arith.addf %272, %275 : vector<4x16xf32>
    %277 = math.tanh %276 : vector<4x16xf32>
    %cst_41 = arith.constant 1.000000e+00 : f32
    %278 = vector.broadcast %cst_41 : f32 to vector<4x16xf32>
    %279 = arith.subf %278, %271 : vector<4x16xf32>
    %280 = arith.mulf %279, %277 : vector<4x16xf32>
    %281 = arith.mulf %271, %248 : vector<4x16xf32>
    %282 = arith.addf %280, %281 : vector<4x16xf32>
    %283 = vector.extract_strided_slice %44 {offsets = [0, 0], sizes = [2, 16], strides = [1, 1]} : vector<4x16xf32> to vector<2x16xf32>
    %284 = vector.extract_strided_slice %78 {offsets = [0, 0], sizes = [2, 16], strides = [1, 1]} : vector<4x16xf32> to vector<2x16xf32>
    %285 = vector.extract_strided_slice %112 {offsets = [0, 0], sizes = [2, 16], strides = [1, 1]} : vector<4x16xf32> to vector<2x16xf32>
    %286 = vector.extract_strided_slice %146 {offsets = [0, 0], sizes = [2, 16], strides = [1, 1]} : vector<4x16xf32> to vector<2x16xf32>
    %287 = vector.extract_strided_slice %180 {offsets = [0, 0], sizes = [2, 16], strides = [1, 1]} : vector<4x16xf32> to vector<2x16xf32>
    %288 = vector.extract_strided_slice %214 {offsets = [0, 0], sizes = [2, 16], strides = [1, 1]} : vector<4x16xf32> to vector<2x16xf32>
    %289 = vector.extract_strided_slice %248 {offsets = [0, 0], sizes = [2, 16], strides = [1, 1]} : vector<4x16xf32> to vector<2x16xf32>
    %290 = vector.extract_strided_slice %282 {offsets = [0, 0], sizes = [2, 16], strides = [1, 1]} : vector<4x16xf32> to vector<2x16xf32>
    %291 = tpu.concatenate %283, %284, %285, %286, %287, %288, %289, %290 in 0 : vector<2x16xf32>, vector<2x16xf32>, vector<2x16xf32>, vector<2x16xf32>, vector<2x16xf32>, vector<2x16xf32>, vector<2x16xf32>, vector<2x16xf32> -> vector<16x16xf32>
    %292 = vector.extract_strided_slice %282 {offsets = [2, 0], sizes = [2, 16], strides = [1, 1]} : vector<4x16xf32> to vector<2x16xf32>
    %293 = vector.extract_strided_slice %248 {offsets = [2, 0], sizes = [2, 16], strides = [1, 1]} : vector<4x16xf32> to vector<2x16xf32>
    %294 = vector.extract_strided_slice %214 {offsets = [2, 0], sizes = [2, 16], strides = [1, 1]} : vector<4x16xf32> to vector<2x16xf32>
    %295 = vector.extract_strided_slice %180 {offsets = [2, 0], sizes = [2, 16], strides = [1, 1]} : vector<4x16xf32> to vector<2x16xf32>
    %296 = vector.extract_strided_slice %146 {offsets = [2, 0], sizes = [2, 16], strides = [1, 1]} : vector<4x16xf32> to vector<2x16xf32>
    %297 = vector.extract_strided_slice %112 {offsets = [2, 0], sizes = [2, 16], strides = [1, 1]} : vector<4x16xf32> to vector<2x16xf32>
    %298 = vector.extract_strided_slice %78 {offsets = [2, 0], sizes = [2, 16], strides = [1, 1]} : vector<4x16xf32> to vector<2x16xf32>
    %299 = vector.extract_strided_slice %44 {offsets = [2, 0], sizes = [2, 16], strides = [1, 1]} : vector<4x16xf32> to vector<2x16xf32>
    %300 = tpu.concatenate %292, %293, %294, %295, %296, %297, %298, %299 in 0 : vector<2x16xf32>, vector<2x16xf32>, vector<2x16xf32>, vector<2x16xf32>, vector<2x16xf32>, vector<2x16xf32>, vector<2x16xf32>, vector<2x16xf32> -> vector<16x16xf32>
    %301 = tpu.concatenate %291, %300 in 1 : vector<16x16xf32>, vector<16x16xf32> -> vector<16x32xf32>
    %c0_42 = arith.constant 0 : index
    %c0_43 = arith.constant 0 : index
    %302 = vector.load %arg6[%c0_42, %c0_43] : memref<32x96xf32, #tpu.memory_space<vmem>>, vector<32x96xf32>
    %cst_44 = arith.constant dense<0.000000e+00> : vector<16x96xf32>
    %303 = tpu.matmul %301, %302, %cst_44 {dimension_numbers = #tpu.dot_dimension_numbers<[1], [0], [0], [1], [0, 0, 1, 1], [], []>} : vector<16x32xf32>, vector<32x96xf32>, vector<16x96xf32> -> vector<16x96xf32>
    %c0_45 = arith.constant 0 : index
    %c0_46 = arith.constant 0 : index
    %304 = vector.load %arg8[%c0_45, %c0_46] : memref<1x96xf32, #tpu.memory_space<vmem>>, vector<1x96xf32>
    %305 = vector.broadcast %304 : vector<1x96xf32> to vector<16x96xf32>
    %306 = arith.addf %303, %305 : vector<16x96xf32>
    %307 = vector.extract_strided_slice %306 {offsets = [0, 0], sizes = [16, 48], strides = [1, 1]} : vector<16x96xf32> to vector<16x48xf32>
    %308 = vector.extract_strided_slice %306 {offsets = [0, 48], sizes = [16, 48], strides = [1, 1]} : vector<16x96xf32> to vector<16x48xf32>
    %c0_47 = arith.constant 0 : index
    %c0_48 = arith.constant 0 : index
    %309 = vector.load %arg7[%c0_47, %c0_48] : memref<16x96xf32, #tpu.memory_space<vmem>>, vector<16x96xf32>
    %c0_49 = arith.constant 0 : index
    %c0_50 = arith.constant 0 : index
    %310 = vector.load %arg9[%c0_49, %c0_50] : memref<4x16xf32, #tpu.memory_space<vmem>>, vector<4x16xf32>
    %cst_51 = arith.constant 0.000000e+00 : f32
    %311 = vector.broadcast %cst_51 : f32 to vector<4x16xf32>
    %312 = vector.extract_strided_slice %307 {offsets = [0, 0], sizes = [2, 48], strides = [1, 1]} : vector<16x48xf32> to vector<2x48xf32>
    %313 = vector.extract_strided_slice %308 {offsets = [14, 0], sizes = [2, 48], strides = [1, 1]} : vector<16x48xf32> to vector<2x48xf32>
    %314 = tpu.concatenate %312, %313 in 0 : vector<2x48xf32>, vector<2x48xf32> -> vector<4x48xf32>
    %cst_52 = arith.constant dense<0.000000e+00> : vector<4x96xf32>
    %315 = tpu.matmul %311, %309, %cst_52 {dimension_numbers = #tpu.dot_dimension_numbers<[1], [0], [0], [1], [0, 0, 1, 1], [], []>} : vector<4x16xf32>, vector<16x96xf32>, vector<4x96xf32> -> vector<4x96xf32>
    %316 = vector.extract_strided_slice %315 {offsets = [0, 0], sizes = [2, 48], strides = [1, 1]} : vector<4x96xf32> to vector<2x48xf32>
    %317 = vector.extract_strided_slice %315 {offsets = [2, 48], sizes = [2, 48], strides = [1, 1]} : vector<4x96xf32> to vector<2x48xf32>
    %318 = tpu.concatenate %316, %317 in 0 : vector<2x48xf32>, vector<2x48xf32> -> vector<4x48xf32>
    %319 = vector.extract_strided_slice %314 {offsets = [0, 0], sizes = [4, 16], strides = [1, 1]} : vector<4x48xf32> to vector<4x16xf32>
    %320 = vector.extract_strided_slice %318 {offsets = [0, 0], sizes = [4, 16], strides = [1, 1]} : vector<4x48xf32> to vector<4x16xf32>
    %321 = arith.addf %319, %320 : vector<4x16xf32>
    %322 = arith.negf %321 : vector<4x16xf32>
    %323 = math.exp %322 : vector<4x16xf32>
    %cst_53 = arith.constant 1.000000e+00 : f32
    %324 = vector.broadcast %cst_53 : f32 to vector<4x16xf32>
    %325 = arith.addf %324, %323 : vector<4x16xf32>
    %326 = arith.divf %324, %325 : vector<4x16xf32>
    %327 = vector.extract_strided_slice %314 {offsets = [0, 16], sizes = [4, 16], strides = [1, 1]} : vector<4x48xf32> to vector<4x16xf32>
    %328 = vector.extract_strided_slice %318 {offsets = [0, 16], sizes = [4, 16], strides = [1, 1]} : vector<4x48xf32> to vector<4x16xf32>
    %329 = arith.addf %327, %328 : vector<4x16xf32>
    %330 = arith.negf %329 : vector<4x16xf32>
    %331 = math.exp %330 : vector<4x16xf32>
    %cst_54 = arith.constant 1.000000e+00 : f32
    %332 = vector.broadcast %cst_54 : f32 to vector<4x16xf32>
    %333 = arith.addf %332, %331 : vector<4x16xf32>
    %334 = arith.divf %332, %333 : vector<4x16xf32>
    %335 = vector.extract_strided_slice %314 {offsets = [0, 32], sizes = [4, 16], strides = [1, 1]} : vector<4x48xf32> to vector<4x16xf32>
    %336 = vector.extract_strided_slice %318 {offsets = [0, 32], sizes = [4, 16], strides = [1, 1]} : vector<4x48xf32> to vector<4x16xf32>
    %337 = arith.addf %336, %310 : vector<4x16xf32>
    %338 = arith.mulf %326, %337 : vector<4x16xf32>
    %339 = arith.addf %335, %338 : vector<4x16xf32>
    %340 = math.tanh %339 : vector<4x16xf32>
    %cst_55 = arith.constant 1.000000e+00 : f32
    %341 = vector.broadcast %cst_55 : f32 to vector<4x16xf32>
    %342 = arith.subf %341, %334 : vector<4x16xf32>
    %343 = arith.mulf %342, %340 : vector<4x16xf32>
    %344 = arith.mulf %334, %311 : vector<4x16xf32>
    %345 = arith.addf %343, %344 : vector<4x16xf32>
    %346 = vector.extract_strided_slice %307 {offsets = [2, 0], sizes = [2, 48], strides = [1, 1]} : vector<16x48xf32> to vector<2x48xf32>
    %347 = vector.extract_strided_slice %308 {offsets = [12, 0], sizes = [2, 48], strides = [1, 1]} : vector<16x48xf32> to vector<2x48xf32>
    %348 = tpu.concatenate %346, %347 in 0 : vector<2x48xf32>, vector<2x48xf32> -> vector<4x48xf32>
    %cst_56 = arith.constant dense<0.000000e+00> : vector<4x96xf32>
    %349 = tpu.matmul %345, %309, %cst_56 {dimension_numbers = #tpu.dot_dimension_numbers<[1], [0], [0], [1], [0, 0, 1, 1], [], []>} : vector<4x16xf32>, vector<16x96xf32>, vector<4x96xf32> -> vector<4x96xf32>
    %350 = vector.extract_strided_slice %349 {offsets = [0, 0], sizes = [2, 48], strides = [1, 1]} : vector<4x96xf32> to vector<2x48xf32>
    %351 = vector.extract_strided_slice %349 {offsets = [2, 48], sizes = [2, 48], strides = [1, 1]} : vector<4x96xf32> to vector<2x48xf32>
    %352 = tpu.concatenate %350, %351 in 0 : vector<2x48xf32>, vector<2x48xf32> -> vector<4x48xf32>
    %353 = vector.extract_strided_slice %348 {offsets = [0, 0], sizes = [4, 16], strides = [1, 1]} : vector<4x48xf32> to vector<4x16xf32>
    %354 = vector.extract_strided_slice %352 {offsets = [0, 0], sizes = [4, 16], strides = [1, 1]} : vector<4x48xf32> to vector<4x16xf32>
    %355 = arith.addf %353, %354 : vector<4x16xf32>
    %356 = arith.negf %355 : vector<4x16xf32>
    %357 = math.exp %356 : vector<4x16xf32>
    %cst_57 = arith.constant 1.000000e+00 : f32
    %358 = vector.broadcast %cst_57 : f32 to vector<4x16xf32>
    %359 = arith.addf %358, %357 : vector<4x16xf32>
    %360 = arith.divf %358, %359 : vector<4x16xf32>
    %361 = vector.extract_strided_slice %348 {offsets = [0, 16], sizes = [4, 16], strides = [1, 1]} : vector<4x48xf32> to vector<4x16xf32>
    %362 = vector.extract_strided_slice %352 {offsets = [0, 16], sizes = [4, 16], strides = [1, 1]} : vector<4x48xf32> to vector<4x16xf32>
    %363 = arith.addf %361, %362 : vector<4x16xf32>
    %364 = arith.negf %363 : vector<4x16xf32>
    %365 = math.exp %364 : vector<4x16xf32>
    %cst_58 = arith.constant 1.000000e+00 : f32
    %366 = vector.broadcast %cst_58 : f32 to vector<4x16xf32>
    %367 = arith.addf %366, %365 : vector<4x16xf32>
    %368 = arith.divf %366, %367 : vector<4x16xf32>
    %369 = vector.extract_strided_slice %348 {offsets = [0, 32], sizes = [4, 16], strides = [1, 1]} : vector<4x48xf32> to vector<4x16xf32>
    %370 = vector.extract_strided_slice %352 {offsets = [0, 32], sizes = [4, 16], strides = [1, 1]} : vector<4x48xf32> to vector<4x16xf32>
    %371 = arith.addf %370, %310 : vector<4x16xf32>
    %372 = arith.mulf %360, %371 : vector<4x16xf32>
    %373 = arith.addf %369, %372 : vector<4x16xf32>
    %374 = math.tanh %373 : vector<4x16xf32>
    %cst_59 = arith.constant 1.000000e+00 : f32
    %375 = vector.broadcast %cst_59 : f32 to vector<4x16xf32>
    %376 = arith.subf %375, %368 : vector<4x16xf32>
    %377 = arith.mulf %376, %374 : vector<4x16xf32>
    %378 = arith.mulf %368, %345 : vector<4x16xf32>
    %379 = arith.addf %377, %378 : vector<4x16xf32>
    %380 = vector.extract_strided_slice %307 {offsets = [4, 0], sizes = [2, 48], strides = [1, 1]} : vector<16x48xf32> to vector<2x48xf32>
    %381 = vector.extract_strided_slice %308 {offsets = [10, 0], sizes = [2, 48], strides = [1, 1]} : vector<16x48xf32> to vector<2x48xf32>
    %382 = tpu.concatenate %380, %381 in 0 : vector<2x48xf32>, vector<2x48xf32> -> vector<4x48xf32>
    %cst_60 = arith.constant dense<0.000000e+00> : vector<4x96xf32>
    %383 = tpu.matmul %379, %309, %cst_60 {dimension_numbers = #tpu.dot_dimension_numbers<[1], [0], [0], [1], [0, 0, 1, 1], [], []>} : vector<4x16xf32>, vector<16x96xf32>, vector<4x96xf32> -> vector<4x96xf32>
    %384 = vector.extract_strided_slice %383 {offsets = [0, 0], sizes = [2, 48], strides = [1, 1]} : vector<4x96xf32> to vector<2x48xf32>
    %385 = vector.extract_strided_slice %383 {offsets = [2, 48], sizes = [2, 48], strides = [1, 1]} : vector<4x96xf32> to vector<2x48xf32>
    %386 = tpu.concatenate %384, %385 in 0 : vector<2x48xf32>, vector<2x48xf32> -> vector<4x48xf32>
    %387 = vector.extract_strided_slice %382 {offsets = [0, 0], sizes = [4, 16], strides = [1, 1]} : vector<4x48xf32> to vector<4x16xf32>
    %388 = vector.extract_strided_slice %386 {offsets = [0, 0], sizes = [4, 16], strides = [1, 1]} : vector<4x48xf32> to vector<4x16xf32>
    %389 = arith.addf %387, %388 : vector<4x16xf32>
    %390 = arith.negf %389 : vector<4x16xf32>
    %391 = math.exp %390 : vector<4x16xf32>
    %cst_61 = arith.constant 1.000000e+00 : f32
    %392 = vector.broadcast %cst_61 : f32 to vector<4x16xf32>
    %393 = arith.addf %392, %391 : vector<4x16xf32>
    %394 = arith.divf %392, %393 : vector<4x16xf32>
    %395 = vector.extract_strided_slice %382 {offsets = [0, 16], sizes = [4, 16], strides = [1, 1]} : vector<4x48xf32> to vector<4x16xf32>
    %396 = vector.extract_strided_slice %386 {offsets = [0, 16], sizes = [4, 16], strides = [1, 1]} : vector<4x48xf32> to vector<4x16xf32>
    %397 = arith.addf %395, %396 : vector<4x16xf32>
    %398 = arith.negf %397 : vector<4x16xf32>
    %399 = math.exp %398 : vector<4x16xf32>
    %cst_62 = arith.constant 1.000000e+00 : f32
    %400 = vector.broadcast %cst_62 : f32 to vector<4x16xf32>
    %401 = arith.addf %400, %399 : vector<4x16xf32>
    %402 = arith.divf %400, %401 : vector<4x16xf32>
    %403 = vector.extract_strided_slice %382 {offsets = [0, 32], sizes = [4, 16], strides = [1, 1]} : vector<4x48xf32> to vector<4x16xf32>
    %404 = vector.extract_strided_slice %386 {offsets = [0, 32], sizes = [4, 16], strides = [1, 1]} : vector<4x48xf32> to vector<4x16xf32>
    %405 = arith.addf %404, %310 : vector<4x16xf32>
    %406 = arith.mulf %394, %405 : vector<4x16xf32>
    %407 = arith.addf %403, %406 : vector<4x16xf32>
    %408 = math.tanh %407 : vector<4x16xf32>
    %cst_63 = arith.constant 1.000000e+00 : f32
    %409 = vector.broadcast %cst_63 : f32 to vector<4x16xf32>
    %410 = arith.subf %409, %402 : vector<4x16xf32>
    %411 = arith.mulf %410, %408 : vector<4x16xf32>
    %412 = arith.mulf %402, %379 : vector<4x16xf32>
    %413 = arith.addf %411, %412 : vector<4x16xf32>
    %414 = vector.extract_strided_slice %307 {offsets = [6, 0], sizes = [2, 48], strides = [1, 1]} : vector<16x48xf32> to vector<2x48xf32>
    %415 = vector.extract_strided_slice %308 {offsets = [8, 0], sizes = [2, 48], strides = [1, 1]} : vector<16x48xf32> to vector<2x48xf32>
    %416 = tpu.concatenate %414, %415 in 0 : vector<2x48xf32>, vector<2x48xf32> -> vector<4x48xf32>
    %cst_64 = arith.constant dense<0.000000e+00> : vector<4x96xf32>
    %417 = tpu.matmul %413, %309, %cst_64 {dimension_numbers = #tpu.dot_dimension_numbers<[1], [0], [0], [1], [0, 0, 1, 1], [], []>} : vector<4x16xf32>, vector<16x96xf32>, vector<4x96xf32> -> vector<4x96xf32>
    %418 = vector.extract_strided_slice %417 {offsets = [0, 0], sizes = [2, 48], strides = [1, 1]} : vector<4x96xf32> to vector<2x48xf32>
    %419 = vector.extract_strided_slice %417 {offsets = [2, 48], sizes = [2, 48], strides = [1, 1]} : vector<4x96xf32> to vector<2x48xf32>
    %420 = tpu.concatenate %418, %419 in 0 : vector<2x48xf32>, vector<2x48xf32> -> vector<4x48xf32>
    %421 = vector.extract_strided_slice %416 {offsets = [0, 0], sizes = [4, 16], strides = [1, 1]} : vector<4x48xf32> to vector<4x16xf32>
    %422 = vector.extract_strided_slice %420 {offsets = [0, 0], sizes = [4, 16], strides = [1, 1]} : vector<4x48xf32> to vector<4x16xf32>
    %423 = arith.addf %421, %422 : vector<4x16xf32>
    %424 = arith.negf %423 : vector<4x16xf32>
    %425 = math.exp %424 : vector<4x16xf32>
    %cst_65 = arith.constant 1.000000e+00 : f32
    %426 = vector.broadcast %cst_65 : f32 to vector<4x16xf32>
    %427 = arith.addf %426, %425 : vector<4x16xf32>
    %428 = arith.divf %426, %427 : vector<4x16xf32>
    %429 = vector.extract_strided_slice %416 {offsets = [0, 16], sizes = [4, 16], strides = [1, 1]} : vector<4x48xf32> to vector<4x16xf32>
    %430 = vector.extract_strided_slice %420 {offsets = [0, 16], sizes = [4, 16], strides = [1, 1]} : vector<4x48xf32> to vector<4x16xf32>
    %431 = arith.addf %429, %430 : vector<4x16xf32>
    %432 = arith.negf %431 : vector<4x16xf32>
    %433 = math.exp %432 : vector<4x16xf32>
    %cst_66 = arith.constant 1.000000e+00 : f32
    %434 = vector.broadcast %cst_66 : f32 to vector<4x16xf32>
    %435 = arith.addf %434, %433 : vector<4x16xf32>
    %436 = arith.divf %434, %435 : vector<4x16xf32>
    %437 = vector.extract_strided_slice %416 {offsets = [0, 32], sizes = [4, 16], strides = [1, 1]} : vector<4x48xf32> to vector<4x16xf32>
    %438 = vector.extract_strided_slice %420 {offsets = [0, 32], sizes = [4, 16], strides = [1, 1]} : vector<4x48xf32> to vector<4x16xf32>
    %439 = arith.addf %438, %310 : vector<4x16xf32>
    %440 = arith.mulf %428, %439 : vector<4x16xf32>
    %441 = arith.addf %437, %440 : vector<4x16xf32>
    %442 = math.tanh %441 : vector<4x16xf32>
    %cst_67 = arith.constant 1.000000e+00 : f32
    %443 = vector.broadcast %cst_67 : f32 to vector<4x16xf32>
    %444 = arith.subf %443, %436 : vector<4x16xf32>
    %445 = arith.mulf %444, %442 : vector<4x16xf32>
    %446 = arith.mulf %436, %413 : vector<4x16xf32>
    %447 = arith.addf %445, %446 : vector<4x16xf32>
    %448 = vector.extract_strided_slice %307 {offsets = [8, 0], sizes = [2, 48], strides = [1, 1]} : vector<16x48xf32> to vector<2x48xf32>
    %449 = vector.extract_strided_slice %308 {offsets = [6, 0], sizes = [2, 48], strides = [1, 1]} : vector<16x48xf32> to vector<2x48xf32>
    %450 = tpu.concatenate %448, %449 in 0 : vector<2x48xf32>, vector<2x48xf32> -> vector<4x48xf32>
    %cst_68 = arith.constant dense<0.000000e+00> : vector<4x96xf32>
    %451 = tpu.matmul %447, %309, %cst_68 {dimension_numbers = #tpu.dot_dimension_numbers<[1], [0], [0], [1], [0, 0, 1, 1], [], []>} : vector<4x16xf32>, vector<16x96xf32>, vector<4x96xf32> -> vector<4x96xf32>
    %452 = vector.extract_strided_slice %451 {offsets = [0, 0], sizes = [2, 48], strides = [1, 1]} : vector<4x96xf32> to vector<2x48xf32>
    %453 = vector.extract_strided_slice %451 {offsets = [2, 48], sizes = [2, 48], strides = [1, 1]} : vector<4x96xf32> to vector<2x48xf32>
    %454 = tpu.concatenate %452, %453 in 0 : vector<2x48xf32>, vector<2x48xf32> -> vector<4x48xf32>
    %455 = vector.extract_strided_slice %450 {offsets = [0, 0], sizes = [4, 16], strides = [1, 1]} : vector<4x48xf32> to vector<4x16xf32>
    %456 = vector.extract_strided_slice %454 {offsets = [0, 0], sizes = [4, 16], strides = [1, 1]} : vector<4x48xf32> to vector<4x16xf32>
    %457 = arith.addf %455, %456 : vector<4x16xf32>
    %458 = arith.negf %457 : vector<4x16xf32>
    %459 = math.exp %458 : vector<4x16xf32>
    %cst_69 = arith.constant 1.000000e+00 : f32
    %460 = vector.broadcast %cst_69 : f32 to vector<4x16xf32>
    %461 = arith.addf %460, %459 : vector<4x16xf32>
    %462 = arith.divf %460, %461 : vector<4x16xf32>
    %463 = vector.extract_strided_slice %450 {offsets = [0, 16], sizes = [4, 16], strides = [1, 1]} : vector<4x48xf32> to vector<4x16xf32>
    %464 = vector.extract_strided_slice %454 {offsets = [0, 16], sizes = [4, 16], strides = [1, 1]} : vector<4x48xf32> to vector<4x16xf32>
    %465 = arith.addf %463, %464 : vector<4x16xf32>
    %466 = arith.negf %465 : vector<4x16xf32>
    %467 = math.exp %466 : vector<4x16xf32>
    %cst_70 = arith.constant 1.000000e+00 : f32
    %468 = vector.broadcast %cst_70 : f32 to vector<4x16xf32>
    %469 = arith.addf %468, %467 : vector<4x16xf32>
    %470 = arith.divf %468, %469 : vector<4x16xf32>
    %471 = vector.extract_strided_slice %450 {offsets = [0, 32], sizes = [4, 16], strides = [1, 1]} : vector<4x48xf32> to vector<4x16xf32>
    %472 = vector.extract_strided_slice %454 {offsets = [0, 32], sizes = [4, 16], strides = [1, 1]} : vector<4x48xf32> to vector<4x16xf32>
    %473 = arith.addf %472, %310 : vector<4x16xf32>
    %474 = arith.mulf %462, %473 : vector<4x16xf32>
    %475 = arith.addf %471, %474 : vector<4x16xf32>
    %476 = math.tanh %475 : vector<4x16xf32>
    %cst_71 = arith.constant 1.000000e+00 : f32
    %477 = vector.broadcast %cst_71 : f32 to vector<4x16xf32>
    %478 = arith.subf %477, %470 : vector<4x16xf32>
    %479 = arith.mulf %478, %476 : vector<4x16xf32>
    %480 = arith.mulf %470, %447 : vector<4x16xf32>
    %481 = arith.addf %479, %480 : vector<4x16xf32>
    %482 = vector.extract_strided_slice %307 {offsets = [10, 0], sizes = [2, 48], strides = [1, 1]} : vector<16x48xf32> to vector<2x48xf32>
    %483 = vector.extract_strided_slice %308 {offsets = [4, 0], sizes = [2, 48], strides = [1, 1]} : vector<16x48xf32> to vector<2x48xf32>
    %484 = tpu.concatenate %482, %483 in 0 : vector<2x48xf32>, vector<2x48xf32> -> vector<4x48xf32>
    %cst_72 = arith.constant dense<0.000000e+00> : vector<4x96xf32>
    %485 = tpu.matmul %481, %309, %cst_72 {dimension_numbers = #tpu.dot_dimension_numbers<[1], [0], [0], [1], [0, 0, 1, 1], [], []>} : vector<4x16xf32>, vector<16x96xf32>, vector<4x96xf32> -> vector<4x96xf32>
    %486 = vector.extract_strided_slice %485 {offsets = [0, 0], sizes = [2, 48], strides = [1, 1]} : vector<4x96xf32> to vector<2x48xf32>
    %487 = vector.extract_strided_slice %485 {offsets = [2, 48], sizes = [2, 48], strides = [1, 1]} : vector<4x96xf32> to vector<2x48xf32>
    %488 = tpu.concatenate %486, %487 in 0 : vector<2x48xf32>, vector<2x48xf32> -> vector<4x48xf32>
    %489 = vector.extract_strided_slice %484 {offsets = [0, 0], sizes = [4, 16], strides = [1, 1]} : vector<4x48xf32> to vector<4x16xf32>
    %490 = vector.extract_strided_slice %488 {offsets = [0, 0], sizes = [4, 16], strides = [1, 1]} : vector<4x48xf32> to vector<4x16xf32>
    %491 = arith.addf %489, %490 : vector<4x16xf32>
    %492 = arith.negf %491 : vector<4x16xf32>
    %493 = math.exp %492 : vector<4x16xf32>
    %cst_73 = arith.constant 1.000000e+00 : f32
    %494 = vector.broadcast %cst_73 : f32 to vector<4x16xf32>
    %495 = arith.addf %494, %493 : vector<4x16xf32>
    %496 = arith.divf %494, %495 : vector<4x16xf32>
    %497 = vector.extract_strided_slice %484 {offsets = [0, 16], sizes = [4, 16], strides = [1, 1]} : vector<4x48xf32> to vector<4x16xf32>
    %498 = vector.extract_strided_slice %488 {offsets = [0, 16], sizes = [4, 16], strides = [1, 1]} : vector<4x48xf32> to vector<4x16xf32>
    %499 = arith.addf %497, %498 : vector<4x16xf32>
    %500 = arith.negf %499 : vector<4x16xf32>
    %501 = math.exp %500 : vector<4x16xf32>
    %cst_74 = arith.constant 1.000000e+00 : f32
    %502 = vector.broadcast %cst_74 : f32 to vector<4x16xf32>
    %503 = arith.addf %502, %501 : vector<4x16xf32>
    %504 = arith.divf %502, %503 : vector<4x16xf32>
    %505 = vector.extract_strided_slice %484 {offsets = [0, 32], sizes = [4, 16], strides = [1, 1]} : vector<4x48xf32> to vector<4x16xf32>
    %506 = vector.extract_strided_slice %488 {offsets = [0, 32], sizes = [4, 16], strides = [1, 1]} : vector<4x48xf32> to vector<4x16xf32>
    %507 = arith.addf %506, %310 : vector<4x16xf32>
    %508 = arith.mulf %496, %507 : vector<4x16xf32>
    %509 = arith.addf %505, %508 : vector<4x16xf32>
    %510 = math.tanh %509 : vector<4x16xf32>
    %cst_75 = arith.constant 1.000000e+00 : f32
    %511 = vector.broadcast %cst_75 : f32 to vector<4x16xf32>
    %512 = arith.subf %511, %504 : vector<4x16xf32>
    %513 = arith.mulf %512, %510 : vector<4x16xf32>
    %514 = arith.mulf %504, %481 : vector<4x16xf32>
    %515 = arith.addf %513, %514 : vector<4x16xf32>
    %516 = vector.extract_strided_slice %307 {offsets = [12, 0], sizes = [2, 48], strides = [1, 1]} : vector<16x48xf32> to vector<2x48xf32>
    %517 = vector.extract_strided_slice %308 {offsets = [2, 0], sizes = [2, 48], strides = [1, 1]} : vector<16x48xf32> to vector<2x48xf32>
    %518 = tpu.concatenate %516, %517 in 0 : vector<2x48xf32>, vector<2x48xf32> -> vector<4x48xf32>
    %cst_76 = arith.constant dense<0.000000e+00> : vector<4x96xf32>
    %519 = tpu.matmul %515, %309, %cst_76 {dimension_numbers = #tpu.dot_dimension_numbers<[1], [0], [0], [1], [0, 0, 1, 1], [], []>} : vector<4x16xf32>, vector<16x96xf32>, vector<4x96xf32> -> vector<4x96xf32>
    %520 = vector.extract_strided_slice %519 {offsets = [0, 0], sizes = [2, 48], strides = [1, 1]} : vector<4x96xf32> to vector<2x48xf32>
    %521 = vector.extract_strided_slice %519 {offsets = [2, 48], sizes = [2, 48], strides = [1, 1]} : vector<4x96xf32> to vector<2x48xf32>
    %522 = tpu.concatenate %520, %521 in 0 : vector<2x48xf32>, vector<2x48xf32> -> vector<4x48xf32>
    %523 = vector.extract_strided_slice %518 {offsets = [0, 0], sizes = [4, 16], strides = [1, 1]} : vector<4x48xf32> to vector<4x16xf32>
    %524 = vector.extract_strided_slice %522 {offsets = [0, 0], sizes = [4, 16], strides = [1, 1]} : vector<4x48xf32> to vector<4x16xf32>
    %525 = arith.addf %523, %524 : vector<4x16xf32>
    %526 = arith.negf %525 : vector<4x16xf32>
    %527 = math.exp %526 : vector<4x16xf32>
    %cst_77 = arith.constant 1.000000e+00 : f32
    %528 = vector.broadcast %cst_77 : f32 to vector<4x16xf32>
    %529 = arith.addf %528, %527 : vector<4x16xf32>
    %530 = arith.divf %528, %529 : vector<4x16xf32>
    %531 = vector.extract_strided_slice %518 {offsets = [0, 16], sizes = [4, 16], strides = [1, 1]} : vector<4x48xf32> to vector<4x16xf32>
    %532 = vector.extract_strided_slice %522 {offsets = [0, 16], sizes = [4, 16], strides = [1, 1]} : vector<4x48xf32> to vector<4x16xf32>
    %533 = arith.addf %531, %532 : vector<4x16xf32>
    %534 = arith.negf %533 : vector<4x16xf32>
    %535 = math.exp %534 : vector<4x16xf32>
    %cst_78 = arith.constant 1.000000e+00 : f32
    %536 = vector.broadcast %cst_78 : f32 to vector<4x16xf32>
    %537 = arith.addf %536, %535 : vector<4x16xf32>
    %538 = arith.divf %536, %537 : vector<4x16xf32>
    %539 = vector.extract_strided_slice %518 {offsets = [0, 32], sizes = [4, 16], strides = [1, 1]} : vector<4x48xf32> to vector<4x16xf32>
    %540 = vector.extract_strided_slice %522 {offsets = [0, 32], sizes = [4, 16], strides = [1, 1]} : vector<4x48xf32> to vector<4x16xf32>
    %541 = arith.addf %540, %310 : vector<4x16xf32>
    %542 = arith.mulf %530, %541 : vector<4x16xf32>
    %543 = arith.addf %539, %542 : vector<4x16xf32>
    %544 = math.tanh %543 : vector<4x16xf32>
    %cst_79 = arith.constant 1.000000e+00 : f32
    %545 = vector.broadcast %cst_79 : f32 to vector<4x16xf32>
    %546 = arith.subf %545, %538 : vector<4x16xf32>
    %547 = arith.mulf %546, %544 : vector<4x16xf32>
    %548 = arith.mulf %538, %515 : vector<4x16xf32>
    %549 = arith.addf %547, %548 : vector<4x16xf32>
    %550 = vector.extract_strided_slice %307 {offsets = [14, 0], sizes = [2, 48], strides = [1, 1]} : vector<16x48xf32> to vector<2x48xf32>
    %551 = vector.extract_strided_slice %308 {offsets = [0, 0], sizes = [2, 48], strides = [1, 1]} : vector<16x48xf32> to vector<2x48xf32>
    %552 = tpu.concatenate %550, %551 in 0 : vector<2x48xf32>, vector<2x48xf32> -> vector<4x48xf32>
    %cst_80 = arith.constant dense<0.000000e+00> : vector<4x96xf32>
    %553 = tpu.matmul %549, %309, %cst_80 {dimension_numbers = #tpu.dot_dimension_numbers<[1], [0], [0], [1], [0, 0, 1, 1], [], []>} : vector<4x16xf32>, vector<16x96xf32>, vector<4x96xf32> -> vector<4x96xf32>
    %554 = vector.extract_strided_slice %553 {offsets = [0, 0], sizes = [2, 48], strides = [1, 1]} : vector<4x96xf32> to vector<2x48xf32>
    %555 = vector.extract_strided_slice %553 {offsets = [2, 48], sizes = [2, 48], strides = [1, 1]} : vector<4x96xf32> to vector<2x48xf32>
    %556 = tpu.concatenate %554, %555 in 0 : vector<2x48xf32>, vector<2x48xf32> -> vector<4x48xf32>
    %557 = vector.extract_strided_slice %552 {offsets = [0, 0], sizes = [4, 16], strides = [1, 1]} : vector<4x48xf32> to vector<4x16xf32>
    %558 = vector.extract_strided_slice %556 {offsets = [0, 0], sizes = [4, 16], strides = [1, 1]} : vector<4x48xf32> to vector<4x16xf32>
    %559 = arith.addf %557, %558 : vector<4x16xf32>
    %560 = arith.negf %559 : vector<4x16xf32>
    %561 = math.exp %560 : vector<4x16xf32>
    %cst_81 = arith.constant 1.000000e+00 : f32
    %562 = vector.broadcast %cst_81 : f32 to vector<4x16xf32>
    %563 = arith.addf %562, %561 : vector<4x16xf32>
    %564 = arith.divf %562, %563 : vector<4x16xf32>
    %565 = vector.extract_strided_slice %552 {offsets = [0, 16], sizes = [4, 16], strides = [1, 1]} : vector<4x48xf32> to vector<4x16xf32>
    %566 = vector.extract_strided_slice %556 {offsets = [0, 16], sizes = [4, 16], strides = [1, 1]} : vector<4x48xf32> to vector<4x16xf32>
    %567 = arith.addf %565, %566 : vector<4x16xf32>
    %568 = arith.negf %567 : vector<4x16xf32>
    %569 = math.exp %568 : vector<4x16xf32>
    %cst_82 = arith.constant 1.000000e+00 : f32
    %570 = vector.broadcast %cst_82 : f32 to vector<4x16xf32>
    %571 = arith.addf %570, %569 : vector<4x16xf32>
    %572 = arith.divf %570, %571 : vector<4x16xf32>
    %573 = vector.extract_strided_slice %552 {offsets = [0, 32], sizes = [4, 16], strides = [1, 1]} : vector<4x48xf32> to vector<4x16xf32>
    %574 = vector.extract_strided_slice %556 {offsets = [0, 32], sizes = [4, 16], strides = [1, 1]} : vector<4x48xf32> to vector<4x16xf32>
    %575 = arith.addf %574, %310 : vector<4x16xf32>
    %576 = arith.mulf %564, %575 : vector<4x16xf32>
    %577 = arith.addf %573, %576 : vector<4x16xf32>
    %578 = math.tanh %577 : vector<4x16xf32>
    %cst_83 = arith.constant 1.000000e+00 : f32
    %579 = vector.broadcast %cst_83 : f32 to vector<4x16xf32>
    %580 = arith.subf %579, %572 : vector<4x16xf32>
    %581 = arith.mulf %580, %578 : vector<4x16xf32>
    %582 = arith.mulf %572, %549 : vector<4x16xf32>
    %583 = arith.addf %581, %582 : vector<4x16xf32>
    %584 = vector.extract_strided_slice %345 {offsets = [0, 0], sizes = [1, 16], strides = [1, 1]} : vector<4x16xf32> to vector<1x16xf32>
    %585 = vector.extract_strided_slice %379 {offsets = [0, 0], sizes = [1, 16], strides = [1, 1]} : vector<4x16xf32> to vector<1x16xf32>
    %586 = vector.extract_strided_slice %413 {offsets = [0, 0], sizes = [1, 16], strides = [1, 1]} : vector<4x16xf32> to vector<1x16xf32>
    %587 = vector.extract_strided_slice %447 {offsets = [0, 0], sizes = [1, 16], strides = [1, 1]} : vector<4x16xf32> to vector<1x16xf32>
    %588 = vector.extract_strided_slice %481 {offsets = [0, 0], sizes = [1, 16], strides = [1, 1]} : vector<4x16xf32> to vector<1x16xf32>
    %589 = vector.extract_strided_slice %515 {offsets = [0, 0], sizes = [1, 16], strides = [1, 1]} : vector<4x16xf32> to vector<1x16xf32>
    %590 = vector.extract_strided_slice %549 {offsets = [0, 0], sizes = [1, 16], strides = [1, 1]} : vector<4x16xf32> to vector<1x16xf32>
    %591 = vector.extract_strided_slice %583 {offsets = [0, 0], sizes = [1, 16], strides = [1, 1]} : vector<4x16xf32> to vector<1x16xf32>
    %592 = tpu.concatenate %584, %585, %586, %587, %588, %589, %590, %591 in 0 : vector<1x16xf32>, vector<1x16xf32>, vector<1x16xf32>, vector<1x16xf32>, vector<1x16xf32>, vector<1x16xf32>, vector<1x16xf32>, vector<1x16xf32> -> vector<8x16xf32>
    %593 = vector.extract_strided_slice %583 {offsets = [2, 0], sizes = [1, 16], strides = [1, 1]} : vector<4x16xf32> to vector<1x16xf32>
    %594 = vector.extract_strided_slice %549 {offsets = [2, 0], sizes = [1, 16], strides = [1, 1]} : vector<4x16xf32> to vector<1x16xf32>
    %595 = vector.extract_strided_slice %515 {offsets = [2, 0], sizes = [1, 16], strides = [1, 1]} : vector<4x16xf32> to vector<1x16xf32>
    %596 = vector.extract_strided_slice %481 {offsets = [2, 0], sizes = [1, 16], strides = [1, 1]} : vector<4x16xf32> to vector<1x16xf32>
    %597 = vector.extract_strided_slice %447 {offsets = [2, 0], sizes = [1, 16], strides = [1, 1]} : vector<4x16xf32> to vector<1x16xf32>
    %598 = vector.extract_strided_slice %413 {offsets = [2, 0], sizes = [1, 16], strides = [1, 1]} : vector<4x16xf32> to vector<1x16xf32>
    %599 = vector.extract_strided_slice %379 {offsets = [2, 0], sizes = [1, 16], strides = [1, 1]} : vector<4x16xf32> to vector<1x16xf32>
    %600 = vector.extract_strided_slice %345 {offsets = [2, 0], sizes = [1, 16], strides = [1, 1]} : vector<4x16xf32> to vector<1x16xf32>
    %601 = tpu.concatenate %593, %594, %595, %596, %597, %598, %599, %600 in 0 : vector<1x16xf32>, vector<1x16xf32>, vector<1x16xf32>, vector<1x16xf32>, vector<1x16xf32>, vector<1x16xf32>, vector<1x16xf32>, vector<1x16xf32> -> vector<8x16xf32>
    %602 = tpu.concatenate %592, %601 in 1 : vector<8x16xf32>, vector<8x16xf32> -> vector<8x32xf32>
    %603 = vector.extract_strided_slice %345 {offsets = [1, 0], sizes = [1, 16], strides = [1, 1]} : vector<4x16xf32> to vector<1x16xf32>
    %604 = vector.extract_strided_slice %379 {offsets = [1, 0], sizes = [1, 16], strides = [1, 1]} : vector<4x16xf32> to vector<1x16xf32>
    %605 = vector.extract_strided_slice %413 {offsets = [1, 0], sizes = [1, 16], strides = [1, 1]} : vector<4x16xf32> to vector<1x16xf32>
    %606 = vector.extract_strided_slice %447 {offsets = [1, 0], sizes = [1, 16], strides = [1, 1]} : vector<4x16xf32> to vector<1x16xf32>
    %607 = vector.extract_strided_slice %481 {offsets = [1, 0], sizes = [1, 16], strides = [1, 1]} : vector<4x16xf32> to vector<1x16xf32>
    %608 = vector.extract_strided_slice %515 {offsets = [1, 0], sizes = [1, 16], strides = [1, 1]} : vector<4x16xf32> to vector<1x16xf32>
    %609 = vector.extract_strided_slice %549 {offsets = [1, 0], sizes = [1, 16], strides = [1, 1]} : vector<4x16xf32> to vector<1x16xf32>
    %610 = vector.extract_strided_slice %583 {offsets = [1, 0], sizes = [1, 16], strides = [1, 1]} : vector<4x16xf32> to vector<1x16xf32>
    %611 = tpu.concatenate %603, %604, %605, %606, %607, %608, %609, %610 in 0 : vector<1x16xf32>, vector<1x16xf32>, vector<1x16xf32>, vector<1x16xf32>, vector<1x16xf32>, vector<1x16xf32>, vector<1x16xf32>, vector<1x16xf32> -> vector<8x16xf32>
    %612 = vector.extract_strided_slice %583 {offsets = [3, 0], sizes = [1, 16], strides = [1, 1]} : vector<4x16xf32> to vector<1x16xf32>
    %613 = vector.extract_strided_slice %549 {offsets = [3, 0], sizes = [1, 16], strides = [1, 1]} : vector<4x16xf32> to vector<1x16xf32>
    %614 = vector.extract_strided_slice %515 {offsets = [3, 0], sizes = [1, 16], strides = [1, 1]} : vector<4x16xf32> to vector<1x16xf32>
    %615 = vector.extract_strided_slice %481 {offsets = [3, 0], sizes = [1, 16], strides = [1, 1]} : vector<4x16xf32> to vector<1x16xf32>
    %616 = vector.extract_strided_slice %447 {offsets = [3, 0], sizes = [1, 16], strides = [1, 1]} : vector<4x16xf32> to vector<1x16xf32>
    %617 = vector.extract_strided_slice %413 {offsets = [3, 0], sizes = [1, 16], strides = [1, 1]} : vector<4x16xf32> to vector<1x16xf32>
    %618 = vector.extract_strided_slice %379 {offsets = [3, 0], sizes = [1, 16], strides = [1, 1]} : vector<4x16xf32> to vector<1x16xf32>
    %619 = vector.extract_strided_slice %345 {offsets = [3, 0], sizes = [1, 16], strides = [1, 1]} : vector<4x16xf32> to vector<1x16xf32>
    %620 = tpu.concatenate %612, %613, %614, %615, %616, %617, %618, %619 in 0 : vector<1x16xf32>, vector<1x16xf32>, vector<1x16xf32>, vector<1x16xf32>, vector<1x16xf32>, vector<1x16xf32>, vector<1x16xf32>, vector<1x16xf32> -> vector<8x16xf32>
    %621 = tpu.concatenate %611, %620 in 1 : vector<8x16xf32>, vector<8x16xf32> -> vector<8x32xf32>
    %622 = vector.shape_cast %602 : vector<8x32xf32> to vector<1x8x32xf32>
    %623 = vector.shape_cast %621 : vector<8x32xf32> to vector<1x8x32xf32>
    %624 = tpu.concatenate %622, %623 in 0 : vector<1x8x32xf32>, vector<1x8x32xf32> -> vector<2x8x32xf32>
    %625 = vector.shape_cast %602 : vector<8x32xf32> to vector<8x1x32xf32>
    %626 = vector.shape_cast %621 : vector<8x32xf32> to vector<8x1x32xf32>
    %627 = tpu.concatenate %625, %626 in 1 : vector<8x1x32xf32>, vector<8x1x32xf32> -> vector<8x2x32xf32>
    %628 = vector.shape_cast %627 : vector<8x2x32xf32> to vector<16x32xf32>
    %c0_84 = arith.constant 0 : index
    %c0_85 = arith.constant 0 : index
    %629 = vector.load %arg19[%c0_84, %c0_85] : memref<16x32xf32, #tpu.memory_space<vmem>>, vector<16x32xf32>
    tpu.vector_store %arg19[%c0_84, %c0_85], %628 {strides = array<i32>} : memref<16x32xf32, #tpu.memory_space<vmem>>, vector<16x32xf32>,
    %c0_86 = arith.constant 0 : index
    %c0_87 = arith.constant 0 : index
    %630 = vector.load %arg10[%c0_86, %c0_87] : memref<2x8xf32, #tpu.memory_space<vmem>>, vector<2x8xf32>
    %631 = vector.shape_cast %624 : vector<2x8x32xf32> to vector<16x32xf32>
    %c0_88 = arith.constant 0 : index
    %c0_89 = arith.constant 0 : index
    %632 = vector.load %arg13[%c0_88, %c0_89] : memref<32x32xf32, #tpu.memory_space<vmem>>, vector<32x32xf32>
    %cst_90 = arith.constant dense<0.000000e+00> : vector<16x32xf32>
    %633 = tpu.matmul %631, %632, %cst_90 {dimension_numbers = #tpu.dot_dimension_numbers<[1], [0], [0], [1], [0, 0, 1, 1], [], []>} : vector<16x32xf32>, vector<32x32xf32>, vector<16x32xf32> -> vector<16x32xf32>
    %c0_91 = arith.constant 0 : index
    %c0_92 = arith.constant 0 : index
    %634 = vector.load %arg14[%c0_91, %c0_92] : memref<1x32xf32, #tpu.memory_space<vmem>>, vector<1x32xf32>
    %635 = vector.broadcast %634 : vector<1x32xf32> to vector<16x32xf32>
    %636 = arith.addf %633, %635 : vector<16x32xf32>
    %637 = vector.shape_cast %636 : vector<16x32xf32> to vector<2x8x32xf32>
    "tpu.trace_start"() <{level = 10 : i32, message = "btm,bsm->bts"}> : () -> ()
    %cst_93 = arith.constant dense<0.000000e+00> : vector<2x8x8xf32>
    %638 = tpu.matmul %637, %624, %cst_93 {dimension_numbers = #tpu.dot_dimension_numbers<[2], [2], [1], [1], [0, 0, 0, 1, 1, 1], [0], [0]>} : vector<2x8x32xf32>, vector<2x8x32xf32>, vector<2x8x8xf32> -> vector<2x8x8xf32>
    "tpu.trace_stop"() : () -> ()
    %639 = math.tanh %638 : vector<2x8x8xf32>
    %640 = math.exp %639 : vector<2x8x8xf32>
    %641 = vector.shape_cast %630 : vector<2x8xf32> to vector<2x1x8xf32>
    %642 = vector.broadcast %641 : vector<2x1x8xf32> to vector<2x8x8xf32>
    %643 = arith.mulf %640, %642 : vector<2x8x8xf32>
    %cst_94 = arith.constant dense<0.000000e+00> : vector<2x8xf32>
    %644 = vector.multi_reduction <add>, %643, %cst_94 [2] : vector<2x8x8xf32> to vector<2x8xf32>
    %645 = vector.shape_cast %644 : vector<2x8xf32> to vector<2x8x1xf32>
    %646 = vector.broadcast %645 : vector<2x8x1xf32> to vector<2x8x8xf32>
    %647 = arith.divf %643, %646 : vector<2x8x8xf32>
    %648 = vector.extract_strided_slice %647 {offsets = [0, 0, 0], sizes = [1, 8, 8], strides = [1, 1, 1]} : vector<2x8x8xf32> to vector<1x8x8xf32>
    %649 = vector.shape_cast %648 : vector<1x8x8xf32> to vector<8x8xf32>
    %650 = vector.extract_strided_slice %647 {offsets = [1, 0, 0], sizes = [1, 8, 8], strides = [1, 1, 1]} : vector<2x8x8xf32> to vector<1x8x8xf32>
    %651 = vector.shape_cast %650 : vector<1x8x8xf32> to vector<8x8xf32>
    %652 = vector.shape_cast %649 : vector<8x8xf32> to vector<8x1x8xf32>
    %653 = vector.shape_cast %651 : vector<8x8xf32> to vector<8x1x8xf32>
    %654 = tpu.concatenate %652, %653 in 1 : vector<8x1x8xf32>, vector<8x1x8xf32> -> vector<8x2x8xf32>
    %c0_95 = arith.constant 0 : index
    %c0_96 = arith.constant 0 : index
    %c0_97 = arith.constant 0 : index
    %655 = vector.load %arg21[%c0_95, %c0_96, %c0_97] : memref<8x2x8xf32, #tpu.memory_space<vmem>>, vector<8x2x8xf32>
    tpu.vector_store %arg21[%c0_95, %c0_96, %c0_97], %654 {strides = array<i32>} : memref<8x2x8xf32, #tpu.memory_space<vmem>>, vector<8x2x8xf32>,
    "tpu.trace_start"() <{level = 10 : i32, message = "bts,bsm->btm"}> : () -> ()
    %cst_98 = arith.constant dense<0.000000e+00> : vector<2x8x32xf32>
    %656 = tpu.matmul %647, %624, %cst_98 {dimension_numbers = #tpu.dot_dimension_numbers<[2], [1], [1], [2], [0, 0, 0, 1, 1, 2], [0], [0]>} : vector<2x8x8xf32>, vector<2x8x32xf32>, vector<2x8x32xf32> -> vector<2x8x32xf32>
    "tpu.trace_stop"() : () -> ()
    %657 = vector.extract_strided_slice %656 {offsets = [0, 0, 0], sizes = [1, 8, 32], strides = [1, 1, 1]} : vector<2x8x32xf32> to vector<1x8x32xf32>
    %658 = vector.shape_cast %657 : vector<1x8x32xf32> to vector<8x32xf32>
    %659 = vector.extract_strided_slice %656 {offsets = [1, 0, 0], sizes = [1, 8, 32], strides = [1, 1, 1]} : vector<2x8x32xf32> to vector<1x8x32xf32>
    %660 = vector.shape_cast %659 : vector<1x8x32xf32> to vector<8x32xf32>
    %661 = vector.shape_cast %658 : vector<8x32xf32> to vector<8x1x32xf32>
    %662 = vector.shape_cast %660 : vector<8x32xf32> to vector<8x1x32xf32>
    %663 = tpu.concatenate %661, %662 in 1 : vector<8x1x32xf32>, vector<8x1x32xf32> -> vector<8x2x32xf32>
    %664 = vector.shape_cast %663 : vector<8x2x32xf32> to vector<16x32xf32>
    %c0_99 = arith.constant 0 : index
    %c0_100 = arith.constant 0 : index
    %665 = vector.load %arg15[%c0_99, %c0_100] : memref<32x32xf32, #tpu.memory_space<vmem>>, vector<32x32xf32>
    %cst_101 = arith.constant dense<0.000000e+00> : vector<16x32xf32>
    %666 = tpu.matmul %664, %665, %cst_101 {dimension_numbers = #tpu.dot_dimension_numbers<[1], [0], [0], [1], [0, 0, 1, 1], [], []>} : vector<16x32xf32>, vector<32x32xf32>, vector<16x32xf32> -> vector<16x32xf32>
    %c0_102 = arith.constant 0 : index
    %c0_103 = arith.constant 0 : index
    %667 = vector.load %arg16[%c0_102, %c0_103] : memref<1x32xf32, #tpu.memory_space<vmem>>, vector<1x32xf32>
    %668 = vector.broadcast %667 : vector<1x32xf32> to vector<16x32xf32>
    %669 = arith.addf %666, %668 : vector<16x32xf32>
    %cst_104 = arith.constant 0.000000e+00 : f32
    %670 = vector.broadcast %cst_104 : f32 to vector<16x32xf32>
    %671 = arith.maximumf %669, %670 : vector<16x32xf32>
    %c0_105 = arith.constant 0 : index
    %c0_106 = arith.constant 0 : index
    %672 = vector.load %arg17[%c0_105, %c0_106] : memref<32x7xf32, #tpu.memory_space<vmem>>, vector<32x7xf32>
    %cst_107 = arith.constant dense<0.000000e+00> : vector<16x7xf32>
    %673 = tpu.matmul %671, %672, %cst_107 {dimension_numbers = #tpu.dot_dimension_numbers<[1], [0], [0], [1], [0, 0, 1, 1], [], []>} : vector<16x32xf32>, vector<32x7xf32>, vector<16x7xf32> -> vector<16x7xf32>
    %c0_108 = arith.constant 0 : index
    %c0_109 = arith.constant 0 : index
    %674 = vector.load %arg18[%c0_108, %c0_109] : memref<1x7xf32, #tpu.memory_space<vmem>>, vector<1x7xf32>
    %675 = vector.broadcast %674 : vector<1x7xf32> to vector<16x7xf32>
    %676 = arith.addf %673, %675 : vector<16x7xf32>
    %cst_110 = arith.constant dense<0xFF800000> : vector<16xf32>
    %677 = vector.multi_reduction <maximumf>, %676, %cst_110 [1] : vector<16x7xf32> to vector<16xf32>
    %678 = vector.shape_cast %677 : vector<16xf32> to vector<16x1xf32>
    %679 = vector.broadcast %678 : vector<16x1xf32> to vector<16x7xf32>
    %680 = arith.subf %676, %679 : vector<16x7xf32>
    %681 = math.exp %680 : vector<16x7xf32>
    %cst_111 = arith.constant dense<0.000000e+00> : vector<16xf32>
    %682 = vector.multi_reduction <add>, %681, %cst_111 [1] : vector<16x7xf32> to vector<16xf32>
    %683 = vector.shape_cast %682 : vector<16xf32> to vector<16x1xf32>
    %684 = math.log %683 : vector<16x1xf32>
    %685 = arith.addf %678, %684 : vector<16x1xf32>
    %686 = vector.broadcast %685 : vector<16x1xf32> to vector<16x7xf32>
    %687 = arith.subf %676, %686 : vector<16x7xf32>
    %c0_112 = arith.constant 0 : index
    %c0_113 = arith.constant 0 : index
    %688 = vector.load %arg20[%c0_112, %c0_113] : memref<16x7xf32, #tpu.memory_space<vmem>>, vector<16x7xf32>
    tpu.vector_store %arg20[%c0_112, %c0_113], %687 {strides = array<i32>} : memref<16x7xf32, #tpu.memory_space<vmem>>, vector<16x7xf32>,
    %689 = tpu.iota {dimensions = array<i32: 1>} : vector<16x7xi32>
    %c0_114 = arith.constant 0 : index
    %c0_115 = arith.constant 0 : index
    %690 = vector.load %arg11[%c0_114, %c0_115] : memref<16x1xi32, #tpu.memory_space<vmem>>, vector<16x1xi32>
    %691 = vector.broadcast %690 : vector<16x1xi32> to vector<16x7xi32>
    %692 = arith.cmpi eq, %689, %691 : vector<16x7xi32>
    %cst_116 = arith.constant 0.000000e+00 : f32
    %693 = vector.broadcast %cst_116 : f32 to vector<16x7xf32>
    %694 = arith.select %692, %687, %693 : vector<16x7xi1>, vector<16x7xf32>
    %cst_117 = arith.constant dense<0.000000e+00> : vector<16xf32>
    %695 = vector.multi_reduction <add>, %694, %cst_117 [1] : vector<16x7xf32> to vector<16xf32>
    %696 = vector.shape_cast %695 : vector<16xf32> to vector<16x1xf32>
    %c0_118 = arith.constant 0 : index
    %c0_119 = arith.constant 0 : index
    %697 = vector.load %arg12[%c0_118, %c0_119] : memref<16x1xf32, #tpu.memory_space<vmem>>, vector<16x1xf32>
    %698 = arith.mulf %696, %697 : vector<16x1xf32>
    %699 = vector.shape_cast %698 : vector<16x1xf32> to vector<1x16x1xf32>
    %cst_120 = arith.constant dense<0.000000e+00> : vector<1xf32>
    %700 = vector.multi_reduction <add>, %699, %cst_120 [1, 2] : vector<1x16x1xf32> to vector<1xf32>
    %701 = vector.shape_cast %700 : vector<1xf32> to vector<1x1x1xf32>
    %702 = vector.extract %701[0, 0, 0] : f32 from vector<1x1x1xf32>
    %703 = vector.broadcast %702 : f32 to vector<1x1xf32>
    %c0_121 = arith.constant 0 : index
    %c0_122 = arith.constant 0 : index
    %704 = vector.load %arg12[%c0_121, %c0_122] : memref<16x1xf32, #tpu.memory_space<vmem>>, vector<16x1xf32>
    %705 = vector.shape_cast %704 : vector<16x1xf32> to vector<1x16x1xf32>
    %cst_123 = arith.constant dense<0.000000e+00> : vector<1xf32>
    %706 = vector.multi_reduction <add>, %705, %cst_123 [1, 2] : vector<1x16x1xf32> to vector<1xf32>
    %707 = vector.shape_cast %706 : vector<1xf32> to vector<1x1x1xf32>
    %708 = vector.extract %707[0, 0, 0] : f32 from vector<1x1x1xf32>
    %709 = vector.broadcast %708 : f32 to vector<1x1xf32>
    %cst_124 = arith.constant 0.000000e+00 : f32
    %710 = vector.broadcast %cst_124 : f32 to vector<1x1xf32>
    %711 = arith.subf %710, %703 : vector<1x1xf32>
    %712 = arith.divf %711, %709 : vector<1x1xf32>
    %c0_125 = arith.constant 0 : index
    %c0_126 = arith.constant 0 : index
    %713 = vector.load %arg22[%c0_125, %c0_126] : memref<1x1xf32, #tpu.memory_space<vmem>>, vector<1x1xf32>
    tpu.vector_store %arg22[%c0_125, %c0_126], %712 {strides = array<i32>} : memref<1x1xf32, #tpu.memory_space<vmem>>, vector<1x1xf32>,
    return
  }
  func.func @transform_0(%arg0: i32) -> (i32, i32) {
    %c0_i32 = arith.constant 0 : i32
    %c0_i32_0 = arith.constant 0 : i32
    %c0_i32_1 = arith.constant 0 : i32
    return %c0_i32, %c0_i32_0 : i32, i32
  }
  func.func @transform_1(%arg0: i32) -> (i32, i32) {
    %c0_i32 = arith.constant 0 : i32
    %c0_i32_0 = arith.constant 0 : i32
    %c0_i32_1 = arith.constant 0 : i32
    return %c0_i32, %c0_i32_0 : i32, i32
  }
  func.func @transform_2(%arg0: i32) -> (i32, i32) {
    %c0_i32 = arith.constant 0 : i32
    %c0_i32_0 = arith.constant 0 : i32
    %c0_i32_1 = arith.constant 0 : i32
    return %c0_i32, %c0_i32_0 : i32, i32
  }
  func.func @transform_3(%arg0: i32) -> (i32, i32) {
    %c0_i32 = arith.constant 0 : i32
    %c0_i32_0 = arith.constant 0 : i32
    %c0_i32_1 = arith.constant 0 : i32
    return %c0_i32, %c0_i32_0 : i32, i32
  }
  func.func @transform_4(%arg0: i32) -> (i32, i32) {
    %c0_i32 = arith.constant 0 : i32
    %c0_i32_0 = arith.constant 0 : i32
    %c0_i32_1 = arith.constant 0 : i32
    return %c0_i32, %c0_i32_0 : i32, i32
  }
  func.func @transform_5(%arg0: i32) -> (i32, i32) {
    %c0_i32 = arith.constant 0 : i32
    %c0_i32_0 = arith.constant 0 : i32
    %c0_i32_1 = arith.constant 0 : i32
    return %c0_i32, %c0_i32_0 : i32, i32
  }
  func.func @transform_6(%arg0: i32) -> (i32, i32) {
    %c0_i32 = arith.constant 0 : i32
    %c0_i32_0 = arith.constant 0 : i32
    %c0_i32_1 = arith.constant 0 : i32
    return %c0_i32, %c0_i32_0 : i32, i32
  }
  func.func @transform_7(%arg0: i32) -> (i32, i32) {
    %c0_i32 = arith.constant 0 : i32
    %c0_i32_0 = arith.constant 0 : i32
    %c0_i32_1 = arith.constant 0 : i32
    return %c0_i32, %c0_i32_0 : i32, i32
  }
  func.func @transform_8(%arg0: i32) -> (i32, i32) {
    %c0_i32 = arith.constant 0 : i32
    %c0_i32_0 = arith.constant 0 : i32
    %c0_i32_1 = arith.constant 0 : i32
    return %c0_i32, %c0_i32_0 : i32, i32
  }
  func.func @transform_9(%arg0: i32) -> (i32, i32) {
    %c0_i32 = arith.constant 0 : i32
    %c0_i32_0 = arith.constant 0 : i32
    %c0_i32_1 = arith.constant 0 : i32
    return %c0_i32, %c0_i32_0 : i32, i32
  }
  func.func @transform_10(%arg0: i32) -> (i32, i32) {
    %c0_i32 = arith.constant 0 : i32
    %c0_i32_0 = arith.constant 0 : i32
    %c0_i32_1 = arith.constant 0 : i32
    return %c0_i32, %c0_i32_0 : i32, i32
  }
  func.func @transform_11(%arg0: i32) -> (i32, i32) {
    %c0_i32 = arith.constant 0 : i32
    %c0_i32_0 = arith.constant 0 : i32
    %c0_i32_1 = arith.constant 0 : i32
    return %c0_i32, %c0_i32_0 : i32, i32
  }
  func.func @transform_12(%arg0: i32) -> (i32, i32) {
    %c0_i32 = arith.constant 0 : i32
    %c0_i32_0 = arith.constant 0 : i32
    %c0_i32_1 = arith.constant 0 : i32
    return %c0_i32, %c0_i32_0 : i32, i32
  }
  func.func @transform_13(%arg0: i32) -> (i32, i32) {
    %c0_i32 = arith.constant 0 : i32
    %c0_i32_0 = arith.constant 0 : i32
    %c0_i32_1 = arith.constant 0 : i32
    return %c0_i32, %c0_i32_0 : i32, i32
  }
  func.func @transform_14(%arg0: i32) -> (i32, i32) {
    %c0_i32 = arith.constant 0 : i32
    %c0_i32_0 = arith.constant 0 : i32
    %c0_i32_1 = arith.constant 0 : i32
    return %c0_i32, %c0_i32_0 : i32, i32
  }
  func.func @transform_15(%arg0: i32) -> (i32, i32) {
    %c0_i32 = arith.constant 0 : i32
    %c0_i32_0 = arith.constant 0 : i32
    %c0_i32_1 = arith.constant 0 : i32
    return %c0_i32, %c0_i32_0 : i32, i32
  }
  func.func @transform_16(%arg0: i32) -> (i32, i32) {
    %c0_i32 = arith.constant 0 : i32
    %c0_i32_0 = arith.constant 0 : i32
    %c0_i32_1 = arith.constant 0 : i32
    return %c0_i32, %c0_i32_0 : i32, i32
  }
  func.func @transform_17(%arg0: i32) -> (i32, i32) {
    %c0_i32 = arith.constant 0 : i32
    %c0_i32_0 = arith.constant 0 : i32
    %c0_i32_1 = arith.constant 0 : i32
    return %c0_i32, %c0_i32_0 : i32, i32
  }
  func.func @transform_18(%arg0: i32) -> (i32, i32) {
    %c0_i32 = arith.constant 0 : i32
    %c0_i32_0 = arith.constant 0 : i32
    %c0_i32_1 = arith.constant 0 : i32
    return %c0_i32, %c0_i32_0 : i32, i32
  }
  func.func @transform_19(%arg0: i32) -> (i32, i32) {
    %c0_i32 = arith.constant 0 : i32
    %c0_i32_0 = arith.constant 0 : i32
    %c0_i32_1 = arith.constant 0 : i32
    return %c0_i32, %c0_i32_0 : i32, i32
  }
  func.func @transform_20(%arg0: i32) -> (i32, i32, i32) {
    %c0_i32 = arith.constant 0 : i32
    %c0_i32_0 = arith.constant 0 : i32
    %c0_i32_1 = arith.constant 0 : i32
    %c0_i32_2 = arith.constant 0 : i32
    return %c0_i32, %c0_i32_0, %c0_i32_1 : i32, i32, i32
  }
  func.func @transform_21(%arg0: i32) -> (i32, i32) {
    %c0_i32 = arith.constant 0 : i32
    %c0_i32_0 = arith.constant 0 : i32
    %c0_i32_1 = arith.constant 0 : i32
    return %c0_i32, %c0_i32_0 : i32, i32
  }
}

</mosaic_0001>

<bundles_post_ra>
// kernel: tpu_custom_call.1
= control target key start
LH: loop header
LB: loop body
LE: loop exit
PB: predicated region body
PF: predicated region fallthrough
CT: control target
= control target key end

     0   :  { %s5404_s0 = inlined_call_operand.hbm [shape: f32[16,16], index: 0, kind: input, shape index: {}]   ;;  %s5405_s1 = inlined_call_operand.hbm [shape: f32[16,96], index: 1, kind: input, shape index: {}]   ;;  %s5406_s2 = inlined_call_operand.hbm [shape: f32[16,96], index: 2, kind: input, shape index: {}]   ;;  %s5407_s3 = inlined_call_operand.hbm [shape: f32[1,96], index: 3, kind: input, shape index: {}]   ;;  %s5408_s4 = inlined_call_operand.hbm [shape: f32[4,16], index: 4, kind: input, shape index: {}]   ;;  %s5409_s5 = inlined_call_operand.vmem [shape: f32[32,96], index: 5, kind: input, shape index: {}]   ;;  %s5410_s6 = inlined_call_operand.hbm [shape: f32[16,96], index: 6, kind: input, shape index: {}]   ;;  %s5411_s7 = inlined_call_operand.hbm [shape: f32[1,96], index: 7, kind: input, shape index: {}]   ;;  %s5412_s8 = inlined_call_operand.hbm [shape: f32[4,16], index: 8, kind: input, shape index: {}]   ;;  %s5413_s9 = inlined_call_operand.vmem [shape: f32[2,8], index: 9, kind: input, shape index: {}]   ;;  %s5414_s10 = inlined_call_operand.vmem [shape: s32[16,1], index: 10, kind: input, shape index: {}]   ;;  %s5415_s11 = inlined_call_operand.vmem [shape: f32[16,1], index: 11, kind: input, shape index: {}]   ;;  %s5416_s12 = inlined_call_operand.vmem [shape: f32[32,32], index: 12, kind: input, shape index: {}]   ;;  %s5417_s13 = inlined_call_operand.vmem [shape: f32[1,32], index: 13, kind: input, shape index: {}]   ;;  %s5418_s14 = inlined_call_operand.vmem [shape: f32[32,32], index: 14, kind: input, shape index: {}]   ;;  %s5419_s15 = inlined_call_operand.vmem [shape: f32[1,32], index: 15, kind: input, shape index: {}]   ;;  %s5420_s16 = inlined_call_operand.vmem [shape: f32[32,7], index: 16, kind: input, shape index: {}]   ;;  %s5421_s17 = inlined_call_operand.vmem [shape: f32[1,7], index: 17, kind: input, shape index: {}]   ;;  %s5422_s18 = inlined_call_operand.hbm [shape: f32[16,32], index: 18, kind: output, shape index: {0}]   ;;  %s5423_s19 = inlined_call_operand.vmem [shape: f32[16,7], index: 19, kind: output, shape index: {1}]   ;;  %s5424_s20 = inlined_call_operand.hbm [shape: f32[8,2,8], index: 20, kind: output, shape index: {2}]   ;;  %s5425_s21 = inlined_call_operand.hbm [shape: f32[1,1], index: 21, kind: output, shape index: {3}]  }
   0x1   :  { %5438 = sst [smem:[#allocation27_spill]] %s5404_s0 }
   0x2   :  { %5439 = sst [smem:[#allocation28_spill]] %s5405_s1 }
   0x3   :  { %5440 = sst [smem:[#allocation29_spill]] %s5406_s2 }
   0x4   :  { %5441 = sst [smem:[#allocation30_spill]] %s5407_s3 }
   0x5   :  { %5442 = sst [smem:[#allocation31_spill]] %s5408_s4 }
   0x6   :  { %5443 = sst [smem:[#allocation32_spill]] %s5409_s5 }
   0x7   :  { %5444 = sst [smem:[#allocation33_spill]] %s5422_s18 }
   0x8   :  { %5445 = sst [smem:[#allocation34_spill]] %s5425_s21 }
   0x9   :  { %27 = vsyncpa [#allocation3], 0 }
   0xa   :  { %28 = vsyncpa [#allocation6], 0 }
   0xb   :  { %29 = vsyncpa [#allocation9], 0 }
   0xc   :  { %30 = vsyncpa [#allocation12], 0 }
   0xd   :  { %31 = vsyncpa [#allocation15], 0 }
   0xe   :  { %32 = vsyncpa [#allocation4], 0 }
   0xf   :  { %33 = vsyncpa [#allocation18], 0  ;;  %s4424_s2 = smov [#allocation5]   ;;  %s4425_s26 = smov [#allocation8]  }
  0x10   :  { %s51_s25 = sshll.u32 %s4424_s2, 4  ;;  %s76_s27 = sshll.u32 %s4425_s26, 4  ;;  %s52_s25 = int_to_ptr.vmem [resolvable:$true] %s51_s25  ;;  %s4558_s27 = int_to_ptr.vmem [resolvable:$true] %s76_s27 }
  0x11   :  { %s5446_s29 = sld [smem:[#allocation28_spill]] }
  0x17   :  { %s4168_s0 = scalar_lea.hbm %s5446_s29, 256 }
  0x18   :  { %p4169_p0 = scmp.ne.s32.totalorder %s5446_s29, %s4168_s0  ;;  %p4172_p1 = scmp.lt.u32.totalorder %s4168_s0, %s5446_s29 }
  0x1a   :  { %p4174_p2 = pnand %p4172_p1, %p4169_p0 }
  0x1c   :  { %4177 = shalt.err (!%p4174_p2)
}
  0x1d   :  { %s4178_s23 = scalar_lea.vmem %s52_s25, 256  ;;  %p4183_p4 = scmp.lt.s32.totalorder %s52_s25, %s52_s25 }
  0x1e   :  { %p4179_p3 = scmp.ne.s32.totalorder %s52_s25, %s4178_s23  ;;  %p4184_p5 = scmp.lt.s32.totalorder %s4178_s23, %s4178_s23 }
  0x20   :  { %p4185_p6 = por %p4184_p5, %p4183_p4 }
  0x22   :  { %p4186_p7 = pnand %p4185_p6, %p4179_p3 }
  0x24   :  { %4189 = shalt.err (!%p4186_p7)
}
  0x25   :  { %s5432_s1 = smov 128   ;;  %s5434_s24 = smov 8  }
  0x26   :  { %57 = dma.hbm_to_vmem [thread:$0]  %s5446_s29, 256, %s52_s25, [#allocation6], %s5432_s1, %s5432_s1, %s5434_s24  }
  0x27   :  { %s5447_s0 = sld [smem:[#allocation30_spill]] }
  0x2d   :  { %s4190_s4 = scalar_lea.hbm %s5447_s0, 16 }
  0x2e   :  { %p4191_p8 = scmp.ne.s32.totalorder %s5447_s0, %s4190_s4  ;;  %p4194_p9 = scmp.lt.u32.totalorder %s4190_s4, %s5447_s0 }
  0x30   :  { %p4196_p10 = pnand %p4194_p9, %p4191_p8 }
  0x32   :  { %4199 = shalt.err (!%p4196_p10)
}
  0x33   :  { %s4200_s2 = scalar_lea.vmem %s4558_s27, 16  ;;  %s4204_s25 = scalar_lea.vmem %s4558_s27, 32 }
  0x34   :  { %p4201_p11 = scmp.ne.s32.totalorder %s4558_s27, %s4200_s2  ;;  %p4205_p12 = scmp.lt.s32.totalorder %s4558_s27, %s4558_s27 }
  0x35   :  { %p4206_p13 = scmp.lt.s32.totalorder %s4204_s25, %s4200_s2 }
  0x37   :  { %p4207_p0 = por %p4206_p13, %p4205_p12 }
  0x39   :  { %p4208_p1 = pnand %p4207_p0, %p4201_p11 }
  0x3b   :  { %4211 = shalt.err (!%p4208_p1)
}
  0x3c   :  { %79 = dma.hbm_to_vmem [thread:$0]  %s5447_s0, 16, %s4558_s27, [#allocation9]  }
  0x3d   :  { %s4428_s3 = smov [#allocation11]   ;;  %s4429_s4 = smov [#allocation2]  }
  0x3e   :  { %s97_s28 = sshll.u32 %s4428_s3, 4  ;;  %s39_s30 = sshll.u32 %s4429_s4, 4  ;;  %s98_s28 = int_to_ptr.vmem [resolvable:$true] %s97_s28  ;;  %s4593_s30 = int_to_ptr.vmem [resolvable:$true] %s39_s30 }
  0x3f   :  { %s4212_s23 = scalar_lea.hbm %s5410_s6, 256 }
  0x40   :  { %p4213_p2 = scmp.ne.s32.totalorder %s5410_s6, %s4212_s23  ;;  %p4216_p3 = scmp.lt.u32.totalorder %s4212_s23, %s5410_s6 }
  0x42   :  { %p4218_p4 = pnand %p4216_p3, %p4213_p2 }
  0x44   :  { %4221 = shalt.err (!%p4218_p4)
}
  0x45   :  { %s4222_s27 = scalar_lea.vmem %s98_s28, 256  ;;  %p4227_p6 = scmp.lt.s32.totalorder %s98_s28, %s98_s28 }
  0x46   :  { %p4223_p5 = scmp.ne.s32.totalorder %s98_s28, %s4222_s27  ;;  %p4228_p7 = scmp.lt.s32.totalorder %s4222_s27, %s4222_s27 }
  0x48   :  { %p4229_p8 = por %p4228_p7, %p4227_p6 }
  0x4a   :  { %p4230_p9 = pnand %p4229_p8, %p4223_p5 }
  0x4c   :  { %4233 = shalt.err (!%p4230_p9)
}
  0x4d   :  { %s5448_s0 = smov 8   ;;  %s5449_s29 = smov 128  }
  0x4e   :  { %103 = dma.hbm_to_vmem [thread:$0]  %s5410_s6, 256, %s98_s28, [#allocation12], %s5449_s29, %s5449_s29, %s5448_s0  }
  0x4f   :  { %s5450_s1 = sld [smem:[#allocation27_spill]] }
  0x55   :  { %s4234_s24 = scalar_lea.hbm %s5450_s1, 256 }
  0x56   :  { %p4235_p10 = scmp.ne.s32.totalorder %s5450_s1, %s4234_s24  ;;  %p4238_p11 = scmp.lt.u32.totalorder %s4234_s24, %s5450_s1 }
  0x58   :  { %p4240_p12 = pnand %p4238_p11, %p4235_p10 }
  0x5a   :  { %4243 = shalt.err (!%p4240_p12)
}
  0x5b   :  { %s4244_s27 = scalar_lea.vmem %s4593_s30, 256  ;;  %p4249_p0 = scmp.lt.s32.totalorder %s4593_s30, %s4593_s30 }
  0x5c   :  { %p4245_p13 = scmp.ne.s32.totalorder %s4593_s30, %s4244_s27  ;;  %p4250_p1 = scmp.lt.s32.totalorder %s4244_s27, %s4244_s27 }
  0x5e   :  { %p4251_p2 = por %p4250_p1, %p4249_p0 }
  0x60   :  { %p4252_p3 = pnand %p4251_p2, %p4245_p13 }
  0x62   :  { %4255 = shalt.err (!%p4252_p3)
}
  0x63   :  { %45 = dma.hbm_to_vmem [thread:$0]  %s5450_s1, 256, %s4593_s30, [#allocation3], %s5449_s29, %s5449_s29, %s5448_s0  }
  0x64   :  { %s4430_s26 = smov [#allocation7]   ;;  %s4431_s4 = smov [#allocation10]  }
  0x65   :  { %s63_s3 = sshll.u32 %s4430_s26, 4  ;;  %s86_s5 = sshll.u32 %s4431_s4, 4  ;;  %s64_s3 = int_to_ptr.vmem [resolvable:$true] %s63_s3  ;;  %s87_s5 = int_to_ptr.vmem [resolvable:$true] %s86_s5 }
  0x66   :  { %s5451_s23 = sld [smem:[#allocation29_spill]] }
  0x6c   :  { %s4256_s2 = scalar_lea.hbm %s5451_s23, 256 }
  0x6d   :  { %p4257_p4 = scmp.ne.s32.totalorder %s5451_s23, %s4256_s2  ;;  %p4260_p5 = scmp.lt.u32.totalorder %s4256_s2, %s5451_s23 }
  0x6f   :  { %p4262_p6 = pnand %p4260_p5, %p4257_p4 }
  0x71   :  { %4265 = shalt.err (!%p4262_p6)
}
  0x72   :  { %s4266_s30 = scalar_lea.vmem %s64_s3, 256  ;;  %p4271_p8 = scmp.lt.s32.totalorder %s64_s3, %s64_s3 }
  0x73   :  { %p4267_p7 = scmp.ne.s32.totalorder %s64_s3, %s4266_s30  ;;  %p4272_p9 = scmp.lt.s32.totalorder %s4266_s30, %s4266_s30 }
  0x75   :  { %p4273_p10 = por %p4272_p9, %p4271_p8 }
  0x77   :  { %p4274_p11 = pnand %p4273_p10, %p4267_p7 }
  0x79   :  { %4277 = shalt.err (!%p4274_p11)
}
  0x7a   :  { %69 = dma.hbm_to_vmem [thread:$0]  %s5451_s23, 256, %s64_s3, [#allocation6], %s5449_s29, %s5449_s29, %s5448_s0  }
  0x7b   :  { %s5452_s18 = sld [smem:[#allocation31_spill]] }
  0x81   :  { %s4278_s21 = scalar_lea.hbm %s5452_s18, 64 }
  0x82   :  { %p4279_p12 = scmp.ne.s32.totalorder %s5452_s18, %s4278_s21  ;;  %p4282_p13 = scmp.lt.u32.totalorder %s4278_s21, %s5452_s18 }
  0x84   :  { %p4284_p0 = pnand %p4282_p13, %p4279_p12 }
  0x86   :  { %4287 = shalt.err (!%p4284_p0)
}
  0x87   :  { %s4288_s25 = scalar_lea.vmem %s87_s5, 64  ;;  %p4293_p2 = scmp.lt.s32.totalorder %s87_s5, %s87_s5 }
  0x88   :  { %p4289_p1 = scmp.ne.s32.totalorder %s87_s5, %s4288_s25  ;;  %p4294_p3 = scmp.lt.s32.totalorder %s4288_s25, %s4288_s25 }
  0x8a   :  { %p4295_p4 = por %p4294_p3, %p4293_p2 }
  0x8c   :  { %p4296_p5 = pnand %p4295_p4, %p4289_p1 }
  0x8e   :  { %4299 = shalt.err (!%p4296_p5)
}
  0x8f   :  { %89 = dma.hbm_to_vmem [thread:$0]  %s5452_s18, 64, %s87_s5, [#allocation9]  }
  0x90   :  { %s4432_s27 = smov [#allocation13]   ;;  %s4433_s1 = smov [#allocation14]  }
  0x91   :  { %s110_s30 = sshll.u32 %s4432_s27, 4  ;;  %s120_s6 = sshll.u32 %s4433_s1, 4  ;;  %s111_s30 = int_to_ptr.vmem [resolvable:$true] %s110_s30  ;;  %s121_s6 = int_to_ptr.vmem [resolvable:$true] %s120_s6 }
  0x92   :  { %s4300_s21 = scalar_lea.hbm %s5411_s7, 16 }
  0x93   :  { %p4301_p6 = scmp.ne.s32.totalorder %s5411_s7, %s4300_s21  ;;  %p4304_p7 = scmp.lt.u32.totalorder %s4300_s21, %s5411_s7 }
  0x95   :  { %p4306_p8 = pnand %p4304_p7, %p4301_p6 }
  0x97   :  { %4309 = shalt.err (!%p4306_p8)
}
  0x98   :  { %s4310_s5 = scalar_lea.vmem %s111_s30, 16  ;;  %s4314_s18 = scalar_lea.vmem %s111_s30, 32 }
  0x99   :  { %p4311_p9 = scmp.ne.s32.totalorder %s111_s30, %s4310_s5  ;;  %p4315_p10 = scmp.lt.s32.totalorder %s111_s30, %s111_s30 }
  0x9a   :  { %p4316_p11 = scmp.lt.s32.totalorder %s4314_s18, %s4310_s5 }
  0x9c   :  { %p4317_p12 = por %p4316_p11, %p4315_p10 }
  0x9e   :  { %p4318_p13 = pnand %p4317_p12, %p4311_p9 }
  0xa0   :  { %4321 = shalt.err (!%p4318_p13)
}
  0xa1   :  { %113 = dma.hbm_to_vmem [thread:$0]  %s5411_s7, 16, %s111_s30, [#allocation12]  }
  0xa2   :  { %s4322_s1 = scalar_lea.hbm %s5412_s8, 64 }
  0xa3   :  { %p4323_p0 = scmp.ne.s32.totalorder %s5412_s8, %s4322_s1  ;;  %p4326_p1 = scmp.lt.u32.totalorder %s4322_s1, %s5412_s8 }
  0xa5   :  { %p4328_p2 = pnand %p4326_p1, %p4323_p0 }
  0xa7   :  { %4331 = shalt.err (!%p4328_p2)
}
  0xa8   :  { %s4332_s24 = scalar_lea.vmem %s121_s6, 64  ;;  %p4337_p4 = scmp.lt.s32.totalorder %s121_s6, %s121_s6 }
  0xa9   :  { %p4333_p3 = scmp.ne.s32.totalorder %s121_s6, %s4332_s24  ;;  %p4338_p5 = scmp.lt.s32.totalorder %s4332_s24, %s4332_s24 }
  0xab   :  { %p4339_p6 = por %p4338_p5, %p4337_p4 }
  0xad   :  { %p4340_p7 = pnand %p4339_p6, %p4333_p3 }
  0xaf   :  { %4343 = shalt.err (!%p4340_p7)
}
  0xb0   :  { %123 = dma.hbm_to_vmem [thread:$0]  %s5412_s8, 64, %s121_s6, [#allocation15]  }
  0xb1   :  { %4410 = dma.done.wait [#allocation3], 256  }
  0xb2   :  { %4411 = vsyncadd [#allocation3], 4294967040 }
  0xb3   :  { %4412 = dma.done.wait [#allocation6], 512  }
  0xb4   :  { %4413 = vsyncadd [#allocation6], 4294966784 }
  0xb5   :  { %4414 = dma.done.wait [#allocation9], 80  }
  0xb6   :  { %4415 = vsyncadd [#allocation9], 4294967216 }
  0xb7   :  { %4416 = dma.done.wait [#allocation12], 272  }
  0xb8   :  { %4417 = vsyncadd [#allocation12], 4294967024 }
  0xb9   :  { %4418 = dma.done.wait [#allocation15], 64  }
  0xba   :  { %4419 = vsyncadd [#allocation15], 4294967232  ;;  %v4434_v0 = vmov 0.0|0.0   ;;  %vm4435_vm0 = vmmov 0   ;;  %v4436_v1 = vmov 0.0   ;;  %vm177_vm1 = vcmask 130048  }
  0xbb   :  { %3940 = vmatprep.subr.bf16.mxu1 %v4434_v0  ;;  %3764 = vmatprep.mubr.msk.f32.mxu1 %vm4435_vm0, %v4436_v1  ;;  %v168_v2 = vld [vmem:[#allocation5] sm:$0xff]  ;;  %v169_v3 = vld [vmem:[#allocation5 + $0x8] sm:$0xff]  ;;  %v259_v4 = vld [vmem:[#allocation7] sm:$0xff]  ;;  %s4437_s8 = smov 80   ;;  %s4438_s6 = smov 32   ;;  %vm267_vm2 = vcmask 1041408  }
  0xbc   :  { %v3936_v5 = vpack.c.bf16 %v169_v3, %v168_v2  ;;  %v260_v6 = vld [vmem:[#allocation7 + $0x8] sm:$0xff]  ;;  %v166_v7 = vld [vmem:[#allocation2] sm:$0xff]  ;;  %v3617_v10 = vld [vmem:[#allocation8] ss:$0 sm:$0xff]  ;;  %s4439_s22 = smov 96   ;;  %s4440_s2 = smov 112  }
  0xbd   :  { %v4684_v8 = vpack.c.bf16 %v260_v6, %v259_v4  ;;  %3757 = vmatprep.mubr.msk.f32.mxu0 %vm177_vm1, %v166_v7  ;;  %v167_v9 = vld [vmem:[#allocation2 + $0x8] sm:$0xff]  ;;  %v261_v16 = vld [vmem:[#allocation10] sm:$0xf]  ;;  %vm1181_vm3 = vcmask 1043456   ;;  %vm1183_vm4 = vcmask 1045504   ;;  %s5453_s25 = sld [smem:[#allocation32_spill]] }
  0xbe   :  { %3937 = vmatprep.subr.bf16.mxu0 %v3936_v5  ;;  %vm1219_vm5 = vcmask 261120   ;;  %vm2220_vm6 = vcmask 1040384   ;;  %vm2223_vm7 = vcmask 1042432   ;;  %vm2226_vm8 = vcmask 1044480   ;;  %s4445_s21 = smov [#allocation16]  }
  0xbf   :  { %3942 = vmatpush3.bf16.msra.mxu1 %v4684_v8  ;;  %3939 = vmatpush3.bf16.msra.mxu0 %v3936_v5  ;;  %vm2229_vm9 = vcmask 1046528   ;;  %vm2776_vm10 = vcmask 64512   ;;  %vm2943_vm11 = vcmask 58368   ;;  %vm3478_vm12 = vcmask 56320   ;;  %s3568_s4 = sshll.u32 %s4445_s21, 4  ;;  %s3569_s4 = int_to_ptr.vmem [resolvable:$true] %s3568_s4 }
  0xc0   :  { %3943 = vmatprep.subr.bf16.mxu0 %v4434_v0  ;;  %3946 = vmatprep.subr.bf16.mxu1 %v4434_v0  ;;  %vm3531_vm15 = vcmask 7168  }
  0xc2   :  { %3765 = vmatmul.mubr.f32.vlgmr.msra.gmra.mrb[0].mxu1 %v4436_v1  ;;  %3758 = vmatmul.mubr.msk.f32.vlgmr.msra.gmra.mrb[0].mxu0 %vm177_vm1, %v167_v9 }
  0xc3   :  { %3945 = vmatpush3.bf16.msra.mxu0 %v4684_v8  ;;  %3771 = vmatprep.mubr.msk.f32.mxu0 %vm4435_vm0, %v4436_v1 }
  0xc4   :  { %3948 = vmatpush3.bf16.msra.mxu1 %v4684_v8  ;;  %3778 = vmatprep.mubr.msk.f32.mxu1 %vm4435_vm0, %v4436_v1 }
  0xc5   :  { %3949 = vmatprep.subr.bf16.mxu0 %v4434_v0  ;;  %3952 = vmatprep.subr.bf16.mxu1 %v4434_v0 }
 0x195   :  { %v338_v11 = vpop.f32.mrb[0].mxu1  ;;  %v3759_v12 = vpop.f32.mrb[0].mxu0 }
 0x196   :  { %343 = vrot.lane.b32.xlu0 %v338_v11, %s4437_s8  ;;  %v4701_v13 = vadd.f32 %v3759_v12, %v3617_v10  ;;  %v3766_v14 = vpop.f32.mrb[1].mxu1  ;;  %v250_v15 = vpop.f32.mrb[1].mxu0 }
 0x197   :  { %v4703_v17 = vadd.f32 %v3617_v10, %v250_v15 }
 0x198   :  { %v263_v18 = vrot.slane %v4701_v13, 4  ;;  %v381_v40 = vrot.slane %v4701_v13, 2 }
 0x199   :  { %v379_v48 = vrot.slane %v4703_v17, 2 }
 0x19a   :  { %355 = vrot.lane.b32.xlu0 %v261_v16, %s4438_s6  ;;  %264 = vrot.lane.b32.xlu1 %v263_v18, %s4437_s8 }
 0x208   :  { %v344_v19 = vpop.permute.xlu0 %343 }
 0x209   :  { %v346_v20 = vsel %vm267_vm2, %v338_v11, %v344_v19  ;;  %v493_v11 = vrot.slane %v4703_v17, 4 }
 0x20c   :  { %v4711_v21 = vpop.permute.xlu0 %355  ;;  %v265_v23 = vpop.permute.xlu1 %264 }
 0x20d   :  { %v358_v22 = vadd.f32 %v4711_v21, %v346_v20  ;;  %v268_v24 = vsel %vm267_vm2, %v4703_v17, %v265_v23 }
 0x20e   :  { %v347_v25 = vadd.f32 %v346_v20, %v268_v24 }
 0x20f   :  { %360 = vrot.lane.b32.xlu1 %v358_v22, %s4439_s22 }
 0x210   :  { %v3620_v26 = vmul.f32 -1.442695, %v347_v25 }
 0x212   :  { %4050 = vpow2.f32 %v3620_v26 }
 0x21c   :  { %v4051_v27 = vpop.eup %4050 }
 0x21d   :  { %v351_v28 = vadd.f32 1.0, %v4051_v27 }
 0x21f   :  { %4052 = vrcp.f32 %v351_v28 }
 0x229   :  { %v4053_v29 = vpop.eup %4052 }
 0x22a   :  { %v370_v35 = vsub.f32 1.0, %v4053_v29  ;;  %v376_v37 = vmul.f32 0.0, %v4053_v29 }
 0x281   :  { %v361_v30 = vpop.permute.xlu1 %360 }
 0x282   :  { %v363_v31 = vmul.f32 %v4053_v29, %v361_v30 }
 0x284   :  { %365 = vrot.lane.b32.xlu0 %v363_v31, %s4438_s6 }
 0x2f6   :  { %v366_v32 = vpop.permute.xlu0 %365 }
 0x2f7   :  { %v368_v33 = vadd.f32 %v366_v32, %v268_v24  ;;  %v608_v32 = vrot.slane %v4701_v13, 6 }
 0x2f9   :  { %4054 = vtanh.f32 %v368_v33 }
 0x303   :  { %v4055_v34 = vpop.eup %4054 }
 0x304   :  { %372 = vrot.lane.b32.xlu1 %v4055_v34, %s4440_s2 }
 0x376   :  { %v373_v36 = vpop.permute.xlu1 %372 }
 0x377   :  { %v375_v38 = vmul.f32 %v373_v36, %v370_v35 }
 0x379   :  { %v4719_v39 = vadd.f32 %v376_v37, %v375_v38 }
 0x37b   :  { %387 = vrot.lane.b32.xlu0 %v4719_v39, %s4440_s2 }
 0x37f   :  { %382 = vrot.lane.b32.xlu0 %v381_v40, %s4437_s8 }
 0x3ed   :  { %v388_v41 = vpop.permute.xlu0 %387 }
 0x3ee   :  { %3772 = vmatmul.mubr.msk.f32.vlgmr.msra.gmra.mrb[2].mxu0 %vm177_vm1, %v388_v41 }
 0x3ef   :  { %3951 = vmatpush3.bf16.msra.mxu0 %v4684_v8  ;;  %3785 = vmatprep.mubr.msk.f32.mxu0 %vm4435_vm0, %v4436_v1 }
 0x3f0   :  { %3955 = vmatprep.subr.bf16.mxu0 %v4434_v0 }
 0x3f1   :  { %v383_v47 = vpop.permute.xlu0 %382 }
 0x3f2   :  { %v385_v49 = vsel %vm267_vm2, %v379_v48, %v383_v47 }
 0x4c1   :  { %v457_v42 = vpop.f32.mrb[2].mxu0 }
 0x4c2   :  { %462 = vrot.lane.b32.xlu1 %v457_v42, %s4437_s8  ;;  %v3773_v43 = vpop.f32.mrb[3].mxu0 }
 0x534   :  { %v463_v44 = vpop.permute.xlu1 %462 }
 0x535   :  { %v465_v45 = vsel %vm267_vm2, %v457_v42, %v463_v44  ;;  %v606_v42 = vrot.slane %v4703_v17, 6 }
 0x536   :  { %v473_v46 = vadd.f32 %v465_v45, %v4711_v21  ;;  %v466_v50 = vadd.f32 %v465_v45, %v385_v49 }
 0x538   :  { %475 = vrot.lane.b32.xlu1 %v473_v46, %s4439_s22  ;;  %v3622_v51 = vmul.f32 -1.442695, %v466_v50 }
 0x53a   :  { %4056 = vpow2.f32 %v3622_v51 }
 0x544   :  { %v4057_v52 = vpop.eup %4056 }
 0x545   :  { %v470_v53 = vadd.f32 1.0, %v4057_v52 }
 0x547   :  { %4058 = vrcp.f32 %v470_v53 }
 0x551   :  { %v4059_v54 = vpop.eup %4058 }
 0x552   :  { %v485_v60 = vsub.f32 1.0, %v4059_v54  ;;  %v491_v62 = vmul.f32 %v4059_v54, %v4719_v39 }
 0x5aa   :  { %v476_v55 = vpop.permute.xlu1 %475 }
 0x5ab   :  { %v478_v56 = vmul.f32 %v4059_v54, %v476_v55 }
 0x5ad   :  { %480 = vrot.lane.b32.xlu0 %v478_v56, %s4438_s6 }
 0x61f   :  { %v481_v57 = vpop.permute.xlu0 %480 }
 0x620   :  { %v483_v58 = vadd.f32 %v481_v57, %v385_v49 }
 0x622   :  { %4060 = vtanh.f32 %v483_v58 }
 0x62c   :  { %v4061_v59 = vpop.eup %4060 }
 0x62d   :  { %487 = vrot.lane.b32.xlu1 %v4061_v59, %s4440_s2 }
 0x69f   :  { %v488_v61 = vpop.permute.xlu1 %487 }
 0x6a0   :  { %v490_v63 = vmul.f32 %v488_v61, %v485_v60 }
 0x6a2   :  { %v4743_v2 = vadd.f32 %v491_v62, %v490_v63 }
 0x6a4   :  { %500 = vrot.lane.b32.xlu0 %v4743_v2, %s4440_s2 }
 0x6a8   :  { %495 = vrot.lane.b32.xlu0 %v4701_v13, %s4437_s8 }
 0x716   :  { %v501_v3 = vpop.permute.xlu0 %500 }
 0x717   :  { %3779 = vmatmul.mubr.msk.f32.vlgmr.msra.gmra.mrb[2].mxu1 %vm177_vm1, %v501_v3 }
 0x718   :  { %3954 = vmatpush3.bf16.msra.mxu1 %v4684_v8  ;;  %3792 = vmatprep.mubr.msk.f32.mxu1 %vm4435_vm0, %v4436_v1 }
 0x719   :  { %3958 = vmatprep.subr.bf16.mxu1 %v4434_v0 }
 0x71a   :  { %v496_v10 = vpop.permute.xlu0 %495 }
 0x71b   :  { %v498_v12 = vsel %vm267_vm2, %v493_v11, %v496_v10 }
 0x7ea   :  { %v570_v4 = vpop.f32.mrb[2].mxu1 }
 0x7eb   :  { %575 = vrot.lane.b32.xlu1 %v570_v4, %s4437_s8  ;;  %v3780_v5 = vpop.f32.mrb[3].mxu1 }
 0x85d   :  { %v576_v6 = vpop.permute.xlu1 %575 }
 0x85e   :  { %v578_v7 = vsel %vm267_vm2, %v570_v4, %v576_v6 }
 0x85f   :  { %v586_v9 = vadd.f32 %v578_v7, %v4711_v21  ;;  %v579_v14 = vadd.f32 %v578_v7, %v498_v12 }
 0x861   :  { %588 = vrot.lane.b32.xlu1 %v586_v9, %s4439_s22  ;;  %v3624_v15 = vmul.f32 -1.442695, %v579_v14 }
 0x863   :  { %4062 = vpow2.f32 %v3624_v15 }
 0x86d   :  { %v4063_v16 = vpop.eup %4062 }
 0x86e   :  { %v583_v19 = vadd.f32 1.0, %v4063_v16 }
 0x870   :  { %4064 = vrcp.f32 %v583_v19 }
 0x87a   :  { %v4065_v20 = vpop.eup %4064 }
 0x87b   :  { %v598_v27 = vsub.f32 1.0, %v4065_v20  ;;  %v604_v29 = vmul.f32 %v4065_v20, %v4743_v2 }
 0x8d3   :  { %v589_v22 = vpop.permute.xlu1 %588 }
 0x8d4   :  { %v591_v23 = vmul.f32 %v4065_v20, %v589_v22 }
 0x8d6   :  { %593 = vrot.lane.b32.xlu0 %v591_v23, %s4438_s6 }
 0x948   :  { %v594_v24 = vpop.permute.xlu0 %593 }
 0x949   :  { %v596_v25 = vadd.f32 %v594_v24, %v498_v12 }
 0x94b   :  { %4066 = vtanh.f32 %v596_v25 }
 0x955   :  { %v4067_v26 = vpop.eup %4066 }
 0x956   :  { %600 = vrot.lane.b32.xlu1 %v4067_v26, %s4440_s2 }
 0x9c8   :  { %v601_v28 = vpop.permute.xlu1 %600 }
 0x9c9   :  { %v603_v30 = vmul.f32 %v601_v28, %v598_v27 }
 0x9cb   :  { %v4763_v31 = vadd.f32 %v604_v29, %v603_v30 }
 0x9cd   :  { %614 = vrot.lane.b32.xlu0 %v4763_v31, %s4440_s2 }
 0x9d1   :  { %609 = vrot.lane.b32.xlu0 %v608_v32, %s4437_s8 }
 0xa3f   :  { %v615_v33 = vpop.permute.xlu0 %614 }
 0xa40   :  { %3786 = vmatmul.mubr.msk.f32.vlgmr.msra.gmra.mrb[4].mxu0 %vm177_vm1, %v615_v33 }
 0xa41   :  { %3957 = vmatpush3.bf16.msra.mxu0 %v4684_v8  ;;  %3799 = vmatprep.mubr.msk.f32.mxu0 %vm4435_vm0, %v4436_v1 }
 0xa42   :  { %3961 = vmatprep.subr.bf16.mxu0 %v4434_v0 }
 0xa43   :  { %v610_v41 = vpop.permute.xlu0 %609 }
 0xa44   :  { %v612_v43 = vsel %vm267_vm2, %v606_v42, %v610_v41 }
 0xb13   :  { %v684_v34 = vpop.f32.mrb[4].mxu0 }
 0xb14   :  { %689 = vrot.lane.b32.xlu1 %v684_v34, %s4437_s8  ;;  %v3787_v35 = vpop.f32.mrb[5].mxu0 }
 0xb86   :  { %v690_v36 = vpop.permute.xlu1 %689 }
 0xb87   :  { %v692_v37 = vsel %vm267_vm2, %v684_v34, %v690_v36 }
 0xb88   :  { %v700_v38 = vadd.f32 %v692_v37, %v4711_v21  ;;  %v693_v44 = vadd.f32 %v692_v37, %v612_v43 }
 0xb8a   :  { %702 = vrot.lane.b32.xlu1 %v700_v38, %s4439_s22  ;;  %v3626_v45 = vmul.f32 -1.442695, %v693_v44 }
 0xb8c   :  { %4068 = vpow2.f32 %v3626_v45 }
 0xb96   :  { %v4069_v46 = vpop.eup %4068 }
 0xb97   :  { %v697_v47 = vadd.f32 1.0, %v4069_v46 }
 0xb99   :  { %4070 = vrcp.f32 %v697_v47 }
 0xba3   :  { %v4071_v49 = vpop.eup %4070 }
 0xba4   :  { %v712_v55 = vsub.f32 1.0, %v4071_v49  ;;  %v718_v57 = vmul.f32 %v4071_v49, %v4763_v31 }
 0xbfc   :  { %v703_v50 = vpop.permute.xlu1 %702 }
 0xbfd   :  { %v705_v51 = vmul.f32 %v4071_v49, %v703_v50 }
 0xbff   :  { %707 = vrot.lane.b32.xlu0 %v705_v51, %s4438_s6 }
 0xc71   :  { %v708_v52 = vpop.permute.xlu0 %707 }
 0xc72   :  { %v710_v53 = vadd.f32 %v708_v52, %v612_v43 }
 0xc74   :  { %4072 = vtanh.f32 %v710_v53 }
 0xc7e   :  { %v4073_v54 = vpop.eup %4072 }
 0xc7f   :  { %714 = vrot.lane.b32.xlu1 %v4073_v54, %s4440_s2 }
 0xcf1   :  { %v715_v56 = vpop.permute.xlu1 %714 }
 0xcf2   :  { %v717_v58 = vmul.f32 %v715_v56, %v712_v55 }
 0xcf4   :  { %v4787_v59 = vadd.f32 %v718_v57, %v717_v58 }
 0xcf6   :  { %725 = vrot.lane.b32.xlu0 %v4787_v59, %s4440_s2 }
 0xcfa   :  { %720 = vrot.lane.b32.xlu0 %v493_v11, %s4437_s8 }
 0xd68   :  { %v726_v60 = vpop.permute.xlu0 %725 }
 0xd69   :  { %3793 = vmatmul.mubr.msk.f32.vlgmr.msra.gmra.mrb[4].mxu1 %vm177_vm1, %v726_v60 }
 0xd6a   :  { %3960 = vmatpush3.bf16.msra.mxu1 %v4684_v8  ;;  %3806 = vmatprep.mubr.msk.f32.mxu1 %vm4435_vm0, %v4436_v1 }
 0xd6c   :  { %v721_v5 = vpop.permute.xlu0 %720 }
 0xd6d   :  { %v723_v6 = vsel %vm267_vm2, %v4701_v13, %v721_v5  ;;  %v1301_v13 = vld [vmem:[#allocation11] sm:$0xff] }
 0xe3c   :  { %v795_v61 = vpop.f32.mrb[4].mxu1 }
 0xe3d   :  { %800 = vrot.lane.b32.xlu1 %v795_v61, %s4437_s8  ;;  %v3794_v62 = vpop.f32.mrb[5].mxu1 }
 0xeaf   :  { %v801_v63 = vpop.permute.xlu1 %800 }
 0xeb0   :  { %v803_v3 = vsel %vm267_vm2, %v795_v61, %v801_v63 }
 0xeb1   :  { %v811_v4 = vadd.f32 %v803_v3, %v4711_v21  ;;  %v804_v7 = vadd.f32 %v803_v3, %v723_v6 }
 0xeb3   :  { %813 = vrot.lane.b32.xlu1 %v811_v4, %s4439_s22  ;;  %v3628_v9 = vmul.f32 -1.442695, %v804_v7 }
 0xeb5   :  { %4074 = vpow2.f32 %v3628_v9 }
 0xebf   :  { %v4075_v10 = vpop.eup %4074 }
 0xec0   :  { %v808_v11 = vadd.f32 1.0, %v4075_v10 }
 0xec2   :  { %4076 = vrcp.f32 %v808_v11 }
 0xecc   :  { %v4077_v12 = vpop.eup %4076 }
 0xecd   :  { %v823_v22 = vsub.f32 1.0, %v4077_v12  ;;  %v829_v24 = vmul.f32 %v4077_v12, %v4787_v59 }
 0xf25   :  { %v814_v14 = vpop.permute.xlu1 %813 }
 0xf26   :  { %v816_v15 = vmul.f32 %v4077_v12, %v814_v14 }
 0xf28   :  { %818 = vrot.lane.b32.xlu0 %v816_v15, %s4438_s6 }
 0xf9a   :  { %v819_v16 = vpop.permute.xlu0 %818 }
 0xf9b   :  { %v821_v19 = vadd.f32 %v819_v16, %v723_v6 }
 0xf9d   :  { %4078 = vtanh.f32 %v821_v19 }
 0xfa7   :  { %v4079_v20 = vpop.eup %4078 }
 0xfa8   :  { %825 = vrot.lane.b32.xlu1 %v4079_v20, %s4440_s2 }
0x101a   :  { %v826_v23 = vpop.permute.xlu1 %825 }
0x101b   :  { %v828_v25 = vmul.f32 %v826_v23, %v823_v22 }
0x101d   :  { %v4805_v26 = vadd.f32 %v829_v24, %v828_v25 }
0x101f   :  { %837 = vrot.lane.b32.xlu0 %v4805_v26, %s4440_s2 }
0x1023   :  { %832 = vrot.lane.b32.xlu0 %v379_v48, %s4437_s8 }
0x1091   :  { %v838_v27 = vpop.permute.xlu0 %837 }
0x1092   :  { %3800 = vmatmul.mubr.msk.f32.vlgmr.msra.gmra.mrb[6].mxu0 %vm177_vm1, %v838_v27 }
0x1093   :  { %3963 = vmatpush3.bf16.msra.mxu0 %v4684_v8  ;;  %3813 = vmatprep.mubr.msk.f32.mxu0 %vm4435_vm0, %v4436_v1 }
0x1094   :  { %3972 = vmatprep.subr.bf16.mxu0 %v4434_v0 }
0x1095   :  { %v833_v48 = vpop.permute.xlu0 %832 }
0x1096   :  { %v835_v8 = vsel %vm267_vm2, %v381_v40, %v833_v48 }
0x1165   :  { %v907_v28 = vpop.f32.mrb[6].mxu0 }
0x1166   :  { %912 = vrot.lane.b32.xlu1 %v907_v28, %s4437_s8  ;;  %v3801_v29 = vpop.f32.mrb[7].mxu0 }
0x11d8   :  { %v913_v30 = vpop.permute.xlu1 %912 }
0x11d9   :  { %v915_v33 = vsel %vm267_vm2, %v907_v28, %v913_v30 }
0x11da   :  { %v923_v34 = vadd.f32 %v915_v33, %v4711_v21  ;;  %v916_v35 = vadd.f32 %v915_v33, %v835_v8 }
0x11dc   :  { %925 = vrot.lane.b32.xlu1 %v923_v34, %s4439_s22  ;;  %v3630_v36 = vmul.f32 -1.442695, %v916_v35  ;;  %v1167_v34 = vrot.slane %v4743_v2, 6  ;;  %v1171_v35 = vrot.slane %v4787_v59, 2 }
0x11de   :  { %4080 = vpow2.f32 %v3630_v36  ;;  %v1180_v36 = vsel %vm267_vm2, %v4719_v39, %v1167_v34 }
0x11e8   :  { %v4081_v37 = vpop.eup %4080 }
0x11e9   :  { %v920_v38 = vadd.f32 1.0, %v4081_v37 }
0x11eb   :  { %4082 = vrcp.f32 %v920_v38 }
0x11f5   :  { %v4083_v41 = vpop.eup %4082 }
0x11f6   :  { %v935_v49 = vsub.f32 1.0, %v4083_v41  ;;  %v941_v40 = vmul.f32 %v4083_v41, %v4805_v26 }
0x124e   :  { %v926_v43 = vpop.permute.xlu1 %925 }
0x124f   :  { %v928_v44 = vmul.f32 %v4083_v41, %v926_v43 }
0x1251   :  { %930 = vrot.lane.b32.xlu0 %v928_v44, %s4438_s6  ;;  %v1208_v44 = vld [vmem:[%s5453_s25] sm:$0xff] }
0x12c3   :  { %v931_v45 = vpop.permute.xlu0 %930 }
0x12c4   :  { %v933_v46 = vadd.f32 %v931_v45, %v835_v8  ;;  %v1209_v45 = vld [vmem:[%s5453_s25 + $0x8] sm:$0xff] }
0x12c6   :  { %4084 = vtanh.f32 %v933_v46  ;;  %v1210_v46 = vld [vmem:[%s5453_s25 + $0x10] sm:$0xff] }
0x12d0   :  { %v4085_v47 = vpop.eup %4084 }
0x12d1   :  { %937 = vrot.lane.b32.xlu1 %v4085_v47, %s4440_s2  ;;  %v3964_v47 = vpack.c.bf16 %v1209_v45, %v1208_v44 }
0x12d3   :  { %3965 = vmatprep.subr.bf16.mxu1 %v3964_v47 }
0x1343   :  { %v938_v50 = vpop.permute.xlu1 %937 }
0x1344   :  { %v940_v51 = vmul.f32 %v938_v50, %v935_v49  ;;  %v1211_v49 = vld [vmem:[%s5453_s25 + $0x18] sm:$0xff] }
0x1346   :  { %v4827_v52 = vadd.f32 %v941_v40, %v940_v51  ;;  %v3968_v40 = vpack.c.bf16 %v1211_v49, %v1210_v46 }
0x1348   :  { %949 = vrot.lane.b32.xlu0 %v4827_v52, %s4440_s2 }
0x134c   :  { %944 = vrot.lane.b32.xlu0 %v4703_v17, %s4437_s8 }
0x13ba   :  { %v950_v53 = vpop.permute.xlu0 %949 }
0x13bb   :  { %3807 = vmatmul.mubr.msk.f32.vlgmr.msra.gmra.mrb[6].mxu1 %vm177_vm1, %v950_v53 }
0x13bc   :  { %3967 = vmatpush3.bf16.msra.mxu1 %v3964_v47 }
0x13bd   :  { %3969 = vmatprep.subr.bf16.mxu1 %v3968_v40 }
0x13be   :  { %v945_v60 = vpop.permute.xlu0 %944 }
0x13bf   :  { %v947_v61 = vsel %vm267_vm2, %v263_v18, %v945_v60 }
0x13c0   :  { %3971 = vmatpush3.bf16.msra.mxu1 %v3968_v40 }
0x13c1   :  { %3978 = vmatprep.subr.bf16.mxu1 %v4434_v0 }
0x148e   :  { %v1019_v54 = vpop.f32.mrb[6].mxu1 }
0x148f   :  { %1024 = vrot.lane.b32.xlu1 %v1019_v54, %s4437_s8  ;;  %v3808_v55 = vpop.f32.mrb[7].mxu1 }
0x1501   :  { %v1025_v56 = vpop.permute.xlu1 %1024 }
0x1502   :  { %v1027_v57 = vsel %vm267_vm2, %v1019_v54, %v1025_v56  ;;  %v1173_v56 = vrot.slane %v4827_v52, 6 }
0x1503   :  { %v1035_v58 = vadd.f32 %v1027_v57, %v4711_v21  ;;  %v1028_v62 = vadd.f32 %v1027_v57, %v947_v61 }
0x1505   :  { %1037 = vrot.lane.b32.xlu1 %v1035_v58, %s4439_s22  ;;  %v3632_v63 = vmul.f32 -1.442695, %v1028_v62 }
0x1507   :  { %4086 = vpow2.f32 %v3632_v63  ;;  %v1185_v63 = vsel %vm267_vm2, %v4805_v26, %v1173_v56 }
0x1511   :  { %v4087_v3 = vpop.eup %4086 }
0x1512   :  { %v1032_v4 = vadd.f32 1.0, %v4087_v3 }
0x1514   :  { %4088 = vrcp.f32 %v1032_v4 }
0x151e   :  { %v4089_v5 = vpop.eup %4088 }
0x151f   :  { %v1047_v12 = vsub.f32 1.0, %v4089_v5  ;;  %v1053_v18 = vmul.f32 %v4089_v5, %v4827_v52 }
0x1577   :  { %v1038_v6 = vpop.permute.xlu1 %1037 }
0x1578   :  { %v1040_v7 = vmul.f32 %v4089_v5, %v1038_v6  ;;  %v1188_v6 = vrot.slane %v4805_v26, 4 }
0x157a   :  { %1042 = vrot.lane.b32.xlu0 %v1040_v7, %s4438_s6 }
0x15ec   :  { %v1043_v9 = vpop.permute.xlu0 %1042 }
0x15ed   :  { %v1045_v10 = vadd.f32 %v1043_v9, %v947_v61 }
0x15ef   :  { %4090 = vtanh.f32 %v1045_v10  ;;  %v1303_v10 = vld [vmem:[#allocation14] sm:$0xf] }
0x15f9   :  { %v4091_v11 = vpop.eup %4090 }
0x15fa   :  { %1049 = vrot.lane.b32.xlu1 %v4091_v11, %s4440_s2 }
0x166c   :  { %v1050_v14 = vpop.permute.xlu1 %1049 }
0x166d   :  { %v1052_v15 = vmul.f32 %v1050_v14, %v1047_v12  ;;  %v1195_v12 = vsel %vm267_vm2, %v1171_v35, %v4763_v31  ;;  %v1190_v14 = vrot.slane %v4719_v39, 4 }
0x166e   :  { %v1196_v26 = vsel %vm1181_vm3, %v1195_v12, %v1167_v34 }
0x166f   :  { %v4844_v16 = vadd.f32 %v1053_v18, %v1052_v15 }
0x1671   :  { %1061 = vrot.lane.b32.xlu0 %v4844_v16, %s4440_s2  ;;  %v1175_v60 = vrot.slane %v4844_v16, 4 }
0x1673   :  { %v1186_v3 = vsel %vm1181_vm3, %v1185_v63, %v1175_v60 }
0x1675   :  { %1056 = vrot.lane.b32.xlu0 %v606_v42, %s4437_s8 }
0x16e3   :  { %v1062_v19 = vpop.permute.xlu0 %1061 }
0x16e4   :  { %3814 = vmatmul.mubr.msk.f32.vlgmr.msra.gmra.mrb[8].mxu0 %vm177_vm1, %v1062_v19 }
0x16e5   :  { %3831 = vmatprep.mubr.msk.f32.mxu0 %vm4435_vm0, %v4436_v1 }
0x16e7   :  { %v1057_v27 = vpop.permute.xlu0 %1056 }
0x16e8   :  { %v1059_v17 = vsel %vm267_vm2, %v608_v32, %v1057_v27  ;;  %v1302_v32 = vld [vmem:[#allocation11 + $0x8] sm:$0xff] }
0x16e9   :  { %v4869_v37 = vpack.c.bf16 %v1302_v32, %v1301_v13 }
0x16eb   :  { %3974 = vmatpush3.bf16.msra.mxu0 %v4869_v37 }
0x16ec   :  { %3975 = vmatprep.subr.bf16.mxu0 %v4434_v0 }
0x16ee   :  { %3832 = vmatmul.mubr.f32.vlgmr.msra.gmra.mrb[10].mxu0 %v4436_v1 }
0x16ef   :  { %3977 = vmatpush3.bf16.msra.mxu0 %v4869_v37  ;;  %3838 = vmatprep.mubr.msk.f32.mxu0 %vm4435_vm0, %v4436_v1 }
0x16f0   :  { %3981 = vmatprep.subr.bf16.mxu0 %v4434_v0 }
0x17b7   :  { %v1131_v20 = vpop.f32.mrb[8].mxu0 }
0x17b8   :  { %1136 = vrot.lane.b32.xlu1 %v1131_v20, %s4437_s8  ;;  %v3815_v22 = vpop.f32.mrb[9].mxu0 }
0x17c1   :  { %v1376_v51 = vpop.f32.mrb[10].mxu0 }
0x17c2   :  { %v3833_v53 = vpop.f32.mrb[11].mxu0 }
0x182a   :  { %v1137_v23 = vpop.permute.xlu1 %1136 }
0x182b   :  { %v1139_v24 = vsel %vm267_vm2, %v1131_v20, %v1137_v23 }
0x182c   :  { %v1147_v25 = vadd.f32 %v1139_v24, %v4711_v21  ;;  %v1140_v42 = vadd.f32 %v1139_v24, %v1059_v17  ;;  %v1169_v21 = vrot.slane %v4763_v31, 4  ;;  %v3635_v31 = vld [vmem:[#allocation13] ss:$0 sm:$0xff] }
0x182e   :  { %1149 = vrot.lane.b32.xlu1 %v1147_v25, %s4439_s22  ;;  %v3634_v28 = vmul.f32 -1.442695, %v1140_v42  ;;  %v1182_v38 = vsel %vm1181_vm3, %v1180_v36, %v1169_v21 }
0x182f   :  { %v1184_v41 = vsel %vm1183_vm4, %v1182_v38, %v1171_v35 }
0x1830   :  { %4092 = vpow2.f32 %v3634_v28 }
0x183a   :  { %v4093_v29 = vpop.eup %4092 }
0x183b   :  { %v1144_v30 = vadd.f32 1.0, %v4093_v29 }
0x183d   :  { %4094 = vrcp.f32 %v1144_v30 }
0x1847   :  { %v4095_v33 = vpop.eup %4094 }
0x1848   :  { %v1159_v54 = vsub.f32 1.0, %v4095_v33  ;;  %v1165_v57 = vmul.f32 %v4095_v33, %v4844_v16 }
0x18a0   :  { %v1150_v48 = vpop.permute.xlu1 %1149 }
0x18a1   :  { %v1152_v8 = vmul.f32 %v4095_v33, %v1150_v48 }
0x18a3   :  { %1154 = vrot.lane.b32.xlu0 %v1152_v8, %s4438_s6 }
0x18a7   :  { %1200 = vrot.lane.b32.xlu0 %v1184_v41, %s4440_s2 }
0x18ab   :  { %1381 = vrot.lane.b32.xlu0 %v1376_v51, %s4437_s8 }
0x1915   :  { %v1155_v59 = vpop.permute.xlu0 %1154 }
0x1916   :  { %v1157_v43 = vadd.f32 %v1155_v59, %v1059_v17 }
0x1918   :  { %4096 = vtanh.f32 %v1157_v43 }
0x1919   :  { %v1201_v7 = vpop.permute.xlu0 %1200 }
0x191d   :  { %v1382_v18 = vpop.permute.xlu0 %1381 }
0x191e   :  { %v1384_v20 = vsel %vm267_vm2, %v1376_v51, %v1382_v18 }
0x1922   :  { %v4097_v50 = vpop.eup %4096 }
0x1923   :  { %1161 = vrot.lane.b32.xlu1 %v4097_v50, %s4440_s2 }
0x1995   :  { %v1162_v55 = vpop.permute.xlu1 %1161 }
0x1996   :  { %v1164_v58 = vmul.f32 %v1162_v55, %v1159_v54 }
0x1998   :  { %v1166_v61 = vadd.f32 %v1165_v57, %v1164_v58 }
0x199a   :  { %v1178_v62 = vrot.slane %v1166_v61, 2 }
0x199c   :  { %v1192_v4 = vsel %vm267_vm2, %v1178_v62, %v4844_v16  ;;  %v1187_v5 = vsel %vm1183_vm4, %v1186_v3, %v1178_v62  ;;  %v1197_v16 = vsel %vm1183_vm4, %v1196_v26, %v1190_v14 }
0x199d   :  { %1202 = vrot.lane.b32.xlu1 %v1187_v5, %s4440_s2  ;;  %v1193_v52 = vsel %vm1181_vm3, %v1192_v4, %v1173_v56 }
0x199e   :  { %v1194_v9 = vsel %vm1183_vm4, %v1193_v52, %v1188_v6 }
0x199f   :  { %v1206_v11 = vsel %vm177_vm1, %v1201_v7, %v1194_v9 }
0x19a0   :  { %3824 = vmatprep.mubr.msk.f32.mxu1 %vm1219_vm5, %v1206_v11 }
0x19a1   :  { %1393 = vrot.lane.b32.xlu1 %v1303_v10, %s4438_s6 }
0x1a0f   :  { %v1203_v15 = vpop.permute.xlu1 %1202 }
0x1a10   :  { %v1207_v19 = vsel %vm177_vm1, %v1203_v15, %v1197_v16 }
0x1a11   :  { %3825 = vmatmul.mubr.msk.f32.vlgmr.msra.gmra.mrb[8].mxu1 %vm1219_vm5, %v1207_v19 }
0x1a12   :  { %3980 = vmatpush3.bf16.msra.mxu1 %v4869_v37  ;;  %3845 = vmatprep.mubr.msk.f32.mxu1 %vm4435_vm0, %v4436_v1 }
0x1a13   :  { %v4925_v2 = vpop.permute.xlu1 %1393  ;;  %3984 = vmatprep.subr.bf16.mxu1 %v4434_v0 }
0x1a14   :  { %v1396_v39 = vadd.f32 %v4925_v2, %v1384_v20 }
0x1a16   :  { %1398 = vrot.lane.b32.xlu1 %v1396_v39, %s4439_s22 }
0x1a88   :  { %v1399_v48 = vpop.permute.xlu1 %1398 }
0x1ae4   :  { %v3826_v22 = vpop.f32.mrb[8].mxu1 }
0x1ae5   :  { %v4930_v23 = vadd.f32 %v3826_v22, %v3635_v31  ;;  %v1292_v24 = vpop.f32.mrb[9].mxu1 }
0x1ae6   :  { %v4932_v25 = vadd.f32 %v3635_v31, %v1292_v24 }
0x1ae7   :  { %v1305_v27 = vrot.slane %v4930_v23, 4  ;;  %v1419_v43 = vrot.slane %v4930_v23, 2 }
0x1ae8   :  { %v1417_v51 = vrot.slane %v4932_v25, 2  ;;  %v1531_v15 = vrot.slane %v4932_v25, 4 }
0x1ae9   :  { %1306 = vrot.lane.b32.xlu0 %v1305_v27, %s4437_s8 }
0x1b5b   :  { %v1307_v17 = vpop.permute.xlu0 %1306 }
0x1b5c   :  { %v1309_v42 = vsel %vm267_vm2, %v4932_v25, %v1307_v17 }
0x1b5d   :  { %v1385_v28 = vadd.f32 %v1384_v20, %v1309_v42 }
0x1b5f   :  { %v3638_v29 = vmul.f32 -1.442695, %v1385_v28 }
0x1b61   :  { %4098 = vpow2.f32 %v3638_v29 }
0x1b6b   :  { %v4099_v30 = vpop.eup %4098 }
0x1b6c   :  { %v1389_v33 = vadd.f32 1.0, %v4099_v30 }
0x1b6e   :  { %4100 = vrcp.f32 %v1389_v33 }
0x1b78   :  { %v4101_v34 = vpop.eup %4100 }
0x1b79   :  { %v1401_v8 = vmul.f32 %v4101_v34, %v1399_v48  ;;  %v1408_v32 = vsub.f32 1.0, %v4101_v34  ;;  %v1414_v38 = vmul.f32 0.0, %v4101_v34 }
0x1b7b   :  { %1403 = vrot.lane.b32.xlu0 %v1401_v8, %s4438_s6 }
0x1bed   :  { %v1404_v21 = vpop.permute.xlu0 %1403 }
0x1bee   :  { %v1406_v35 = vadd.f32 %v1404_v21, %v1309_v42  ;;  %v1646_v21 = vrot.slane %v4930_v23, 6 }
0x1bf0   :  { %4102 = vtanh.f32 %v1406_v35 }
0x1bfa   :  { %v4103_v13 = vpop.eup %4102 }
0x1bfb   :  { %1410 = vrot.lane.b32.xlu1 %v4103_v13, %s4440_s2 }
0x1c6d   :  { %v1411_v36 = vpop.permute.xlu1 %1410 }
0x1c6e   :  { %v1413_v41 = vmul.f32 %v1411_v36, %v1408_v32 }
0x1c70   :  { %v4942_v59 = vadd.f32 %v1414_v38, %v1413_v41 }
0x1c72   :  { %1425 = vrot.lane.b32.xlu0 %v4942_v59, %s4440_s2 }
0x1c76   :  { %1420 = vrot.lane.b32.xlu0 %v1419_v43, %s4437_s8 }
0x1ce4   :  { %v1426_v44 = vpop.permute.xlu0 %1425 }
0x1ce5   :  { %3839 = vmatmul.mubr.msk.f32.vlgmr.msra.gmra.mrb[12].mxu0 %vm177_vm1, %v1426_v44 }
0x1ce6   :  { %3983 = vmatpush3.bf16.msra.mxu0 %v4869_v37  ;;  %3852 = vmatprep.mubr.msk.f32.mxu0 %vm4435_vm0, %v4436_v1 }
0x1ce7   :  { %3987 = vmatprep.subr.bf16.mxu0 %v4434_v0 }
0x1ce8   :  { %v1421_v40 = vpop.permute.xlu0 %1420 }
0x1ce9   :  { %v1423_v53 = vsel %vm267_vm2, %v1417_v51, %v1421_v40 }
0x1db8   :  { %v1495_v45 = vpop.f32.mrb[12].mxu0 }
0x1db9   :  { %1500 = vrot.lane.b32.xlu1 %v1495_v45, %s4437_s8  ;;  %v3840_v46 = vpop.f32.mrb[13].mxu0 }
0x1e2b   :  { %v1501_v47 = vpop.permute.xlu1 %1500 }
0x1e2c   :  { %v1503_v49 = vsel %vm267_vm2, %v1495_v45, %v1501_v47  ;;  %v1644_v45 = vrot.slane %v4932_v25, 6 }
0x1e2d   :  { %v1511_v50 = vadd.f32 %v1503_v49, %v4925_v2  ;;  %v1504_v54 = vadd.f32 %v1503_v49, %v1423_v53 }
0x1e2f   :  { %1513 = vrot.lane.b32.xlu1 %v1511_v50, %s4439_s22  ;;  %v3640_v55 = vmul.f32 -1.442695, %v1504_v54 }
0x1e31   :  { %4104 = vpow2.f32 %v3640_v55 }
0x1e3b   :  { %v4105_v56 = vpop.eup %4104 }
0x1e3c   :  { %v1508_v57 = vadd.f32 1.0, %v4105_v56 }
0x1e3e   :  { %4106 = vrcp.f32 %v1508_v57 }
0x1e48   :  { %v4107_v58 = vpop.eup %4106 }
0x1e49   :  { %v1523_v4 = vsub.f32 1.0, %v4107_v58  ;;  %v1529_v6 = vmul.f32 %v4107_v58, %v4942_v59 }
0x1ea1   :  { %v1514_v60 = vpop.permute.xlu1 %1513 }
0x1ea2   :  { %v1516_v61 = vmul.f32 %v4107_v58, %v1514_v60 }
0x1ea4   :  { %1518 = vrot.lane.b32.xlu0 %v1516_v61, %s4438_s6 }
0x1f16   :  { %v1519_v62 = vpop.permute.xlu0 %1518 }
0x1f17   :  { %v1521_v63 = vadd.f32 %v1519_v62, %v1423_v53 }
0x1f19   :  { %4108 = vtanh.f32 %v1521_v63 }
0x1f23   :  { %v4109_v3 = vpop.eup %4108 }
0x1f24   :  { %1525 = vrot.lane.b32.xlu1 %v4109_v3, %s4440_s2 }
0x1f96   :  { %v1526_v5 = vpop.permute.xlu1 %1525 }
0x1f97   :  { %v1528_v52 = vmul.f32 %v1526_v5, %v1523_v4 }
0x1f99   :  { %v4966_v7 = vadd.f32 %v1529_v6, %v1528_v52 }
0x1f9b   :  { %1538 = vrot.lane.b32.xlu0 %v4966_v7, %s4440_s2 }
0x1f9f   :  { %1533 = vrot.lane.b32.xlu0 %v4930_v23, %s4437_s8 }
0x200d   :  { %v1539_v9 = vpop.permute.xlu0 %1538 }
0x200e   :  { %3846 = vmatmul.mubr.msk.f32.vlgmr.msra.gmra.mrb[10].mxu1 %vm177_vm1, %v1539_v9 }
0x200f   :  { %3986 = vmatpush3.bf16.msra.mxu1 %v4869_v37  ;;  %3859 = vmatprep.mubr.msk.f32.mxu1 %vm4435_vm0, %v4436_v1 }
0x2010   :  { %3990 = vmatprep.subr.bf16.mxu1 %v4434_v0 }
0x2011   :  { %v1534_v18 = vpop.permute.xlu0 %1533 }
0x2012   :  { %v1536_v16 = vsel %vm267_vm2, %v1531_v15, %v1534_v18 }
0x20e1   :  { %v1608_v10 = vpop.f32.mrb[10].mxu1 }
0x20e2   :  { %1613 = vrot.lane.b32.xlu1 %v1608_v10, %s4437_s8  ;;  %v3847_v11 = vpop.f32.mrb[11].mxu1 }
0x2154   :  { %v1614_v12 = vpop.permute.xlu1 %1613 }
0x2155   :  { %v1616_v26 = vsel %vm267_vm2, %v1608_v10, %v1614_v12 }
0x2156   :  { %v1624_v14 = vadd.f32 %v1616_v26, %v4925_v2  ;;  %v1617_v19 = vadd.f32 %v1616_v26, %v1536_v16 }
0x2158   :  { %1626 = vrot.lane.b32.xlu1 %v1624_v14, %s4439_s22  ;;  %v3642_v20 = vmul.f32 -1.442695, %v1617_v19 }
0x215a   :  { %4110 = vpow2.f32 %v3642_v20 }
0x2164   :  { %v4111_v39 = vpop.eup %4110 }
0x2165   :  { %v1621_v31 = vadd.f32 1.0, %v4111_v39 }
0x2167   :  { %4112 = vrcp.f32 %v1621_v31 }
0x2171   :  { %v4113_v22 = vpop.eup %4112 }
0x2172   :  { %v1636_v30 = vsub.f32 1.0, %v4113_v22  ;;  %v1642_v34 = vmul.f32 %v4113_v22, %v4966_v7 }
0x21ca   :  { %v1627_v24 = vpop.permute.xlu1 %1626 }
0x21cb   :  { %v1629_v17 = vmul.f32 %v4113_v22, %v1627_v24 }
0x21cd   :  { %1631 = vrot.lane.b32.xlu0 %v1629_v17, %s4438_s6 }
0x223f   :  { %v1632_v42 = vpop.permute.xlu0 %1631 }
0x2240   :  { %v1634_v28 = vadd.f32 %v1632_v42, %v1536_v16 }
0x2242   :  { %4114 = vtanh.f32 %v1634_v28 }
0x224c   :  { %v4115_v29 = vpop.eup %4114 }
0x224d   :  { %1638 = vrot.lane.b32.xlu1 %v4115_v29, %s4440_s2 }
0x22bf   :  { %v1639_v33 = vpop.permute.xlu1 %1638 }
0x22c0   :  { %v1641_v48 = vmul.f32 %v1639_v33, %v1636_v30 }
0x22c2   :  { %v4986_v8 = vadd.f32 %v1642_v34, %v1641_v48 }
0x22c4   :  { %1652 = vrot.lane.b32.xlu0 %v4986_v8, %s4440_s2 }
0x22c8   :  { %1647 = vrot.lane.b32.xlu0 %v1646_v21, %s4437_s8 }
0x2336   :  { %v1653_v35 = vpop.permute.xlu0 %1652 }
0x2337   :  { %3853 = vmatmul.mubr.msk.f32.vlgmr.msra.gmra.mrb[14].mxu0 %vm177_vm1, %v1653_v35 }
0x2338   :  { %3989 = vmatpush3.bf16.msra.mxu0 %v4869_v37  ;;  %3866 = vmatprep.mubr.msk.f32.mxu0 %vm4435_vm0, %v4436_v1 }
0x2339   :  { %3993 = vmatprep.subr.bf16.mxu0 %v4434_v0 }
0x233a   :  { %v1648_v44 = vpop.permute.xlu0 %1647 }
0x233b   :  { %v1650_v46 = vsel %vm267_vm2, %v1644_v45, %v1648_v44 }
0x240a   :  { %v1722_v13 = vpop.f32.mrb[14].mxu0 }
0x240b   :  { %1727 = vrot.lane.b32.xlu1 %v1722_v13, %s4437_s8  ;;  %v3854_v32 = vpop.f32.mrb[15].mxu0 }
0x247d   :  { %v1728_v36 = vpop.permute.xlu1 %1727 }
0x247e   :  { %v1730_v38 = vsel %vm267_vm2, %v1722_v13, %v1728_v36 }
0x247f   :  { %v1738_v41 = vadd.f32 %v1730_v38, %v4925_v2  ;;  %v1731_v47 = vadd.f32 %v1730_v38, %v1650_v46 }
0x2481   :  { %1740 = vrot.lane.b32.xlu1 %v1738_v41, %s4439_s22  ;;  %v3644_v0 = vmul.f32 -1.442695, %v1731_v47 }
0x2483   :  { %4116 = vpow2.f32 %v3644_v0 }
0x248d   :  { %v4117_v49 = vpop.eup %4116 }
0x248e   :  { %v1735_v50 = vadd.f32 1.0, %v4117_v49 }
0x2490   :  { %4118 = vrcp.f32 %v1735_v50 }
0x249a   :  { %v4119_v40 = vpop.eup %4118 }
0x249b   :  { %v1750_v58 = vsub.f32 1.0, %v4119_v40  ;;  %v1756_v61 = vmul.f32 %v4119_v40, %v4986_v8 }
0x24f3   :  { %v1741_v53 = vpop.permute.xlu1 %1740 }
0x24f4   :  { %v1743_v54 = vmul.f32 %v4119_v40, %v1741_v53 }
0x24f6   :  { %1745 = vrot.lane.b32.xlu0 %v1743_v54, %s4438_s6 }
0x2568   :  { %v1746_v55 = vpop.permute.xlu0 %1745 }
0x2569   :  { %v1748_v56 = vadd.f32 %v1746_v55, %v1650_v46 }
0x256b   :  { %4120 = vtanh.f32 %v1748_v56 }
0x2575   :  { %v4121_v57 = vpop.eup %4120 }
0x2576   :  { %1752 = vrot.lane.b32.xlu1 %v4121_v57, %s4440_s2 }
0x25e8   :  { %v1753_v60 = vpop.permute.xlu1 %1752 }
0x25e9   :  { %v1755_v62 = vmul.f32 %v1753_v60, %v1750_v58 }
0x25eb   :  { %v5010_v63 = vadd.f32 %v1756_v61, %v1755_v62 }
0x25ed   :  { %1763 = vrot.lane.b32.xlu0 %v5010_v63, %s4440_s2 }
0x25f1   :  { %1758 = vrot.lane.b32.xlu0 %v1531_v15, %s4437_s8 }
0x265f   :  { %v1764_v3 = vpop.permute.xlu0 %1763 }
0x2660   :  { %3860 = vmatmul.mubr.msk.f32.vlgmr.msra.gmra.mrb[12].mxu1 %vm177_vm1, %v1764_v3 }
0x2661   :  { %3992 = vmatpush3.bf16.msra.mxu1 %v4869_v37  ;;  %3873 = vmatprep.mubr.msk.f32.mxu1 %vm4435_vm0, %v4436_v1 }
0x2663   :  { %v1759_v10 = vpop.permute.xlu0 %1758 }
0x2664   :  { %v1761_v11 = vsel %vm267_vm2, %v4930_v23, %v1759_v10  ;;  %v2499_v23 = vld [vmem:[%s5416_s12] sm:$0xff] }
0x2733   :  { %v1833_v4 = vpop.f32.mrb[12].mxu1 }
0x2734   :  { %1838 = vrot.lane.b32.xlu1 %v1833_v4, %s4437_s8  ;;  %v3861_v5 = vpop.f32.mrb[13].mxu1 }
0x27a6   :  { %v1839_v6 = vpop.permute.xlu1 %1838 }
0x27a7   :  { %v1841_v52 = vsel %vm267_vm2, %v1833_v4, %v1839_v6 }
0x27a8   :  { %v1849_v9 = vadd.f32 %v1841_v52, %v4925_v2  ;;  %v1842_v12 = vadd.f32 %v1841_v52, %v1761_v11 }
0x27aa   :  { %1851 = vrot.lane.b32.xlu1 %v1849_v9, %s4439_s22  ;;  %v3646_v26 = vmul.f32 -1.442695, %v1842_v12 }
0x27ac   :  { %4122 = vpow2.f32 %v3646_v26 }
0x27b6   :  { %v4123_v14 = vpop.eup %4122 }
0x27b7   :  { %v1846_v18 = vadd.f32 1.0, %v4123_v14 }
0x27b9   :  { %4124 = vrcp.f32 %v1846_v18 }
0x27c3   :  { %v4125_v15 = vpop.eup %4124 }
0x27c4   :  { %v1861_v22 = vsub.f32 1.0, %v4125_v15  ;;  %v1867_v17 = vmul.f32 %v4125_v15, %v5010_v63 }
0x281c   :  { %v1852_v16 = vpop.permute.xlu1 %1851 }
0x281d   :  { %v1854_v19 = vmul.f32 %v4125_v15, %v1852_v16 }
0x281f   :  { %1856 = vrot.lane.b32.xlu0 %v1854_v19, %s4438_s6 }
0x2891   :  { %v1857_v20 = vpop.permute.xlu0 %1856 }
0x2892   :  { %v1859_v39 = vadd.f32 %v1857_v20, %v1761_v11 }
0x2894   :  { %4126 = vtanh.f32 %v1859_v39 }
0x289e   :  { %v4127_v31 = vpop.eup %4126 }
0x289f   :  { %1863 = vrot.lane.b32.xlu1 %v4127_v31, %s4440_s2 }
0x2911   :  { %v1864_v24 = vpop.permute.xlu1 %1863 }
0x2912   :  { %v1866_v42 = vmul.f32 %v1864_v24, %v1861_v22 }
0x2914   :  { %v5028_v28 = vadd.f32 %v1867_v17, %v1866_v42 }
0x2916   :  { %1875 = vrot.lane.b32.xlu0 %v5028_v28, %s4440_s2 }
0x291a   :  { %1870 = vrot.lane.b32.xlu0 %v1417_v51, %s4437_s8 }
0x2988   :  { %v1876_v29 = vpop.permute.xlu0 %1875 }
0x2989   :  { %3867 = vmatmul.mubr.msk.f32.vlgmr.msra.gmra.mrb[16].mxu0 %vm177_vm1, %v1876_v29 }
0x298a   :  { %3995 = vmatpush3.bf16.msra.mxu0 %v4869_v37  ;;  %3880 = vmatprep.mubr.msk.f32.mxu0 %vm4435_vm0, %v4436_v1 }
0x298b   :  { %3894 = vmatprep.subr.mxu0 %v4436_v1 }
0x298c   :  { %v1871_v51 = vpop.permute.xlu0 %1870 }
0x298d   :  { %v1873_v37 = vsel %vm267_vm2, %v1419_v43, %v1871_v51 }
0x2a5c   :  { %v1945_v30 = vpop.f32.mrb[16].mxu0 }
0x2a5d   :  { %1950 = vrot.lane.b32.xlu1 %v1945_v30, %s4437_s8  ;;  %v3868_v33 = vpop.f32.mrb[17].mxu0 }
0x2acf   :  { %v1951_v34 = vpop.permute.xlu1 %1950 }
0x2ad0   :  { %v1953_v48 = vsel %vm267_vm2, %v1945_v30, %v1951_v34 }
0x2ad1   :  { %v1961_v35 = vadd.f32 %v1953_v48, %v4925_v2  ;;  %v1954_v13 = vadd.f32 %v1953_v48, %v1873_v37 }
0x2ad3   :  { %1963 = vrot.lane.b32.xlu1 %v1961_v35, %s4439_s22  ;;  %v3648_v32 = vmul.f32 -1.442695, %v1954_v13 }
0x2ad5   :  { %4128 = vpow2.f32 %v3648_v32  ;;  %v2502_v32 = vld [vmem:[%s5416_s12 + $0x18] sm:$0xff] }
0x2adf   :  { %v4129_v36 = vpop.eup %4128 }
0x2ae0   :  { %v1958_v38 = vadd.f32 1.0, %v4129_v36 }
0x2ae2   :  { %4130 = vrcp.f32 %v1958_v38 }
0x2aec   :  { %v4131_v41 = vpop.eup %4130 }
0x2aed   :  { %v1973_v50 = vsub.f32 1.0, %v4131_v41  ;;  %v1979_v43 = vmul.f32 %v4131_v41, %v5028_v28 }
0x2b45   :  { %v1964_v44 = vpop.permute.xlu1 %1963 }
0x2b46   :  { %v1966_v46 = vmul.f32 %v4131_v41, %v1964_v44  ;;  %v2205_v41 = vrot.slane %v4966_v7, 7  ;;  %v2207_v44 = vrot.slane %v4986_v8, 6 }
0x2b48   :  { %1968 = vrot.lane.b32.xlu0 %v1966_v46, %s4438_s6  ;;  %v2259_v46 = vrot.slane %v4986_v8, 7 }
0x2bba   :  { %v1969_v47 = vpop.permute.xlu0 %1968 }
0x2bbb   :  { %v1971_v0 = vadd.f32 %v1969_v47, %v1873_v37  ;;  %v2501_v37 = vld [vmem:[%s5416_s12 + $0x10] sm:$0xff]  ;;  %v2257_v47 = vrot.slane %v4942_v59, 1 }
0x2bbc   :  { %v4000_v36 = vpack.c.bf16 %v2502_v32, %v2501_v37  ;;  %v2301_v32 = vlaneseq }
0x2bbd   :  { %4132 = vtanh.f32 %v1971_v0  ;;  %v2209_v0 = vrot.slane %v5010_v63, 5 }
0x2bc7   :  { %v4133_v49 = vpop.eup %4132 }
0x2bc8   :  { %1975 = vrot.lane.b32.xlu1 %v4133_v49, %s4440_s2  ;;  %v2237_v49 = vrot.slane %v5010_v63, 6 }
0x2c3a   :  { %v1976_v40 = vpop.permute.xlu1 %1975 }
0x2c3b   :  { %v1978_v53 = vmul.f32 %v1976_v40, %v1973_v50  ;;  %v2221_v50 = vsel %vm2220_vm6, %v4942_v59, %v2205_v41 }
0x2c3d   :  { %v5050_v54 = vadd.f32 %v1979_v43, %v1978_v53  ;;  %v2211_v43 = vrot.slane %v5028_v28, 4  ;;  %v2261_v53 = vrot.slane %v5028_v28, 5 }
0x2c3f   :  { %1987 = vrot.lane.b32.xlu0 %v5050_v54, %s4440_s2 }
0x2c43   :  { %1982 = vrot.lane.b32.xlu0 %v4932_v25, %s4437_s8 }
0x2cb1   :  { %v1988_v55 = vpop.permute.xlu0 %1987 }
0x2cb2   :  { %3874 = vmatmul.mubr.msk.f32.vlgmr.msra.gmra.mrb[14].mxu1 %vm177_vm1, %v1988_v55 }
0x2cb5   :  { %v1983_v62 = vpop.permute.xlu0 %1982 }
0x2cb6   :  { %v1985_v3 = vsel %vm267_vm2, %v1305_v27, %v1983_v62 }
0x2d85   :  { %v2057_v56 = vpop.f32.mrb[14].mxu1 }
0x2d86   :  { %2062 = vrot.lane.b32.xlu1 %v2057_v56, %s4437_s8  ;;  %v3875_v57 = vpop.f32.mrb[15].mxu1 }
0x2d87   :  { %v2222_v57 = vsel %vm267_vm2, %v2221_v50, %v2207_v44 }
0x2df8   :  { %v2063_v58 = vpop.permute.xlu1 %2062 }
0x2df9   :  { %v2065_v60 = vsel %vm267_vm2, %v2057_v56, %v2063_v58  ;;  %v2213_v56 = vrot.slane %v5050_v54, 3  ;;  %v2263_v58 = vrot.slane %v5050_v54, 4 }
0x2dfa   :  { %v2073_v61 = vadd.f32 %v2065_v60, %v4925_v2  ;;  %v2066_v4 = vadd.f32 %v2065_v60, %v1985_v3  ;;  %v2267_v60 = vsel %vm2220_vm6, %v2257_v47, %v4966_v7 }
0x2dfc   :  { %2075 = vrot.lane.b32.xlu1 %v2073_v61, %s4439_s22  ;;  %v3650_v5 = vmul.f32 -1.442695, %v2066_v4 }
0x2dfe   :  { %4134 = vpow2.f32 %v3650_v5  ;;  %v2224_v5 = vsel %vm2223_vm7, %v2222_v57, %v2209_v0 }
0x2e08   :  { %v4135_v6 = vpop.eup %4134 }
0x2e09   :  { %v2070_v52 = vadd.f32 1.0, %v4135_v6 }
0x2e0b   :  { %4136 = vrcp.f32 %v2070_v52 }
0x2e15   :  { %v4137_v9 = vpop.eup %4136 }
0x2e16   :  { %v2085_v18 = vsub.f32 1.0, %v4137_v9  ;;  %v2091_v27 = vmul.f32 %v4137_v9, %v5050_v54 }
0x2e6e   :  { %v2076_v10 = vpop.permute.xlu1 %2075 }
0x2e6f   :  { %v2078_v11 = vmul.f32 %v4137_v9, %v2076_v10  ;;  %v2225_v10 = vsel %vm1181_vm3, %v2224_v5, %v2211_v43 }
0x2e71   :  { %2080 = vrot.lane.b32.xlu0 %v2078_v11, %s4438_s6 }
0x2ee3   :  { %v2081_v12 = vpop.permute.xlu0 %2080 }
0x2ee4   :  { %v2083_v26 = vadd.f32 %v2081_v12, %v1985_v3  ;;  %v2268_v3 = vsel %vm267_vm2, %v2267_v60, %v2259_v46  ;;  %v2227_v12 = vsel %vm2226_vm8, %v2225_v10, %v2213_v56  ;;  %v4442_v46 = vmov 1983009808  }
0x2ee5   :  { %v2269_v52 = vsel %vm2223_vm7, %v2268_v3, %v2237_v49 }
0x2ee6   :  { %4138 = vtanh.f32 %v2083_v26  ;;  %v2270_v11 = vsel %vm1181_vm3, %v2269_v52, %v2261_v53 }
0x2ee7   :  { %v2271_v26 = vsel %vm2226_vm8, %v2270_v11, %v2263_v58 }
0x2ef0   :  { %v4139_v14 = vpop.eup %4138 }
0x2ef1   :  { %2087 = vrot.lane.b32.xlu1 %v4139_v14, %s4440_s2 }
0x2f63   :  { %v2088_v15 = vpop.permute.xlu1 %2087 }
0x2f64   :  { %v2090_v16 = vmul.f32 %v2088_v15, %v2085_v18 }
0x2f66   :  { %v5067_v19 = vadd.f32 %v2091_v27, %v2090_v16 }
0x2f68   :  { %2099 = vrot.lane.b32.xlu0 %v5067_v19, %s4440_s2  ;;  %v2215_v4 = vrot.slane %v5067_v19, 2  ;;  %v2265_v6 = vrot.slane %v5067_v19, 3  ;;  %v2233_v14 = vrot.slane %v5067_v19, 1 }
0x2f6a   :  { %v2228_v16 = vsel %vm1183_vm4, %v2227_v12, %v2215_v4 }
0x2f6c   :  { %2094 = vrot.lane.b32.xlu0 %v1644_v45, %s4437_s8 }
0x2fda   :  { %v2100_v20 = vpop.permute.xlu0 %2099 }
0x2fdb   :  { %3881 = vmatmul.mubr.msk.f32.vlgmr.msra.gmra.mrb[18].mxu0 %vm177_vm1, %v2100_v20  ;;  %v2272_v20 = vsel %vm1183_vm4, %v2271_v26, %v2265_v6 }
0x2fdc   :  { %3896 = vmatprep.mubr.msk.f32.mxu0 %vm4435_vm0, %v4436_v1 }
0x2fde   :  { %v2095_v42 = vpop.permute.xlu0 %2094 }
0x2fdf   :  { %v2097_v25 = vsel %vm267_vm2, %v1646_v21, %v2095_v42  ;;  %v2500_v21 = vld [vmem:[%s5416_s12 + $0x8] sm:$0xff] }
0x2fe0   :  { %v3996_v13 = vpack.c.bf16 %v2500_v21, %v2499_v23 }
0x2fe2   :  { %3997 = vmatprep.subr.bf16.mxu1 %v3996_v13 }
0x2fe3   :  { %3999 = vmatpush3.bf16.msra.mxu1 %v3996_v13  ;;  %v4441_v13 = vmov 1966171168  }
0x2fe4   :  { %4001 = vmatprep.subr.bf16.mxu1 %v4000_v36 }
0x2fe7   :  { %4003 = vmatpush3.bf16.msra.mxu1 %v4000_v36 }
0x2fe8   :  { %3904 = vmatprep.subr.mxu1 %v4436_v1 }
0x30ae   :  { %v2169_v39 = vpop.f32.mrb[18].mxu0 }
0x30af   :  { %2174 = vrot.lane.b32.xlu1 %v2169_v39, %s4437_s8  ;;  %v3882_v31 = vpop.f32.mrb[19].mxu0 }
0x30b0   :  { %v2276_v31 = vrot.slane %v5050_v54, 1 }
0x3121   :  { %v2175_v22 = vpop.permute.xlu1 %2174 }
0x3122   :  { %v2177_v24 = vsel %vm267_vm2, %v2169_v39, %v2175_v22  ;;  %v2235_v39 = vrot.slane %v5028_v28, 7 }
0x3123   :  { %v2185_v17 = vadd.f32 %v2177_v24, %v4925_v2  ;;  %v2178_v45 = vadd.f32 %v2177_v24, %v2097_v25 }
0x3125   :  { %2187 = vrot.lane.b32.xlu1 %v2185_v17, %s4439_s22  ;;  %v3652_v29 = vmul.f32 -1.442695, %v2178_v45 }
0x3127   :  { %4140 = vpow2.f32 %v3652_v29  ;;  %v2239_v29 = vrot.slane %v4986_v8, 5 }
0x3131   :  { %v4141_v30 = vpop.eup %4140 }
0x3132   :  { %v2182_v33 = vadd.f32 1.0, %v4141_v30 }
0x3134   :  { %4142 = vrcp.f32 %v2182_v33 }
0x313e   :  { %v4143_v34 = vpop.eup %4142 }
0x313f   :  { %v2197_v40 = vsub.f32 1.0, %v4143_v34  ;;  %v2203_v61 = vmul.f32 %v4143_v34, %v5067_v19  ;;  %v2278_v19 = vrot.slane %v5010_v63, 7 }
0x3197   :  { %v2188_v48 = vpop.permute.xlu1 %2187 }
0x3198   :  { %v2190_v35 = vmul.f32 %v4143_v34, %v2188_v48  ;;  %v2241_v34 = vrot.slane %v4966_v7, 4  ;;  %v2280_v48 = vrot.slane %v4966_v7, 5  ;;  %v2299_v7 = vunpack.c.l.s4 %v4441_v13 }
0x319a   :  { %2192 = vrot.lane.b32.xlu0 %v2190_v35, %s4438_s6  ;;  %v2300_v36 = vunpack.c.0.s8 %v2299_v7 }
0x320c   :  { %v2193_v51 = vpop.permute.xlu0 %2192 }
0x320d   :  { %v2195_v2 = vadd.f32 %v2193_v51, %v2097_v25  ;;  %v2243_v51 = vrot.slane %v4942_v59, 3 }
0x320f   :  { %4144 = vtanh.f32 %v2195_v2  ;;  %v2282_v2 = vrot.slane %v4942_v59, 4  ;;  %v2463_v59 = vunpack.c.l.s4 %v4442_v46  ;;  %v3653_v46 = vld [vmem:[%s5417_s13] ss:$0 sm:$0xff] }
0x3211   :  { %v2464_v56 = vunpack.c.0.s8 %v2463_v59 }
0x3219   :  { %v4145_v38 = vpop.eup %4144 }
0x321a   :  { %2199 = vrot.lane.b32.xlu1 %v4145_v38, %s4440_s2  ;;  %v2302_v38 = vshrl.u32 %v2301_v32, 7 }
0x321c   :  { %v5156_v41 = vsub.s32 %v2300_v36, %v2302_v38 }
0x328c   :  { %v2200_v55 = vpop.permute.xlu1 %2199 }
0x328d   :  { %v2202_v62 = vmul.f32 %v2200_v55, %v2197_v40  ;;  %v5168_v55 = vsub.s32 0, %v2302_v38 }
0x328f   :  { %v2204_v9 = vadd.f32 %v2203_v61, %v2202_v62 }
0x3291   :  { %v2218_v18 = vrot.slane %v2204_v9, 1  ;;  %v2231_v15 = vrot.slane %v2204_v9, 2  ;;  %v2274_v27 = vrot.slane %v2204_v9, 3 }
0x3293   :  { %v2245_v22 = vsel %vm2220_vm6, %v2231_v15, %v2233_v14  ;;  %v2230_v24 = vsel %vm2229_vm9, %v2228_v16, %v2218_v18  ;;  %v2284_v17 = vsel %vm2220_vm6, %v2274_v27, %v2215_v4  ;;  %v2273_v42 = vsel %vm2229_vm9, %v2272_v20, %v2231_v15 }
0x3294   :  { %v2246_v25 = vsel %vm267_vm2, %v2245_v22, %v5050_v54  ;;  %2253 = vrot.lane.b32.xlu0 %v2230_v24, %s4440_s2  ;;  %2292 = vrot.lane.b32.xlu1 %v2273_v42, %s4440_s2  ;;  %v2285_v45 = vsel %vm267_vm2, %v2284_v17, %v2276_v31  ;;  %v5186_v18 = vsub.s32 %v2464_v56, %v2302_v38 }
0x3295   :  { %v2247_v30 = vsel %vm2223_vm7, %v2246_v25, %v2235_v39  ;;  %v2286_v33 = vsel %vm2223_vm7, %v2285_v45, %v5028_v28 }
0x3296   :  { %v2248_v63 = vsel %vm1181_vm3, %v2247_v30, %v2237_v49  ;;  %v2287_v54 = vsel %vm1181_vm3, %v2286_v33, %v2278_v19 }
0x3297   :  { %v2249_v35 = vsel %vm2226_vm8, %v2248_v63, %v2239_v29  ;;  %v2288_v8 = vsel %vm2226_vm8, %v2287_v54, %v2207_v44 }
0x3298   :  { %v2250_v23 = vsel %vm1183_vm4, %v2249_v35, %v2241_v34  ;;  %v2289_v28 = vsel %vm1183_vm4, %v2288_v8, %v2280_v48 }
0x3299   :  { %v2251_v21 = vsel %vm2229_vm9, %v2250_v23, %v2243_v51  ;;  %v2290_v37 = vsel %vm2229_vm9, %v2289_v28, %v2282_v2 }
0x3306   :  { %v2254_v47 = vpop.permute.xlu0 %2253  ;;  %v2293_v44 = vpop.permute.xlu1 %2292 }
0x3307   :  { %v2256_v0 = vsel %vm177_vm1, %v2254_v47, %v2251_v21  ;;  %v5160_v49 = vsel %vm177_vm1, %v2293_v44, %v2290_v37 }
0x3308   :  { %v2297_v50 = vcombine.high %v2256_v0, %v2256_v0  ;;  %v2304_v40 = vrot.slane %v2256_v0, %v5156_v41  ;;  %v2355_v43 = vcombine.high %v5160_v49, %v5160_v49  ;;  %v2362_v53 = vrot.slane %v5160_v49, %v5156_v41  ;;  %3891 = vmatprep.mubr.msk.f32.mxu1 %vm1219_vm5, %v2256_v0 }
0x3309   :  { %3895 = vmatpush3.xpose.msk.msra.mxu0 %vm1219_vm5, %v2256_v0  ;;  %3892 = vmatmul.mubr.msk.f32.vlgmr.msra.gmra.mrb[16].mxu1 %vm1219_vm5, %v5160_v49 }
0x330a   :  { %v2311_v57 = vrot.slane %v2297_v50, %v5156_v41  ;;  %v2312_v58 = vcombine.high %v2304_v40, %v2304_v40  ;;  %v2320_v60 = vrot.slane %v2304_v40, %v5156_v41  ;;  %v2369_v61 = vrot.slane %v2355_v43, %v5156_v41  ;;  %3905 = vmatpush3.msra.mxu1 %v2256_v0 }
0x330b   :  { %v2370_v62 = vcombine.high %v2362_v53, %v2362_v53  ;;  %v2378_v3 = vrot.slane %v2362_v53, %v5156_v41  ;;  %3899 = vmatprep.subr.mxu0 %v4436_v1  ;;  %3906 = vmatprep.mubr.msk.f32.mxu1 %vm4435_vm0, %v4436_v1 }
0x330c   :  { %v2313_v4 = vcombine.high %v2311_v57, %v2311_v57  ;;  %v2327_v5 = vrot.slane %v2311_v57, %v5156_v41  ;;  %v2334_v6 = vrot.slane %v2312_v58, %v5156_v41  ;;  %v2371_v52 = vcombine.high %v2369_v61, %v2369_v61  ;;  %v3660_v58 = vld.sshfl [vmem:[%s5413_s9] sm:$0x11 pattern:$0x75316420] }
0x330d   :  { %v2385_v9 = vrot.slane %v2369_v61, %v5156_v41  ;;  %v2392_v10 = vrot.slane %v2370_v62, %v5156_v41  ;;  %v2400_v11 = vcombine.high %v2378_v3, %v2378_v3  ;;  %v2342_v26 = vcombine.high %v2320_v60, %v2320_v60 }
0x330e   :  { %v2341_v12 = vrot.slane %v2313_v4, %v5156_v41  ;;  %v2407_v14 = vrot.slane %v2378_v3, %v5168_v55  ;;  %v2399_v15 = vrot.slane %v2371_v52, %v5156_v41  ;;  %v2343_v39 = vcombine.high %v2327_v5, %v2327_v5 }
0x330f   :  { %v2401_v27 = vcombine.high %v2385_v9, %v2385_v9  ;;  %v2402_v16 = vcombine.high %v2392_v10, %v2392_v10  ;;  %v2411_v20 = vrot.slane %v2392_v10, %v5168_v55  ;;  %v2344_v31 = vcombine.high %v2334_v6, %v2334_v6 }
0x3310   :  { %v2415_v22 = vrot.slane %v2400_v11, %v5168_v55  ;;  %v2423_v24 = vrot.slane %v2385_v9, %v5168_v55  ;;  %v2403_v17 = vcombine.high %v2399_v15, %v2399_v15  ;;  %v2427_v19 = vrot.slane %v2399_v15, %v5168_v55 }
0x3311   :  { %v2419_v42 = vrot.slane %v2402_v16, %v5168_v55  ;;  %v2431_v25 = vrot.slane %v2401_v27, %v5168_v55  ;;  %v2345_v45 = vcombine.high %v2341_v12, %v2341_v12  ;;  %v2444_v29 = vsel %vm2220_vm6, %v2320_v60, %v2407_v14 }
0x3312   :  { %v2445_v30 = vsel %vm2220_vm6, %v2334_v6, %v2411_v20  ;;  %v2446_v33 = vsel %vm2220_vm6, %v2342_v26, %v2415_v22  ;;  %v2435_v34 = vrot.slane %v2403_v17, %v5168_v55  ;;  %v2448_v48 = vsel %vm2220_vm6, %v2327_v5, %v2423_v24 }
0x3313   :  { %v2447_v63 = vsel %vm2220_vm6, %v2344_v31, %v2419_v42  ;;  %v2449_v54 = vsel %vm2220_vm6, %v2341_v12, %v2427_v19  ;;  %v2460_v35 = vcombine.low %v2444_v29, %v2445_v30  ;;  %v2450_v8 = vsel %vm2220_vm6, %v2343_v39, %v2431_v25 }
0x3314   :  { %v2461_v51 = vcombine.low %v2446_v33, %v2447_v63  ;;  %v2477_v2 = vcombine.low %v2448_v48, %v2449_v54  ;;  %v2451_v23 = vsel %vm2220_vm6, %v2345_v45, %v2435_v34  ;;  %v2749_v62 = vcombine.high %v3660_v58, %v3660_v58 }
0x3315   :  { %v2468_v28 = vrot.slane %v2460_v35, %v5186_v18  ;;  %v2478_v37 = vcombine.low %v2450_v8, %v2451_v23 }
0x3316   :  { %v2475_v21 = vrot.slane %v2461_v51, %v5186_v18  ;;  %v2485_v7 = vrot.slane %v2477_v2, %v5186_v18  ;;  %v2763_v3 = vrot.slane %v2749_v62, %v5156_v41 }
0x3317   :  { %v2492_v36 = vrot.slane %v2478_v37, %v5186_v18 }
0x3318   :  { %v2476_v13 = vcombine.low %v2468_v28, %v2475_v21  ;;  %v2771_v6 = vrot.slane %v2763_v3, %v5168_v55  ;;  %v3255_v3 = vld [vmem:[%s5418_s14 + $0x18] sm:$0xff] }
0x3319   :  { %v2493_v38 = vcombine.low %v2485_v7, %v2492_v36 }
0x331a   :  { %2496 = vst.msk [vmem:[#allocation16] sm:$0xff] %vm1219_vm5, %v2476_v13 }
0x331b   :  { %2497 = vst.msk [vmem:[#allocation16 + $0x8] sm:$0xff] %vm1219_vm5, %v2493_v38 }
0x33dc   :  { %v3893_v59 = vpop.f32.mrb[16].mxu1 }
0x33dd   :  { %v2580_v47 = vpop.f32.mrb[17].mxu1  ;;  %v2586_v0 = vadd.f32 %v3893_v59, %v3653_v46 }
0x33de   :  { %v2581_v44 = vadd.f32 %v3653_v46, %v2580_v47 }
0x33e0   :  { %3897 = vmatmul.mubr.msk.f32.vlgmr.msra.gmra.mrb[20].mxu0 %vm1219_vm5, %v2581_v44 }
0x33e1   :  { %3900 = vmatpush3.xpose.msk.msra.mxu0 %vm1219_vm5, %v5160_v49  ;;  %3901 = vmatprep.mubr.msk.f32.mxu0 %vm4435_vm0, %v4436_v1 }
0x33e2   :  { %3909 = vmatprep.subr.mxu0 %v4436_v1 }
0x33e4   :  { %3902 = vmatmul.mubr.msk.f32.vlgmr.msra.gmra.mrb[22].mxu0 %vm1219_vm5, %v2586_v0 }
0x33e5   :  { %3910 = vmatpush3.msra.mxu0 %v5160_v49  ;;  %3911 = vmatprep.mubr.msk.f32.mxu0 %vm4435_vm0, %v4436_v1  ;;  %v2756_v49 = vrot.slane %v3660_v58, %v5156_v41 }
0x33e7   :  { %v2767_v1 = vrot.slane %v2756_v49, %v5168_v55  ;;  %v3253_v49 = vld [vmem:[%s5418_s14 + $0x8] sm:$0xff] }
0x34b3   :  { %v2658_v50 = vpop.f32.mrb[20].mxu0 }
0x34b4   :  { %4146 = vtanh.f32 %v2658_v50  ;;  %v3898_v40 = vpop.f32.mrb[21].mxu0 }
0x34b7   :  { %v2731_v43 = vpop.f32.mrb[22].mxu0 }
0x34b8   :  { %4148 = vtanh.f32 %v2731_v43  ;;  %v3903_v53 = vpop.f32.mrb[23].mxu0 }
0x34be   :  { %v4147_v56 = vpop.eup %4146 }
0x34bf   :  { %v2737_v57 = vmul.f32 1.442695, %v4147_v56 }
0x34c1   :  { %4150 = vpow2.f32 %v2737_v57 }
0x34c2   :  { %v4149_v60 = vpop.eup %4148 }
0x34c3   :  { %v2739_v61 = vmul.f32 1.442695, %v4149_v60 }
0x34c5   :  { %4152 = vpow2.f32 %v2739_v61  ;;  %v3252_v61 = vld [vmem:[%s5418_s14] sm:$0xff] }
0x34c6   :  { %v4004_v62 = vpack.c.bf16 %v3253_v49, %v3252_v61 }
0x34c8   :  { %4005 = vmatprep.subr.bf16.mxu1 %v4004_v62 }
0x34cb   :  { %v4151_v4 = vpop.eup %4150 }
0x34cc   :  { %v2774_v5 = vmul.f32 %v4151_v4, %v2767_v1  ;;  %v3254_v1 = vld [vmem:[%s5418_s14 + $0x10] sm:$0xff] }
0x34cd   :  { %v4008_v4 = vpack.c.bf16 %v3255_v3, %v3254_v1  ;;  %v3388_v1 = vld [vmem:[%s5420_s16 + $0x10] sm:$0xff]  ;;  %v3389_v3 = vld [vmem:[%s5420_s16 + $0x18] sm:$0xff] }
0x34ce   :  { %v2777_v52 = vsel %vm2776_vm10, %v2774_v5, 0.0 }
0x34cf   :  { %v4153_v9 = vpop.eup %4152  ;;  %2778 = vadd.xlane.f32.xlu1 %v2777_v52 }
0x34d0   :  { %v2775_v10 = vmul.f32 %v4153_v9, %v2771_v6  ;;  %v3387_v6 = vld [vmem:[%s5420_s16 + $0x8] sm:$0xff] }
0x34d2   :  { %v2780_v11 = vsel %vm2776_vm10, %v2775_v10, 0.0 }
0x34d3   :  { %2781 = vadd.xlane.f32.xlu0 %v2780_v11 }
0x355c   :  { %v2779_v12 = vpop.xlane.xlu1 %2778 }
0x355d   :  { %4154 = vrcp.f32 %v2779_v12 }
0x3560   :  { %v2782_v26 = vpop.xlane.xlu0 %2781 }
0x3561   :  { %4156 = vrcp.f32 %v2782_v26 }
0x3567   :  { %v4155_v14 = vpop.eup %4154 }
0x3568   :  { %v2784_v15 = vmul.f32 %v4155_v14, %v2774_v5  ;;  %v3386_v5 = vld [vmem:[%s5420_s16] sm:$0xff] }
0x3569   :  { %v4012_v52 = vpack.c.bf16 %v3387_v6, %v3386_v5 }
0x356a   :  { %v2788_v27 = vcombine.high %v2784_v15, %v2784_v15  ;;  %v2795_v16 = vrot.slane %v2784_v15, %v5156_v41  ;;  %3907 = vmatmul.mubr.msk.f32.vlgmr.msra.gmra.mrb[18].mxu1 %vm2776_vm10, %v2784_v15 }
0x356b   :  { %v4157_v20 = vpop.eup %4156  ;;  %4007 = vmatpush3.bf16.msra.mxu1 %v4004_v62  ;;  %4013 = vmatprep.subr.bf16.mxu0 %v4012_v52 }
0x356c   :  { %v2802_v39 = vrot.slane %v2788_v27, %v5156_v41  ;;  %v2786_v31 = vmul.f32 %v4157_v20, %v2775_v10  ;;  %v2803_v22 = vcombine.high %v2795_v16, %v2795_v16  ;;  %v2811_v19 = vrot.slane %v2795_v16, %v5156_v41  ;;  %4009 = vmatprep.subr.bf16.mxu1 %v4008_v4 }
0x356e   :  { %3912 = vmatmul.mubr.msk.f32.vlgmr.msra.gmra.mrb[24].mxu0 %vm2776_vm10, %v2786_v31  ;;  %v2846_v24 = vcombine.high %v2786_v31, %v2786_v31  ;;  %v2853_v17 = vrot.slane %v2786_v31, %v5156_v41  ;;  %v2804_v42 = vcombine.high %v2802_v39, %v2802_v39  ;;  %v2818_v25 = vrot.slane %v2802_v39, %v5156_v41 }
0x356f   :  { %v2825_v33 = vrot.slane %v2803_v22, %v5156_v41  ;;  %v2833_v51 = vcombine.high %v2811_v19, %v2811_v19  ;;  %4011 = vmatpush3.bf16.msra.mxu1 %v4008_v4  ;;  %4015 = vmatpush3.bf16.msra.mxu0 %v4012_v52  ;;  %v4016_v4 = vpack.c.bf16 %v3389_v3, %v3388_v1 }
0x3570   :  { %v2860_v45 = vrot.slane %v2846_v24, %v5156_v41  ;;  %v2861_v29 = vcombine.high %v2853_v17, %v2853_v17  ;;  %v2869_v30 = vrot.slane %v2853_v17, %v5156_v41  ;;  %v2832_v35 = vrot.slane %v2804_v42, %v5156_v41 }
0x3571   :  { %v2834_v2 = vcombine.high %v2818_v25, %v2818_v25  ;;  %v2835_v13 = vcombine.high %v2825_v33, %v2825_v33  ;;  %4017 = vmatprep.subr.bf16.mxu0 %v4016_v4 }
0x3572   :  { %v2862_v34 = vcombine.high %v2860_v45, %v2860_v45  ;;  %v2876_v63 = vrot.slane %v2860_v45, %v5156_v41  ;;  %v2883_v48 = vrot.slane %v2861_v29, %v5156_v41  ;;  %v2891_v54 = vcombine.high %v2869_v30, %v2869_v30 }
0x3573   :  { %v2898_v8 = vrot.slane %v2869_v30, %v5168_v55  ;;  %v2836_v0 = vcombine.high %v2832_v35, %v2832_v35  ;;  %4019 = vmatpush3.bf16.msra.mxu0 %v4016_v4 }
0x3574   :  { %v2890_v23 = vrot.slane %v2862_v34, %v5156_v41  ;;  %v2892_v28 = vcombine.high %v2876_v63, %v2876_v63  ;;  %v2893_v21 = vcombine.high %v2883_v48, %v2883_v48  ;;  %v2902_v37 = vrot.slane %v2883_v48, %v5168_v55 }
0x3575   :  { %v2906_v7 = vrot.slane %v2891_v54, %v5168_v55  ;;  %v2914_v36 = vrot.slane %v2876_v63, %v5168_v55  ;;  %v2935_v38 = vsel %vm2220_vm6, %v2811_v19, %v2898_v8 }
0x3576   :  { %v2894_v46 = vcombine.high %v2890_v23, %v2890_v23  ;;  %v2910_v59 = vrot.slane %v2893_v21, %v5168_v55  ;;  %v2918_v47 = vrot.slane %v2890_v23, %v5168_v55  ;;  %v2922_v44 = vrot.slane %v2892_v28, %v5168_v55  ;;  %2944 = vst.msk [vmem:[#allocation17] sm:$0x3] %vm2943_vm11, %v2935_v38 }
0x3577   :  { %v2936_v50 = vsel %vm2220_vm6, %v2825_v33, %v2902_v37  ;;  %v2937_v40 = vsel %vm2220_vm6, %v2833_v51, %v2906_v7  ;;  %v2939_v43 = vsel %vm2220_vm6, %v2818_v25, %v2914_v36 }
0x3578   :  { %v2926_v53 = vrot.slane %v2894_v46, %v5168_v55  ;;  %v2938_v56 = vsel %vm2220_vm6, %v2835_v13, %v2910_v59  ;;  %v2940_v57 = vsel %vm2220_vm6, %v2832_v35, %v2918_v47  ;;  %v2941_v58 = vsel %vm2220_vm6, %v2834_v2, %v2922_v44  ;;  %2945 = vst.msk [vmem:[#allocation17 + $0x2] sm:$0x3] %vm2943_vm11, %v2936_v50 }
0x3579   :  { %2946 = vst.msk [vmem:[#allocation17 + $0x4] sm:$0x3] %vm2943_vm11, %v2937_v40  ;;  %2948 = vst.msk [vmem:[#allocation17 + $0x8] sm:$0x3] %vm2943_vm11, %v2939_v43 }
0x357a   :  { %2947 = vst.msk [vmem:[#allocation17 + $0x6] sm:$0x3] %vm2943_vm11, %v2938_v56  ;;  %2949 = vst.msk [vmem:[#allocation17 + $0xa] sm:$0x3] %vm2943_vm11, %v2940_v57  ;;  %v2942_v60 = vsel %vm2220_vm6, %v2836_v0, %v2926_v53 }
0x357b   :  { %2950 = vst.msk [vmem:[#allocation17 + $0xc] sm:$0x3] %vm2943_vm11, %v2941_v58  ;;  %2951 = vst.msk [vmem:[#allocation17 + $0xe] sm:$0x3] %vm2943_vm11, %v2942_v60 }
0x363d   :  { %v3020_v9 = vpop.f32.mrb[18].mxu1 }
0x363e   :  { %v3097_v10 = vcombine.high %v3020_v9, %v3020_v9  ;;  %v3104_v11 = vrot.slane %v3020_v9, %v5156_v41  ;;  %v3908_v12 = vpop.f32.mrb[19].mxu1 }
0x363f   :  { %v3666_v12 = vld [vmem:[%s5421_s17] ss:$0 sm:$0xff] }
0x3640   :  { %v3111_v26 = vrot.slane %v3097_v10, %v5156_v41  ;;  %v3112_v15 = vcombine.high %v3104_v11, %v3104_v11  ;;  %v3120_v31 = vrot.slane %v3104_v11, %v5156_v41 }
0x3641   :  { %v3092_v14 = vpop.f32.mrb[24].mxu0 }
0x3642   :  { %v3913_v27 = vpop.f32.mrb[25].mxu0  ;;  %v3155_v16 = vcombine.high %v3092_v14, %v3092_v14  ;;  %v3162_v20 = vrot.slane %v3092_v14, %v5156_v41  ;;  %v3113_v39 = vcombine.high %v3111_v26, %v3111_v26  ;;  %v3127_v22 = vrot.slane %v3111_v26, %v5156_v41 }
0x3643   :  { %v3134_v19 = vrot.slane %v3112_v15, %v5156_v41  ;;  %v3142_v34 = vcombine.high %v3120_v31, %v3120_v31 }
0x3644   :  { %v3169_v24 = vrot.slane %v3155_v16, %v5156_v41  ;;  %v3170_v17 = vcombine.high %v3162_v20, %v3162_v20  ;;  %v3178_v42 = vrot.slane %v3162_v20, %v5156_v41  ;;  %v3141_v33 = vrot.slane %v3113_v39, %v5156_v41 }
0x3645   :  { %v3143_v63 = vcombine.high %v3127_v22, %v3127_v22  ;;  %v3144_v8 = vcombine.high %v3134_v19, %v3134_v19  ;;  %v4443_v39 = vmov 0  }
0x3646   :  { %v3171_v25 = vcombine.high %v3169_v24, %v3169_v24  ;;  %v3185_v45 = vrot.slane %v3169_v24, %v5156_v41  ;;  %v3192_v29 = vrot.slane %v3170_v17, %v5156_v41  ;;  %v3200_v30 = vcombine.high %v3178_v42, %v3178_v42  ;;  %4048 = vset.pattern.permute.xlu1 %v4443_v39 }
0x3647   :  { %v3207_v48 = vrot.slane %v3178_v42, %v5168_v55  ;;  %v3145_v38 = vcombine.high %v3141_v33, %v3141_v33  ;;  %4049 = vset.pattern.permute.xlu0 %v4443_v39 }
0x3648   :  { %v3199_v54 = vrot.slane %v3171_v25, %v5156_v41  ;;  %v3201_v35 = vcombine.high %v3185_v45, %v3185_v45  ;;  %v3202_v51 = vcombine.high %v3192_v29, %v3192_v29  ;;  %v3211_v2 = vrot.slane %v3192_v29, %v5168_v55 }
0x3649   :  { %v3215_v23 = vrot.slane %v3200_v30, %v5168_v55  ;;  %v3223_v28 = vrot.slane %v3185_v45, %v5168_v55  ;;  %v3244_v21 = vsel %vm2220_vm6, %v3120_v31, %v3207_v48 }
0x364a   :  { %v3203_v37 = vcombine.high %v3199_v54, %v3199_v54  ;;  %v3219_v13 = vrot.slane %v3202_v51, %v5168_v55  ;;  %v3227_v7 = vrot.slane %v3199_v54, %v5168_v55  ;;  %v3231_v36 = vrot.slane %v3201_v35, %v5168_v55 }
0x364b   :  { %v3245_v41 = vsel %vm2220_vm6, %v3134_v19, %v3211_v2  ;;  %v3246_v46 = vsel %vm2220_vm6, %v3142_v34, %v3215_v23  ;;  %v3248_v59 = vsel %vm2220_vm6, %v3127_v22, %v3223_v28  ;;  %v3510_v34 = vld [vmem:[%s5414_s10 + $0x8] sm:$0xff]  ;;  %v3508_v35 = vand.u32 127, %v2301_v32 }
0x364c   :  { %v3235_v47 = vrot.slane %v3203_v37, %v5168_v55  ;;  %v3249_v44 = vsel %vm2220_vm6, %v3141_v33, %v3227_v7  ;;  %v3250_v0 = vsel %vm2220_vm6, %v3143_v63, %v3231_v36  ;;  %v3271_v50 = vcombine.low %v3244_v21, %v3245_v41  ;;  %v3509_v33 = vld [vmem:[%s5414_s10] sm:$0xff] }
0x364d   :  { %v3288_v40 = vcombine.low %v3248_v59, %v3249_v44  ;;  %v3247_v43 = vsel %vm2220_vm6, %v3144_v8, %v3219_v13 }
0x364e   :  { %v3251_v53 = vsel %vm2220_vm6, %v3145_v38, %v3235_v47  ;;  %v3272_v56 = vcombine.low %v3246_v46, %v3247_v43  ;;  %v3279_v58 = vrot.slane %v3271_v50, %v5186_v18  ;;  %v3527_v46 = vld [vmem:[%s5415_s11] sm:$0xff]  ;;  %v3528_v47 = vld [vmem:[%s5415_s11 + $0x8] sm:$0xff] }
0x364f   :  { %v3289_v57 = vcombine.low %v3250_v0, %v3251_v53  ;;  %v3296_v61 = vrot.slane %v3288_v40, %v5186_v18  ;;  %v3545_v40 = vsel %vm3531_vm15, %v3527_v46, 0.0  ;;  %v3546_v53 = vsel %vm3531_vm15, %v3528_v47, 0.0 }
0x3650   :  { %v3286_v60 = vrot.slane %v3272_v56, %v5186_v18 }
0x3651   :  { %v3303_v55 = vrot.slane %v3289_v57, %v5186_v18  ;;  %v3663_v18 = vld [vmem:[%s5419_s15] ss:$0 sm:$0xff] }
0x3652   :  { %v3287_v49 = vcombine.low %v3279_v58, %v3286_v60  ;;  %v3547_v58 = vadd.f32 %v3546_v53, %v3545_v40 }
0x3653   :  { %v3304_v62 = vcombine.low %v3296_v61, %v3303_v55 }
0x3654   :  { %3922 = vmatprep.mubr.msk.f32.mxu1 %vm1219_vm5, %v3287_v49 }
0x3655   :  { %3923 = vmatmul.mubr.msk.f32.vlgmr.msra.gmra.mrb[20].mxu1 %vm1219_vm5, %v3304_v62 }
0x3728   :  { %v3924_v5 = vpop.f32.mrb[20].mxu1 }
0x3729   :  { %v3381_v6 = vadd.f32 %v3924_v5, %v3663_v18  ;;  %v3375_v52 = vpop.f32.mrb[21].mxu1 }
0x372a   :  { %v3376_v9 = vadd.f32 %v3663_v18, %v3375_v52 }
0x372b   :  { %v3385_v11 = vmax.f32 %v3381_v6, 0.0 }
0x372c   :  { %v3384_v10 = vmax.f32 %v3376_v9, 0.0 }
0x372e   :  { %3933 = vmatprep.mubr.msk.f32.mxu0 %vm1219_vm5, %v3384_v10 }
0x372f   :  { %3934 = vmatmul.mubr.msk.f32.vlgmr.msra.gmra.mrb[26].mxu0 %vm1219_vm5, %v3385_v11 }
0x3802   :  { %v3935_v26 = vpop.f32.mrb[26].mxu0 }
0x3803   :  { %v3469_v14 = vpop.f32.mrb[27].mxu0  ;;  %v3475_v27 = vadd.f32 %v3935_v26, %v3666_v12 }
0x3804   :  { %v3470_v15 = vadd.f32 %v3666_v12, %v3469_v14 }
0x3805   :  { %v3482_v20 = vsel %vm3478_vm12, %v3475_v27, -inf }
0x3806   :  { %v3479_v16 = vsel %vm3478_vm12, %v3470_v15, -inf }
0x3807   :  { %3480 = vmax.xlane.f32.xlu0 %v3479_v16 }
0x380b   :  { %3483 = vmax.xlane.f32.xlu0 %v3482_v20 }
0x3894   :  { %v3481_v31 = vpop.xlane.xlu0 %3480 }
0x3895   :  { %v3485_v22 = vsub.f32 %v3470_v15, %v3481_v31 }
0x3897   :  { %v3487_v24 = vmul.f32 1.442695, %v3485_v22 }
0x3898   :  { %v3484_v17 = vpop.xlane.xlu0 %3483 }
0x3899   :  { %4158 = vpow2.f32 %v3487_v24  ;;  %v3486_v42 = vsub.f32 %v3475_v27, %v3484_v17 }
0x389b   :  { %v3489_v19 = vmul.f32 1.442695, %v3486_v42 }
0x389d   :  { %4160 = vpow2.f32 %v3489_v19 }
0x38a3   :  { %v4159_v25 = vpop.eup %4158 }
0x38a4   :  { %v3491_v45 = vsel %vm3478_vm12, %v4159_v25, 0.0 }
0x38a5   :  { %3492 = vadd.xlane.f32.xlu1 %v3491_v45 }
0x38a7   :  { %v4161_v29 = vpop.eup %4160 }
0x38a8   :  { %v3494_v30 = vsel %vm3478_vm12, %v4161_v29, 0.0 }
0x38a9   :  { %3495 = vadd.xlane.f32.xlu0 %v3494_v30 }
0x38b6   :  { %3512 = vperm.xlu1 %4048, %v3509_v33  }
0x38bf   :  { %3515 = vperm.xlu0 %4049, %v3510_v34  }
0x3932   :  { %v3493_v63 = vpop.xlane.xlu1 %3492 }
0x3933   :  { %4162 = vlog2.f32 %v3493_v63 }
0x3936   :  { %v3496_v48 = vpop.xlane.xlu0 %3495  ;;  %v3513_v2 = vpop.permute.xlu1 %3512 }
0x3937   :  { %4164 = vlog2.f32 %v3496_v48  ;;  %vm3517_vm13 = vcmp.eq.s32.totalorder %v3508_v35, %v3513_v2 }
0x393d   :  { %v4163_v54 = vpop.eup %4162 }
0x393e   :  { %v3498_v51 = vmul.f32 0.6931472, %v4163_v54  ;;  %v3516_v37 = vpop.permute.xlu0 %3515 }
0x393f   :  { %vm3518_vm14 = vcmp.eq.s32.totalorder %v3508_v35, %v3516_v37 }
0x3940   :  { %v3501_v8 = vadd.f32 %v3498_v51, %v3481_v31 }
0x3941   :  { %v4165_v23 = vpop.eup %4164 }
0x3942   :  { %v3500_v28 = vmul.f32 0.6931472, %v4165_v23  ;;  %v3503_v21 = vsub.f32 %v3470_v15, %v3501_v8 }
0x3944   :  { %v3502_v13 = vadd.f32 %v3500_v28, %v3484_v17  ;;  %3505 = vst.msk [vmem:[%s5423_s19] sm:$0xff] %vm3478_vm12, %v3503_v21  ;;  %v3519_v7 = vsel %vm3517_vm13, %v3503_v21, 0.0 }
0x3945   :  { %v3521_v36 = vsel %vm3478_vm12, %v3519_v7, 0.0 }
0x3946   :  { %3522 = vadd.xlane.f32.xlu1 %v3521_v36  ;;  %v3504_v32 = vsub.f32 %v3475_v27, %v3502_v13 }
0x3948   :  { %3506 = vst.msk [vmem:[%s5423_s19 + $0x8] sm:$0xff] %vm3478_vm12, %v3504_v32  ;;  %v3520_v38 = vsel %vm3518_vm14, %v3504_v32, 0.0  ;;  %s4444_s19 = smov [#allocation17]  }
0x3949   :  { %v3524_v41 = vsel %vm3478_vm12, %v3520_v38, 0.0  ;;  %s3582_s26 = sshll.u32 %s4444_s19, 4  ;;  %s3583_s26 = int_to_ptr.vmem [resolvable:$true] %s3582_s26 }
0x394a   :  { %3525 = vadd.xlane.f32.xlu0 %v3524_v41  ;;  %s4344_s24 = scalar_lea.vmem %s3583_s26, 256  ;;  %p4349_p9 = scmp.lt.s32.totalorder %s3583_s26, %s3583_s26 }
0x394b   :  { %p4345_p8 = scmp.ne.s32.totalorder %s3583_s26, %s4344_s24  ;;  %p4350_p10 = scmp.lt.s32.totalorder %s4344_s24, %s4344_s24 }
0x394d   :  { %p4351_p11 = por %p4350_p10, %p4349_p9 }
0x394f   :  { %p4352_p12 = pnand %p4351_p11, %p4345_p8 }
0x39d3   :  { %v3523_v59 = vpop.xlane.xlu1 %3522 }
0x39d4   :  { %v3529_v44 = vmul.f32 %v3527_v46, %v3523_v59 }
0x39d6   :  { %v3532_v43 = vsel %vm3531_vm15, %v3529_v44, 0.0 }
0x39d7   :  { %v3526_v0 = vpop.xlane.xlu0 %3525 }
0x39d8   :  { %v3530_v50 = vmul.f32 %v3528_v47, %v3526_v0 }
0x39da   :  { %v3533_v56 = vsel %vm3531_vm15, %v3530_v50, 0.0 }
0x39db   :  { %v3534_v57 = vadd.f32 %v3533_v56, %v3532_v43 }
0x39dd   :  { %3535 = vadd.xlane.f32.xlu1 %v3534_v57 }
0x39e1   :  { %3548 = vadd.xlane.f32.xlu1 %v3547_v58 }
0x39e2   :  { %4355 = shalt.err (!%p4352_p12)
}
0x39e3   :  { %s4356_s14 = scalar_lea.hbm %s5424_s20, 256 }
0x39e4   :  { %p4357_p13 = scmp.ne.s32.totalorder %s5424_s20, %s4356_s14  ;;  %p4360_p0 = scmp.lt.u32.totalorder %s4356_s14, %s5424_s20 }
0x39e6   :  { %p4362_p1 = pnand %p4360_p0, %p4357_p13 }
0x39e8   :  { %4365 = shalt.err (!%p4362_p1)
}
0x39e9   :  { %s4446_s12 = smov 2   ;;  %s4366_s15 = scalar_lea.vmem %s3569_s4, 256 }
0x39ea   :  { %3588 = dma.vmem_to_hbm [thread:$0]  %s3583_s26, 256, %s5424_s20, [#allocation18], %s4438_s6, %s4438_s6, %s4446_s12  }
0x39eb   :  { %p4367_p2 = scmp.ne.s32.totalorder %s3569_s4, %s4366_s15  ;;  %p4371_p3 = scmp.lt.s32.totalorder %s3569_s4, %s3569_s4 }
0x39ec   :  { %p4372_p4 = scmp.lt.s32.totalorder %s4366_s15, %s4366_s15 }
0x39ee   :  { %p4373_p5 = por %p4372_p4, %p4371_p3 }
0x39f0   :  { %p4374_p6 = pnand %p4373_p5, %p4367_p2 }
0x39f2   :  { %4377 = shalt.err (!%p4374_p6)
}
0x39f3   :  { %s5454_s18 = sld [smem:[#allocation33_spill]] }
0x39f9   :  { %s4378_s9 = scalar_lea.hbm %s5454_s18, 256 }
0x39fa   :  { %p4379_p7 = scmp.ne.s32.totalorder %s5454_s18, %s4378_s9  ;;  %p4382_p8 = scmp.lt.u32.totalorder %s4378_s9, %s5454_s18 }
0x39fc   :  { %p4384_p9 = pnand %p4382_p8, %p4379_p7 }
0x39fe   :  { %4387 = shalt.err (!%p4384_p9)
}
0x39ff   :  { %3574 = dma.vmem_to_hbm [thread:$0]  %s3569_s4, 256, %s5454_s18, [#allocation4], %s5449_s29, %s5449_s29, %s5448_s0   ;;  %vm3561_vm0 = vcmask 0  }
0x3a00   :  { %s4447_s0 = smov [#allocation19]  }
0x3a01   :  { %s3595_s29 = sshll.u32 %s4447_s0, 4  ;;  %s3596_s29 = int_to_ptr.vmem [resolvable:$true] %s3595_s29 }
0x3a02   :  { %s4388_s28 = scalar_lea.vmem %s3596_s29, 16  ;;  %s4392_s19 = scalar_lea.vmem %s3596_s29, 32 }
0x3a03   :  { %p4389_p10 = scmp.ne.s32.totalorder %s3596_s29, %s4388_s28  ;;  %p4393_p11 = scmp.lt.s32.totalorder %s3596_s29, %s3596_s29 }
0x3a04   :  { %p4394_p12 = scmp.lt.s32.totalorder %s4392_s19, %s4388_s28 }
0x3a06   :  { %p4395_p13 = por %p4394_p12, %p4393_p11 }
0x3a08   :  { %p4396_p0 = pnand %p4395_p13, %p4389_p10 }
0x3a6a   :  { %v3536_v60 = vpop.xlane.xlu1 %3535 }
0x3a6b   :  { %v3537_v61 = vrot.slane %v3536_v60, 4 }
0x3a6d   :  { %v3538_v55 = vadd.f32 %v3537_v61, %v3536_v60 }
0x3a6e   :  { %v3549_v49 = vpop.xlane.xlu1 %3548 }
0x3a6f   :  { %v3539_v62 = vrot.slane %v3538_v55, 2  ;;  %v3550_v1 = vrot.slane %v3549_v49, 4 }
0x3a71   :  { %v3551_v3 = vadd.f32 %v3550_v1, %v3549_v49  ;;  %v3540_v4 = vadd.f32 %v3539_v62, %v3538_v55 }
0x3a73   :  { %v3552_v18 = vrot.slane %v3551_v3, 2  ;;  %v3541_v5 = vrot.slane %v3540_v4, 1 }
0x3a75   :  { %v3553_v6 = vadd.f32 %v3552_v18, %v3551_v3  ;;  %v3542_v52 = vadd.f32 %v3541_v5, %v3540_v4 }
0x3a77   :  { %4020 = vpush %v3542_v52  ;;  %v3554_v9 = vrot.slane %v3553_v6, 1 }
0x3a79   :  { %v3555_v10 = vadd.f32 %v3554_v9, %v3553_v6 }
0x3a7b   :  { %4022 = vpush %v3555_v10 }
0x3aa8   :  { %s4021_s27 = spop %4020 }
0x3aa9   :  { %v3544_v12 = vstv %s4021_s27 }
0x3aaa   :  { %v3558_v26 = vsub.f32 0.0, %v3544_v12 }
0x3aac   :  { %s4023_s1 = spop %4022 }
0x3aad   :  { %v3557_v11 = vstv %s4023_s1 }
0x3aae   :  { %4166 = vrcp.f32 %v3557_v11 }
0x3ab8   :  { %v4167_v14 = vpop.eup %4166 }
0x3ab9   :  { %v3560_v15 = vmul.f32 %v4167_v14, %v3558_v26 }
0x3abb   :  { %3562 = vst.msk [vmem:[#allocation19] sm:$0x1] %vm3561_vm0, %v3560_v15 }
0x3abc   :  { %4399 = shalt.err (!%p4396_p0)
}
0x3abd   :  { %s5455_s4 = sld [smem:[#allocation34_spill]] }
0x3ac3   :  { %s4400_s24 = scalar_lea.hbm %s5455_s4, 16 }
0x3ac4   :  { %p4401_p1 = scmp.ne.s32.totalorder %s5455_s4, %s4400_s24  ;;  %p4404_p2 = scmp.lt.u32.totalorder %s4400_s24, %s5455_s4 }
0x3ac6   :  { %p4406_p3 = pnand %p4404_p2, %p4401_p1 }
0x3ac8   :  { %4409 = shalt.err (!%p4406_p3)
}
0x3ac9   :  { %3598 = dma.vmem_to_hbm [thread:$0]  %s3596_s29, 16, %s5455_s4, [#allocation18]  }
0x3aca   :  { %4420 = dma.done.wait [#allocation4], 256  }
0x3acb   :  { %4421 = vsyncadd [#allocation4], 4294967040 }
0x3acc   :  { %4422 = dma.done.wait [#allocation18], 272  }
0x3acd   :  { %4423 = vsyncadd [#allocation18], 4294967024 }
0x3ace   :  { %3610 = vsyncpa [#allocation3], 1 }
0x3acf   :  { %3611 = vsyncpa [#allocation6], 1 }
0x3ad0   :  { %3612 = vsyncpa [#allocation9], 1 }
0x3ad1   :  { %3613 = vsyncpa [#allocation12], 1 }
0x3ad2   :  { %3614 = vsyncpa [#allocation15], 1 }
0x3ad3   :  { %3615 = vsyncpa [#allocation4], 1 }
0x3ad4   :  { %3616 = vsyncpa [#allocation18], 1 }

</bundles_post_ra>
